<compile_context>
chip_gen: v6e
topology: v6e:2x2x1
jax: 0.10.0
libtpu: 0.0.40
codegen_flags: <defaults>
</compile_context>

<pallas_src>
import functools

import jax
import jax.numpy as jnp
from jax.experimental import pallas as pl
from jax.experimental.pallas import tpu as pltpu


def mf_forward_kernel(i_idx_ref, u_ref, item_hbm_ref, out_ref, item_buf, sem):
    """One grid step scores TB batch rows against their N candidate items.

    i_idx_ref    : SMEM (B_pad*N,) int32  flattened item indices (scalar prefetch)
    u_ref        : VMEM (TB, D)           user embedding rows of this tile
    item_hbm_ref : HBM  (n_items, D)      full item embedding table (never copied whole)
    out_ref      : VMEM (TB, N)           scores for this tile
    item_buf     : VMEM (TB, N, D)        scratch for the gathered item rows
    sem          : scalar DMA semaphore
    """
    t = pl.program_id(0)
    tb, n_scores, _ = item_buf.shape
    n_items = item_hbm_ref.shape[0]
    base = t * (tb * n_scores)

    # Issue one row-gather DMA per (batch row, candidate item).
    for r in range(tb):
        for n in range(n_scores):
            idx = i_idx_ref[base + r * n_scores + n]
            idx = jnp.clip(idx, 0, n_items - 1)  # guard against OOB -> no DMA fault
            pltpu.make_async_copy(
                item_hbm_ref.at[pl.ds(idx, 1), :],
                item_buf.at[r, pl.ds(n, 1), :],
                sem,
            ).start()

    # Wait for every issued copy (same semaphore; one matching wait per copy).
    for r in range(tb):
        for n in range(n_scores):
            pltpu.make_async_copy(
                item_hbm_ref.at[pl.ds(0, 1), :],
                item_buf.at[r, pl.ds(n, 1), :],
                sem,
            ).wait()

    # Vectorized combine: one fused multiply + a single lane-axis reduction (f32 acc).
    u = u_ref[...].astype(jnp.float32)                 # (TB, D)
    items = item_buf[...].astype(jnp.float32)          # (TB, N, D)
    scores = jnp.sum(u[:, None, :] * items, axis=-1)   # (TB, N)
    out_ref[...] = scores.astype(out_ref.dtype)


@functools.partial(jax.jit, static_argnames=("tb",))
def mf_forward(u_idxs, i_idxs, user_emb, item_emb, *, tb=8):
    """Pallas implementation of SGDBasedRecommenderAlgorithm.forward (MF instantiation)."""
    B = u_idxs.shape[0]
    N = i_idxs.shape[1]
    D = user_emb.shape[1]

    # get_user_representations: tiny (B, D) row gather, done in XLA (cheap).
    u_rows = jnp.take(user_emb, u_idxs.astype(jnp.int32), axis=0)  # (B, D)

    # Pad the batch to a multiple of the tile size (padded rows sliced off at the end).
    b_pad = ((B + tb - 1) // tb) * tb
    if b_pad != B:
        u_rows = jnp.pad(u_rows, ((0, b_pad - B), (0, 0)))
        i_idxs = jnp.pad(i_idxs, ((0, b_pad - B), (0, 0)))  # pads with index 0 (valid row)

    i_idx_flat = i_idxs.reshape(-1).astype(jnp.int32)        # 1-D -> no SMEM lane padding
    num_tiles = b_pad // tb

    grid_spec = pltpu.PrefetchScalarGridSpec(
        num_scalar_prefetch=1,
        grid=(num_tiles,),
        in_specs=[
            pl.BlockSpec((tb, D), lambda t, i_idx: (t, 0)),  # user rows, 8-row tiles
            pl.BlockSpec(memory_space=pl.ANY),               # item table stays in HBM
        ],
        out_specs=pl.BlockSpec((tb, N), lambda t, i_idx: (t, 0)),
        scratch_shapes=[
            pltpu.VMEM((tb, N, D), item_emb.dtype),
            pltpu.SemaphoreType.DMA(()),
        ],
    )

    out = pl.pallas_call(
        mf_forward_kernel,
        out_shape=jax.ShapeDtypeStruct((b_pad, N), jnp.float32),
        grid_spec=grid_spec,
        compiler_params=pltpu.CompilerParams(
            dimension_semantics=("parallel",),  # independent tiles -> megacore on v7x
        ),
    )(i_idx_flat, u_rows, item_emb)

    return out[:B]


if __name__ == "__main__":
    # Deterministic synthetic parameters (no checkpoint loading).
    key = jax.random.PRNGKey(0)
    k_u, k_i, k_uid, k_iid = jax.random.split(key, 4)

    n_users, n_items, D = 64, 1024, 128  # embedding tables (item table lives in HBM)
    B, n_neg = 12, 4                     # batch size (not a tile multiple), negatives
    N = n_neg + 1

    user_emb = jax.random.normal(k_u, (n_users, D), dtype=jnp.float32) * 0.1
    item_emb = jax.random.normal(k_i, (n_items, D), dtype=jnp.float32) * 0.1

    u_idxs = jax.random.randint(k_uid, (B,), 0, n_users, dtype=jnp.int32)
    i_idxs = jax.random.randint(k_iid, (B, N), 0, n_items, dtype=jnp.int32)

    out = mf_forward(u_idxs, i_idxs, user_emb, item_emb)
    out = jax.block_until_ready(out)

    # Pure-JAX reference: u_repr (B,D), i_repr (B,N,D), dot over D -> (B,N)
    ref = jnp.einsum("bd,bnd->bn", user_emb[u_idxs], item_emb[i_idxs])
    assert out.shape == (B, N)
    assert jnp.allclose(out, ref, atol=1e-5, rtol=1e-5), "mismatch vs reference"

    print("KERNEL_OK")
</pallas_src>

<mosaic_0001>
module attributes {stable_mosaic.version = 11 : i64} {
  func.func @mf_forward_kernel(%arg0: i32, %arg1: memref<80xi32, #tpu.memory_space<smem>>, %arg2: memref<8x128xf32, #tpu.memory_space<vmem>>, %arg3: memref<1024x128xf32, #tpu.memory_space<any>>, %arg4: memref<8x5xf32, #tpu.memory_space<vmem>>, %arg5: memref<8x5x128xf32, #tpu.memory_space<vmem>>, %arg6: memref<!tpu.dma_semaphore, #tpu.memory_space<semaphore_mem>>) attributes {dimension_semantics = [#tpu.dimension_semantics<parallel>], iteration_bounds = array<i64: 2>, scalar_prefetch = 1 : i64, scratch_operands = 2 : i64, tpu.core_type = #tpu.core_type<tc>, window_params = [{transform_indices = @transform_0, window_bounds = array<i64: 8, 128>}, {}, {transform_indices = @transform_2, window_bounds = array<i64: 8, 5>}]} {
    %c40_i32 = arith.constant 40 : i32
    %0 = arith.muli %arg0, %c40_i32 : i32
    %c0_i32 = arith.constant 0 : i32
    %1 = arith.addi %0, %c0_i32 : i32
    %c0_i32_0 = arith.constant 0 : i32
    %2 = arith.addi %1, %c0_i32_0 : i32
    %3 = arith.index_cast %2 : i32 to index
    %4 = memref.load %arg1[%3] : memref<80xi32, #tpu.memory_space<smem>>
    %c0_i32_1 = arith.constant 0 : i32
    %c1023_i32 = arith.constant 1023 : i32
    %5 = arith.maxsi %c0_i32_1, %4 : i32
    %6 = arith.minsi %c1023_i32, %5 : i32
    %c0_i32_2 = arith.constant 0 : i32
    %c0_i32_3 = arith.constant 0 : i32
    %7 = tpu.memref_slice %arg3[%6, %c0_i32_3] : memref<1024x128xf32, #tpu.memory_space<any>> -> memref<1x128xf32, #tpu.memory_space<any>>
    %c0_i32_4 = arith.constant 0 : i32
    %c0_i32_5 = arith.constant 0 : i32
    %8 = tpu.memref_slice %arg5[%c0_i32_2, %c0_i32_4, %c0_i32_5] : memref<8x5x128xf32, #tpu.memory_space<vmem>> -> memref<1x1x128xf32, #tpu.memory_space<vmem>>
    %9 = tpu.memref_squeeze %8 : memref<1x1x128xf32, #tpu.memory_space<vmem>> -> memref<1x128xf32, #tpu.memory_space<vmem>>
    tpu.enqueue_dma source(%7 : memref<1x128xf32, #tpu.memory_space<any>>) target(%9 : memref<1x128xf32, #tpu.memory_space<vmem>>) target_semaphore(%arg6 : memref<!tpu.dma_semaphore, #tpu.memory_space<semaphore_mem>>)
    %c0_i32_6 = arith.constant 0 : i32
    %10 = arith.addi %0, %c0_i32_6 : i32
    %c1_i32 = arith.constant 1 : i32
    %11 = arith.addi %10, %c1_i32 : i32
    %12 = arith.index_cast %11 : i32 to index
    %13 = memref.load %arg1[%12] : memref<80xi32, #tpu.memory_space<smem>>
    %c0_i32_7 = arith.constant 0 : i32
    %c1023_i32_8 = arith.constant 1023 : i32
    %14 = arith.maxsi %c0_i32_7, %13 : i32
    %15 = arith.minsi %c1023_i32_8, %14 : i32
    %c0_i32_9 = arith.constant 0 : i32
    %c0_i32_10 = arith.constant 0 : i32
    %16 = tpu.memref_slice %arg3[%15, %c0_i32_10] : memref<1024x128xf32, #tpu.memory_space<any>> -> memref<1x128xf32, #tpu.memory_space<any>>
    %c1_i32_11 = arith.constant 1 : i32
    %c0_i32_12 = arith.constant 0 : i32
    %17 = tpu.memref_slice %arg5[%c0_i32_9, %c1_i32_11, %c0_i32_12] : memref<8x5x128xf32, #tpu.memory_space<vmem>> -> memref<1x1x128xf32, #tpu.memory_space<vmem>>
    %18 = tpu.memref_squeeze %17 : memref<1x1x128xf32, #tpu.memory_space<vmem>> -> memref<1x128xf32, #tpu.memory_space<vmem>>
    tpu.enqueue_dma source(%16 : memref<1x128xf32, #tpu.memory_space<any>>) target(%18 : memref<1x128xf32, #tpu.memory_space<vmem>>) target_semaphore(%arg6 : memref<!tpu.dma_semaphore, #tpu.memory_space<semaphore_mem>>)
    %c0_i32_13 = arith.constant 0 : i32
    %19 = arith.addi %0, %c0_i32_13 : i32
    %c2_i32 = arith.constant 2 : i32
    %20 = arith.addi %19, %c2_i32 : i32
    %21 = arith.index_cast %20 : i32 to index
    %22 = memref.load %arg1[%21] : memref<80xi32, #tpu.memory_space<smem>>
    %c0_i32_14 = arith.constant 0 : i32
    %c1023_i32_15 = arith.constant 1023 : i32
    %23 = arith.maxsi %c0_i32_14, %22 : i32
    %24 = arith.minsi %c1023_i32_15, %23 : i32
    %c0_i32_16 = arith.constant 0 : i32
    %c0_i32_17 = arith.constant 0 : i32
    %25 = tpu.memref_slice %arg3[%24, %c0_i32_17] : memref<1024x128xf32, #tpu.memory_space<any>> -> memref<1x128xf32, #tpu.memory_space<any>>
    %c2_i32_18 = arith.constant 2 : i32
    %c0_i32_19 = arith.constant 0 : i32
    %26 = tpu.memref_slice %arg5[%c0_i32_16, %c2_i32_18, %c0_i32_19] : memref<8x5x128xf32, #tpu.memory_space<vmem>> -> memref<1x1x128xf32, #tpu.memory_space<vmem>>
    %27 = tpu.memref_squeeze %26 : memref<1x1x128xf32, #tpu.memory_space<vmem>> -> memref<1x128xf32, #tpu.memory_space<vmem>>
    tpu.enqueue_dma source(%25 : memref<1x128xf32, #tpu.memory_space<any>>) target(%27 : memref<1x128xf32, #tpu.memory_space<vmem>>) target_semaphore(%arg6 : memref<!tpu.dma_semaphore, #tpu.memory_space<semaphore_mem>>)
    %c0_i32_20 = arith.constant 0 : i32
    %28 = arith.addi %0, %c0_i32_20 : i32
    %c3_i32 = arith.constant 3 : i32
    %29 = arith.addi %28, %c3_i32 : i32
    %30 = arith.index_cast %29 : i32 to index
    %31 = memref.load %arg1[%30] : memref<80xi32, #tpu.memory_space<smem>>
    %c0_i32_21 = arith.constant 0 : i32
    %c1023_i32_22 = arith.constant 1023 : i32
    %32 = arith.maxsi %c0_i32_21, %31 : i32
    %33 = arith.minsi %c1023_i32_22, %32 : i32
    %c0_i32_23 = arith.constant 0 : i32
    %c0_i32_24 = arith.constant 0 : i32
    %34 = tpu.memref_slice %arg3[%33, %c0_i32_24] : memref<1024x128xf32, #tpu.memory_space<any>> -> memref<1x128xf32, #tpu.memory_space<any>>
    %c3_i32_25 = arith.constant 3 : i32
    %c0_i32_26 = arith.constant 0 : i32
    %35 = tpu.memref_slice %arg5[%c0_i32_23, %c3_i32_25, %c0_i32_26] : memref<8x5x128xf32, #tpu.memory_space<vmem>> -> memref<1x1x128xf32, #tpu.memory_space<vmem>>
    %36 = tpu.memref_squeeze %35 : memref<1x1x128xf32, #tpu.memory_space<vmem>> -> memref<1x128xf32, #tpu.memory_space<vmem>>
    tpu.enqueue_dma source(%34 : memref<1x128xf32, #tpu.memory_space<any>>) target(%36 : memref<1x128xf32, #tpu.memory_space<vmem>>) target_semaphore(%arg6 : memref<!tpu.dma_semaphore, #tpu.memory_space<semaphore_mem>>)
    %c0_i32_27 = arith.constant 0 : i32
    %37 = arith.addi %0, %c0_i32_27 : i32
    %c4_i32 = arith.constant 4 : i32
    %38 = arith.addi %37, %c4_i32 : i32
    %39 = arith.index_cast %38 : i32 to index
    %40 = memref.load %arg1[%39] : memref<80xi32, #tpu.memory_space<smem>>
    %c0_i32_28 = arith.constant 0 : i32
    %c1023_i32_29 = arith.constant 1023 : i32
    %41 = arith.maxsi %c0_i32_28, %40 : i32
    %42 = arith.minsi %c1023_i32_29, %41 : i32
    %c0_i32_30 = arith.constant 0 : i32
    %c0_i32_31 = arith.constant 0 : i32
    %43 = tpu.memref_slice %arg3[%42, %c0_i32_31] : memref<1024x128xf32, #tpu.memory_space<any>> -> memref<1x128xf32, #tpu.memory_space<any>>
    %c4_i32_32 = arith.constant 4 : i32
    %c0_i32_33 = arith.constant 0 : i32
    %44 = tpu.memref_slice %arg5[%c0_i32_30, %c4_i32_32, %c0_i32_33] : memref<8x5x128xf32, #tpu.memory_space<vmem>> -> memref<1x1x128xf32, #tpu.memory_space<vmem>>
    %45 = tpu.memref_squeeze %44 : memref<1x1x128xf32, #tpu.memory_space<vmem>> -> memref<1x128xf32, #tpu.memory_space<vmem>>
    tpu.enqueue_dma source(%43 : memref<1x128xf32, #tpu.memory_space<any>>) target(%45 : memref<1x128xf32, #tpu.memory_space<vmem>>) target_semaphore(%arg6 : memref<!tpu.dma_semaphore, #tpu.memory_space<semaphore_mem>>)
    %c5_i32 = arith.constant 5 : i32
    %46 = arith.addi %0, %c5_i32 : i32
    %c0_i32_34 = arith.constant 0 : i32
    %47 = arith.addi %46, %c0_i32_34 : i32
    %48 = arith.index_cast %47 : i32 to index
    %49 = memref.load %arg1[%48] : memref<80xi32, #tpu.memory_space<smem>>
    %c0_i32_35 = arith.constant 0 : i32
    %c1023_i32_36 = arith.constant 1023 : i32
    %50 = arith.maxsi %c0_i32_35, %49 : i32
    %51 = arith.minsi %c1023_i32_36, %50 : i32
    %c1_i32_37 = arith.constant 1 : i32
    %c0_i32_38 = arith.constant 0 : i32
    %52 = tpu.memref_slice %arg3[%51, %c0_i32_38] : memref<1024x128xf32, #tpu.memory_space<any>> -> memref<1x128xf32, #tpu.memory_space<any>>
    %c0_i32_39 = arith.constant 0 : i32
    %c0_i32_40 = arith.constant 0 : i32
    %53 = tpu.memref_slice %arg5[%c1_i32_37, %c0_i32_39, %c0_i32_40] : memref<8x5x128xf32, #tpu.memory_space<vmem>> -> memref<1x1x128xf32, #tpu.memory_space<vmem>>
    %54 = tpu.memref_squeeze %53 : memref<1x1x128xf32, #tpu.memory_space<vmem>> -> memref<1x128xf32, #tpu.memory_space<vmem>>
    tpu.enqueue_dma source(%52 : memref<1x128xf32, #tpu.memory_space<any>>) target(%54 : memref<1x128xf32, #tpu.memory_space<vmem>>) target_semaphore(%arg6 : memref<!tpu.dma_semaphore, #tpu.memory_space<semaphore_mem>>)
    %c5_i32_41 = arith.constant 5 : i32
    %55 = arith.addi %0, %c5_i32_41 : i32
    %c1_i32_42 = arith.constant 1 : i32
    %56 = arith.addi %55, %c1_i32_42 : i32
    %57 = arith.index_cast %56 : i32 to index
    %58 = memref.load %arg1[%57] : memref<80xi32, #tpu.memory_space<smem>>
    %c0_i32_43 = arith.constant 0 : i32
    %c1023_i32_44 = arith.constant 1023 : i32
    %59 = arith.maxsi %c0_i32_43, %58 : i32
    %60 = arith.minsi %c1023_i32_44, %59 : i32
    %c1_i32_45 = arith.constant 1 : i32
    %c0_i32_46 = arith.constant 0 : i32
    %61 = tpu.memref_slice %arg3[%60, %c0_i32_46] : memref<1024x128xf32, #tpu.memory_space<any>> -> memref<1x128xf32, #tpu.memory_space<any>>
    %c1_i32_47 = arith.constant 1 : i32
    %c0_i32_48 = arith.constant 0 : i32
    %62 = tpu.memref_slice %arg5[%c1_i32_45, %c1_i32_47, %c0_i32_48] : memref<8x5x128xf32, #tpu.memory_space<vmem>> -> memref<1x1x128xf32, #tpu.memory_space<vmem>>
    %63 = tpu.memref_squeeze %62 : memref<1x1x128xf32, #tpu.memory_space<vmem>> -> memref<1x128xf32, #tpu.memory_space<vmem>>
    tpu.enqueue_dma source(%61 : memref<1x128xf32, #tpu.memory_space<any>>) target(%63 : memref<1x128xf32, #tpu.memory_space<vmem>>) target_semaphore(%arg6 : memref<!tpu.dma_semaphore, #tpu.memory_space<semaphore_mem>>)
    %c5_i32_49 = arith.constant 5 : i32
    %64 = arith.addi %0, %c5_i32_49 : i32
    %c2_i32_50 = arith.constant 2 : i32
    %65 = arith.addi %64, %c2_i32_50 : i32
    %66 = arith.index_cast %65 : i32 to index
    %67 = memref.load %arg1[%66] : memref<80xi32, #tpu.memory_space<smem>>
    %c0_i32_51 = arith.constant 0 : i32
    %c1023_i32_52 = arith.constant 1023 : i32
    %68 = arith.maxsi %c0_i32_51, %67 : i32
    %69 = arith.minsi %c1023_i32_52, %68 : i32
    %c1_i32_53 = arith.constant 1 : i32
    %c0_i32_54 = arith.constant 0 : i32
    %70 = tpu.memref_slice %arg3[%69, %c0_i32_54] : memref<1024x128xf32, #tpu.memory_space<any>> -> memref<1x128xf32, #tpu.memory_space<any>>
    %c2_i32_55 = arith.constant 2 : i32
    %c0_i32_56 = arith.constant 0 : i32
    %71 = tpu.memref_slice %arg5[%c1_i32_53, %c2_i32_55, %c0_i32_56] : memref<8x5x128xf32, #tpu.memory_space<vmem>> -> memref<1x1x128xf32, #tpu.memory_space<vmem>>
    %72 = tpu.memref_squeeze %71 : memref<1x1x128xf32, #tpu.memory_space<vmem>> -> memref<1x128xf32, #tpu.memory_space<vmem>>
    tpu.enqueue_dma source(%70 : memref<1x128xf32, #tpu.memory_space<any>>) target(%72 : memref<1x128xf32, #tpu.memory_space<vmem>>) target_semaphore(%arg6 : memref<!tpu.dma_semaphore, #tpu.memory_space<semaphore_mem>>)
    %c5_i32_57 = arith.constant 5 : i32
    %73 = arith.addi %0, %c5_i32_57 : i32
    %c3_i32_58 = arith.constant 3 : i32
    %74 = arith.addi %73, %c3_i32_58 : i32
    %75 = arith.index_cast %74 : i32 to index
    %76 = memref.load %arg1[%75] : memref<80xi32, #tpu.memory_space<smem>>
    %c0_i32_59 = arith.constant 0 : i32
    %c1023_i32_60 = arith.constant 1023 : i32
    %77 = arith.maxsi %c0_i32_59, %76 : i32
    %78 = arith.minsi %c1023_i32_60, %77 : i32
    %c1_i32_61 = arith.constant 1 : i32
    %c0_i32_62 = arith.constant 0 : i32
    %79 = tpu.memref_slice %arg3[%78, %c0_i32_62] : memref<1024x128xf32, #tpu.memory_space<any>> -> memref<1x128xf32, #tpu.memory_space<any>>
    %c3_i32_63 = arith.constant 3 : i32
    %c0_i32_64 = arith.constant 0 : i32
    %80 = tpu.memref_slice %arg5[%c1_i32_61, %c3_i32_63, %c0_i32_64] : memref<8x5x128xf32, #tpu.memory_space<vmem>> -> memref<1x1x128xf32, #tpu.memory_space<vmem>>
    %81 = tpu.memref_squeeze %80 : memref<1x1x128xf32, #tpu.memory_space<vmem>> -> memref<1x128xf32, #tpu.memory_space<vmem>>
    tpu.enqueue_dma source(%79 : memref<1x128xf32, #tpu.memory_space<any>>) target(%81 : memref<1x128xf32, #tpu.memory_space<vmem>>) target_semaphore(%arg6 : memref<!tpu.dma_semaphore, #tpu.memory_space<semaphore_mem>>)
    %c5_i32_65 = arith.constant 5 : i32
    %82 = arith.addi %0, %c5_i32_65 : i32
    %c4_i32_66 = arith.constant 4 : i32
    %83 = arith.addi %82, %c4_i32_66 : i32
    %84 = arith.index_cast %83 : i32 to index
    %85 = memref.load %arg1[%84] : memref<80xi32, #tpu.memory_space<smem>>
    %c0_i32_67 = arith.constant 0 : i32
    %c1023_i32_68 = arith.constant 1023 : i32
    %86 = arith.maxsi %c0_i32_67, %85 : i32
    %87 = arith.minsi %c1023_i32_68, %86 : i32
    %c1_i32_69 = arith.constant 1 : i32
    %c0_i32_70 = arith.constant 0 : i32
    %88 = tpu.memref_slice %arg3[%87, %c0_i32_70] : memref<1024x128xf32, #tpu.memory_space<any>> -> memref<1x128xf32, #tpu.memory_space<any>>
    %c4_i32_71 = arith.constant 4 : i32
    %c0_i32_72 = arith.constant 0 : i32
    %89 = tpu.memref_slice %arg5[%c1_i32_69, %c4_i32_71, %c0_i32_72] : memref<8x5x128xf32, #tpu.memory_space<vmem>> -> memref<1x1x128xf32, #tpu.memory_space<vmem>>
    %90 = tpu.memref_squeeze %89 : memref<1x1x128xf32, #tpu.memory_space<vmem>> -> memref<1x128xf32, #tpu.memory_space<vmem>>
    tpu.enqueue_dma source(%88 : memref<1x128xf32, #tpu.memory_space<any>>) target(%90 : memref<1x128xf32, #tpu.memory_space<vmem>>) target_semaphore(%arg6 : memref<!tpu.dma_semaphore, #tpu.memory_space<semaphore_mem>>)
    %c10_i32 = arith.constant 10 : i32
    %91 = arith.addi %0, %c10_i32 : i32
    %c0_i32_73 = arith.constant 0 : i32
    %92 = arith.addi %91, %c0_i32_73 : i32
    %93 = arith.index_cast %92 : i32 to index
    %94 = memref.load %arg1[%93] : memref<80xi32, #tpu.memory_space<smem>>
    %c0_i32_74 = arith.constant 0 : i32
    %c1023_i32_75 = arith.constant 1023 : i32
    %95 = arith.maxsi %c0_i32_74, %94 : i32
    %96 = arith.minsi %c1023_i32_75, %95 : i32
    %c2_i32_76 = arith.constant 2 : i32
    %c0_i32_77 = arith.constant 0 : i32
    %97 = tpu.memref_slice %arg3[%96, %c0_i32_77] : memref<1024x128xf32, #tpu.memory_space<any>> -> memref<1x128xf32, #tpu.memory_space<any>>
    %c0_i32_78 = arith.constant 0 : i32
    %c0_i32_79 = arith.constant 0 : i32
    %98 = tpu.memref_slice %arg5[%c2_i32_76, %c0_i32_78, %c0_i32_79] : memref<8x5x128xf32, #tpu.memory_space<vmem>> -> memref<1x1x128xf32, #tpu.memory_space<vmem>>
    %99 = tpu.memref_squeeze %98 : memref<1x1x128xf32, #tpu.memory_space<vmem>> -> memref<1x128xf32, #tpu.memory_space<vmem>>
    tpu.enqueue_dma source(%97 : memref<1x128xf32, #tpu.memory_space<any>>) target(%99 : memref<1x128xf32, #tpu.memory_space<vmem>>) target_semaphore(%arg6 : memref<!tpu.dma_semaphore, #tpu.memory_space<semaphore_mem>>)
    %c10_i32_80 = arith.constant 10 : i32
    %100 = arith.addi %0, %c10_i32_80 : i32
    %c1_i32_81 = arith.constant 1 : i32
    %101 = arith.addi %100, %c1_i32_81 : i32
    %102 = arith.index_cast %101 : i32 to index
    %103 = memref.load %arg1[%102] : memref<80xi32, #tpu.memory_space<smem>>
    %c0_i32_82 = arith.constant 0 : i32
    %c1023_i32_83 = arith.constant 1023 : i32
    %104 = arith.maxsi %c0_i32_82, %103 : i32
    %105 = arith.minsi %c1023_i32_83, %104 : i32
    %c2_i32_84 = arith.constant 2 : i32
    %c0_i32_85 = arith.constant 0 : i32
    %106 = tpu.memref_slice %arg3[%105, %c0_i32_85] : memref<1024x128xf32, #tpu.memory_space<any>> -> memref<1x128xf32, #tpu.memory_space<any>>
    %c1_i32_86 = arith.constant 1 : i32
    %c0_i32_87 = arith.constant 0 : i32
    %107 = tpu.memref_slice %arg5[%c2_i32_84, %c1_i32_86, %c0_i32_87] : memref<8x5x128xf32, #tpu.memory_space<vmem>> -> memref<1x1x128xf32, #tpu.memory_space<vmem>>
    %108 = tpu.memref_squeeze %107 : memref<1x1x128xf32, #tpu.memory_space<vmem>> -> memref<1x128xf32, #tpu.memory_space<vmem>>
    tpu.enqueue_dma source(%106 : memref<1x128xf32, #tpu.memory_space<any>>) target(%108 : memref<1x128xf32, #tpu.memory_space<vmem>>) target_semaphore(%arg6 : memref<!tpu.dma_semaphore, #tpu.memory_space<semaphore_mem>>)
    %c10_i32_88 = arith.constant 10 : i32
    %109 = arith.addi %0, %c10_i32_88 : i32
    %c2_i32_89 = arith.constant 2 : i32
    %110 = arith.addi %109, %c2_i32_89 : i32
    %111 = arith.index_cast %110 : i32 to index
    %112 = memref.load %arg1[%111] : memref<80xi32, #tpu.memory_space<smem>>
    %c0_i32_90 = arith.constant 0 : i32
    %c1023_i32_91 = arith.constant 1023 : i32
    %113 = arith.maxsi %c0_i32_90, %112 : i32
    %114 = arith.minsi %c1023_i32_91, %113 : i32
    %c2_i32_92 = arith.constant 2 : i32
    %c0_i32_93 = arith.constant 0 : i32
    %115 = tpu.memref_slice %arg3[%114, %c0_i32_93] : memref<1024x128xf32, #tpu.memory_space<any>> -> memref<1x128xf32, #tpu.memory_space<any>>
    %c2_i32_94 = arith.constant 2 : i32
    %c0_i32_95 = arith.constant 0 : i32
    %116 = tpu.memref_slice %arg5[%c2_i32_92, %c2_i32_94, %c0_i32_95] : memref<8x5x128xf32, #tpu.memory_space<vmem>> -> memref<1x1x128xf32, #tpu.memory_space<vmem>>
    %117 = tpu.memref_squeeze %116 : memref<1x1x128xf32, #tpu.memory_space<vmem>> -> memref<1x128xf32, #tpu.memory_space<vmem>>
    tpu.enqueue_dma source(%115 : memref<1x128xf32, #tpu.memory_space<any>>) target(%117 : memref<1x128xf32, #tpu.memory_space<vmem>>) target_semaphore(%arg6 : memref<!tpu.dma_semaphore, #tpu.memory_space<semaphore_mem>>)
    %c10_i32_96 = arith.constant 10 : i32
    %118 = arith.addi %0, %c10_i32_96 : i32
    %c3_i32_97 = arith.constant 3 : i32
    %119 = arith.addi %118, %c3_i32_97 : i32
    %120 = arith.index_cast %119 : i32 to index
    %121 = memref.load %arg1[%120] : memref<80xi32, #tpu.memory_space<smem>>
    %c0_i32_98 = arith.constant 0 : i32
    %c1023_i32_99 = arith.constant 1023 : i32
    %122 = arith.maxsi %c0_i32_98, %121 : i32
    %123 = arith.minsi %c1023_i32_99, %122 : i32
    %c2_i32_100 = arith.constant 2 : i32
    %c0_i32_101 = arith.constant 0 : i32
    %124 = tpu.memref_slice %arg3[%123, %c0_i32_101] : memref<1024x128xf32, #tpu.memory_space<any>> -> memref<1x128xf32, #tpu.memory_space<any>>
    %c3_i32_102 = arith.constant 3 : i32
    %c0_i32_103 = arith.constant 0 : i32
    %125 = tpu.memref_slice %arg5[%c2_i32_100, %c3_i32_102, %c0_i32_103] : memref<8x5x128xf32, #tpu.memory_space<vmem>> -> memref<1x1x128xf32, #tpu.memory_space<vmem>>
    %126 = tpu.memref_squeeze %125 : memref<1x1x128xf32, #tpu.memory_space<vmem>> -> memref<1x128xf32, #tpu.memory_space<vmem>>
    tpu.enqueue_dma source(%124 : memref<1x128xf32, #tpu.memory_space<any>>) target(%126 : memref<1x128xf32, #tpu.memory_space<vmem>>) target_semaphore(%arg6 : memref<!tpu.dma_semaphore, #tpu.memory_space<semaphore_mem>>)
    %c10_i32_104 = arith.constant 10 : i32
    %127 = arith.addi %0, %c10_i32_104 : i32
    %c4_i32_105 = arith.constant 4 : i32
    %128 = arith.addi %127, %c4_i32_105 : i32
    %129 = arith.index_cast %128 : i32 to index
    %130 = memref.load %arg1[%129] : memref<80xi32, #tpu.memory_space<smem>>
    %c0_i32_106 = arith.constant 0 : i32
    %c1023_i32_107 = arith.constant 1023 : i32
    %131 = arith.maxsi %c0_i32_106, %130 : i32
    %132 = arith.minsi %c1023_i32_107, %131 : i32
    %c2_i32_108 = arith.constant 2 : i32
    %c0_i32_109 = arith.constant 0 : i32
    %133 = tpu.memref_slice %arg3[%132, %c0_i32_109] : memref<1024x128xf32, #tpu.memory_space<any>> -> memref<1x128xf32, #tpu.memory_space<any>>
    %c4_i32_110 = arith.constant 4 : i32
    %c0_i32_111 = arith.constant 0 : i32
    %134 = tpu.memref_slice %arg5[%c2_i32_108, %c4_i32_110, %c0_i32_111] : memref<8x5x128xf32, #tpu.memory_space<vmem>> -> memref<1x1x128xf32, #tpu.memory_space<vmem>>
    %135 = tpu.memref_squeeze %134 : memref<1x1x128xf32, #tpu.memory_space<vmem>> -> memref<1x128xf32, #tpu.memory_space<vmem>>
    tpu.enqueue_dma source(%133 : memref<1x128xf32, #tpu.memory_space<any>>) target(%135 : memref<1x128xf32, #tpu.memory_space<vmem>>) target_semaphore(%arg6 : memref<!tpu.dma_semaphore, #tpu.memory_space<semaphore_mem>>)
    %c15_i32 = arith.constant 15 : i32
    %136 = arith.addi %0, %c15_i32 : i32
    %c0_i32_112 = arith.constant 0 : i32
    %137 = arith.addi %136, %c0_i32_112 : i32
    %138 = arith.index_cast %137 : i32 to index
    %139 = memref.load %arg1[%138] : memref<80xi32, #tpu.memory_space<smem>>
    %c0_i32_113 = arith.constant 0 : i32
    %c1023_i32_114 = arith.constant 1023 : i32
    %140 = arith.maxsi %c0_i32_113, %139 : i32
    %141 = arith.minsi %c1023_i32_114, %140 : i32
    %c3_i32_115 = arith.constant 3 : i32
    %c0_i32_116 = arith.constant 0 : i32
    %142 = tpu.memref_slice %arg3[%141, %c0_i32_116] : memref<1024x128xf32, #tpu.memory_space<any>> -> memref<1x128xf32, #tpu.memory_space<any>>
    %c0_i32_117 = arith.constant 0 : i32
    %c0_i32_118 = arith.constant 0 : i32
    %143 = tpu.memref_slice %arg5[%c3_i32_115, %c0_i32_117, %c0_i32_118] : memref<8x5x128xf32, #tpu.memory_space<vmem>> -> memref<1x1x128xf32, #tpu.memory_space<vmem>>
    %144 = tpu.memref_squeeze %143 : memref<1x1x128xf32, #tpu.memory_space<vmem>> -> memref<1x128xf32, #tpu.memory_space<vmem>>
    tpu.enqueue_dma source(%142 : memref<1x128xf32, #tpu.memory_space<any>>) target(%144 : memref<1x128xf32, #tpu.memory_space<vmem>>) target_semaphore(%arg6 : memref<!tpu.dma_semaphore, #tpu.memory_space<semaphore_mem>>)
    %c15_i32_119 = arith.constant 15 : i32
    %145 = arith.addi %0, %c15_i32_119 : i32
    %c1_i32_120 = arith.constant 1 : i32
    %146 = arith.addi %145, %c1_i32_120 : i32
    %147 = arith.index_cast %146 : i32 to index
    %148 = memref.load %arg1[%147] : memref<80xi32, #tpu.memory_space<smem>>
    %c0_i32_121 = arith.constant 0 : i32
    %c1023_i32_122 = arith.constant 1023 : i32
    %149 = arith.maxsi %c0_i32_121, %148 : i32
    %150 = arith.minsi %c1023_i32_122, %149 : i32
    %c3_i32_123 = arith.constant 3 : i32
    %c0_i32_124 = arith.constant 0 : i32
    %151 = tpu.memref_slice %arg3[%150, %c0_i32_124] : memref<1024x128xf32, #tpu.memory_space<any>> -> memref<1x128xf32, #tpu.memory_space<any>>
    %c1_i32_125 = arith.constant 1 : i32
    %c0_i32_126 = arith.constant 0 : i32
    %152 = tpu.memref_slice %arg5[%c3_i32_123, %c1_i32_125, %c0_i32_126] : memref<8x5x128xf32, #tpu.memory_space<vmem>> -> memref<1x1x128xf32, #tpu.memory_space<vmem>>
    %153 = tpu.memref_squeeze %152 : memref<1x1x128xf32, #tpu.memory_space<vmem>> -> memref<1x128xf32, #tpu.memory_space<vmem>>
    tpu.enqueue_dma source(%151 : memref<1x128xf32, #tpu.memory_space<any>>) target(%153 : memref<1x128xf32, #tpu.memory_space<vmem>>) target_semaphore(%arg6 : memref<!tpu.dma_semaphore, #tpu.memory_space<semaphore_mem>>)
    %c15_i32_127 = arith.constant 15 : i32
    %154 = arith.addi %0, %c15_i32_127 : i32
    %c2_i32_128 = arith.constant 2 : i32
    %155 = arith.addi %154, %c2_i32_128 : i32
    %156 = arith.index_cast %155 : i32 to index
    %157 = memref.load %arg1[%156] : memref<80xi32, #tpu.memory_space<smem>>
    %c0_i32_129 = arith.constant 0 : i32
    %c1023_i32_130 = arith.constant 1023 : i32
    %158 = arith.maxsi %c0_i32_129, %157 : i32
    %159 = arith.minsi %c1023_i32_130, %158 : i32
    %c3_i32_131 = arith.constant 3 : i32
    %c0_i32_132 = arith.constant 0 : i32
    %160 = tpu.memref_slice %arg3[%159, %c0_i32_132] : memref<1024x128xf32, #tpu.memory_space<any>> -> memref<1x128xf32, #tpu.memory_space<any>>
    %c2_i32_133 = arith.constant 2 : i32
    %c0_i32_134 = arith.constant 0 : i32
    %161 = tpu.memref_slice %arg5[%c3_i32_131, %c2_i32_133, %c0_i32_134] : memref<8x5x128xf32, #tpu.memory_space<vmem>> -> memref<1x1x128xf32, #tpu.memory_space<vmem>>
    %162 = tpu.memref_squeeze %161 : memref<1x1x128xf32, #tpu.memory_space<vmem>> -> memref<1x128xf32, #tpu.memory_space<vmem>>
    tpu.enqueue_dma source(%160 : memref<1x128xf32, #tpu.memory_space<any>>) target(%162 : memref<1x128xf32, #tpu.memory_space<vmem>>) target_semaphore(%arg6 : memref<!tpu.dma_semaphore, #tpu.memory_space<semaphore_mem>>)
    %c15_i32_135 = arith.constant 15 : i32
    %163 = arith.addi %0, %c15_i32_135 : i32
    %c3_i32_136 = arith.constant 3 : i32
    %164 = arith.addi %163, %c3_i32_136 : i32
    %165 = arith.index_cast %164 : i32 to index
    %166 = memref.load %arg1[%165] : memref<80xi32, #tpu.memory_space<smem>>
    %c0_i32_137 = arith.constant 0 : i32
    %c1023_i32_138 = arith.constant 1023 : i32
    %167 = arith.maxsi %c0_i32_137, %166 : i32
    %168 = arith.minsi %c1023_i32_138, %167 : i32
    %c3_i32_139 = arith.constant 3 : i32
    %c0_i32_140 = arith.constant 0 : i32
    %169 = tpu.memref_slice %arg3[%168, %c0_i32_140] : memref<1024x128xf32, #tpu.memory_space<any>> -> memref<1x128xf32, #tpu.memory_space<any>>
    %c3_i32_141 = arith.constant 3 : i32
    %c0_i32_142 = arith.constant 0 : i32
    %170 = tpu.memref_slice %arg5[%c3_i32_139, %c3_i32_141, %c0_i32_142] : memref<8x5x128xf32, #tpu.memory_space<vmem>> -> memref<1x1x128xf32, #tpu.memory_space<vmem>>
    %171 = tpu.memref_squeeze %170 : memref<1x1x128xf32, #tpu.memory_space<vmem>> -> memref<1x128xf32, #tpu.memory_space<vmem>>
    tpu.enqueue_dma source(%169 : memref<1x128xf32, #tpu.memory_space<any>>) target(%171 : memref<1x128xf32, #tpu.memory_space<vmem>>) target_semaphore(%arg6 : memref<!tpu.dma_semaphore, #tpu.memory_space<semaphore_mem>>)
    %c15_i32_143 = arith.constant 15 : i32
    %172 = arith.addi %0, %c15_i32_143 : i32
    %c4_i32_144 = arith.constant 4 : i32
    %173 = arith.addi %172, %c4_i32_144 : i32
    %174 = arith.index_cast %173 : i32 to index
    %175 = memref.load %arg1[%174] : memref<80xi32, #tpu.memory_space<smem>>
    %c0_i32_145 = arith.constant 0 : i32
    %c1023_i32_146 = arith.constant 1023 : i32
    %176 = arith.maxsi %c0_i32_145, %175 : i32
    %177 = arith.minsi %c1023_i32_146, %176 : i32
    %c3_i32_147 = arith.constant 3 : i32
    %c0_i32_148 = arith.constant 0 : i32
    %178 = tpu.memref_slice %arg3[%177, %c0_i32_148] : memref<1024x128xf32, #tpu.memory_space<any>> -> memref<1x128xf32, #tpu.memory_space<any>>
    %c4_i32_149 = arith.constant 4 : i32
    %c0_i32_150 = arith.constant 0 : i32
    %179 = tpu.memref_slice %arg5[%c3_i32_147, %c4_i32_149, %c0_i32_150] : memref<8x5x128xf32, #tpu.memory_space<vmem>> -> memref<1x1x128xf32, #tpu.memory_space<vmem>>
    %180 = tpu.memref_squeeze %179 : memref<1x1x128xf32, #tpu.memory_space<vmem>> -> memref<1x128xf32, #tpu.memory_space<vmem>>
    tpu.enqueue_dma source(%178 : memref<1x128xf32, #tpu.memory_space<any>>) target(%180 : memref<1x128xf32, #tpu.memory_space<vmem>>) target_semaphore(%arg6 : memref<!tpu.dma_semaphore, #tpu.memory_space<semaphore_mem>>)
    %c20_i32 = arith.constant 20 : i32
    %181 = arith.addi %0, %c20_i32 : i32
    %c0_i32_151 = arith.constant 0 : i32
    %182 = arith.addi %181, %c0_i32_151 : i32
    %183 = arith.index_cast %182 : i32 to index
    %184 = memref.load %arg1[%183] : memref<80xi32, #tpu.memory_space<smem>>
    %c0_i32_152 = arith.constant 0 : i32
    %c1023_i32_153 = arith.constant 1023 : i32
    %185 = arith.maxsi %c0_i32_152, %184 : i32
    %186 = arith.minsi %c1023_i32_153, %185 : i32
    %c4_i32_154 = arith.constant 4 : i32
    %c0_i32_155 = arith.constant 0 : i32
    %187 = tpu.memref_slice %arg3[%186, %c0_i32_155] : memref<1024x128xf32, #tpu.memory_space<any>> -> memref<1x128xf32, #tpu.memory_space<any>>
    %c0_i32_156 = arith.constant 0 : i32
    %c0_i32_157 = arith.constant 0 : i32
    %188 = tpu.memref_slice %arg5[%c4_i32_154, %c0_i32_156, %c0_i32_157] : memref<8x5x128xf32, #tpu.memory_space<vmem>> -> memref<1x1x128xf32, #tpu.memory_space<vmem>>
    %189 = tpu.memref_squeeze %188 : memref<1x1x128xf32, #tpu.memory_space<vmem>> -> memref<1x128xf32, #tpu.memory_space<vmem>>
    tpu.enqueue_dma source(%187 : memref<1x128xf32, #tpu.memory_space<any>>) target(%189 : memref<1x128xf32, #tpu.memory_space<vmem>>) target_semaphore(%arg6 : memref<!tpu.dma_semaphore, #tpu.memory_space<semaphore_mem>>)
    %c20_i32_158 = arith.constant 20 : i32
    %190 = arith.addi %0, %c20_i32_158 : i32
    %c1_i32_159 = arith.constant 1 : i32
    %191 = arith.addi %190, %c1_i32_159 : i32
    %192 = arith.index_cast %191 : i32 to index
    %193 = memref.load %arg1[%192] : memref<80xi32, #tpu.memory_space<smem>>
    %c0_i32_160 = arith.constant 0 : i32
    %c1023_i32_161 = arith.constant 1023 : i32
    %194 = arith.maxsi %c0_i32_160, %193 : i32
    %195 = arith.minsi %c1023_i32_161, %194 : i32
    %c4_i32_162 = arith.constant 4 : i32
    %c0_i32_163 = arith.constant 0 : i32
    %196 = tpu.memref_slice %arg3[%195, %c0_i32_163] : memref<1024x128xf32, #tpu.memory_space<any>> -> memref<1x128xf32, #tpu.memory_space<any>>
    %c1_i32_164 = arith.constant 1 : i32
    %c0_i32_165 = arith.constant 0 : i32
    %197 = tpu.memref_slice %arg5[%c4_i32_162, %c1_i32_164, %c0_i32_165] : memref<8x5x128xf32, #tpu.memory_space<vmem>> -> memref<1x1x128xf32, #tpu.memory_space<vmem>>
    %198 = tpu.memref_squeeze %197 : memref<1x1x128xf32, #tpu.memory_space<vmem>> -> memref<1x128xf32, #tpu.memory_space<vmem>>
    tpu.enqueue_dma source(%196 : memref<1x128xf32, #tpu.memory_space<any>>) target(%198 : memref<1x128xf32, #tpu.memory_space<vmem>>) target_semaphore(%arg6 : memref<!tpu.dma_semaphore, #tpu.memory_space<semaphore_mem>>)
    %c20_i32_166 = arith.constant 20 : i32
    %199 = arith.addi %0, %c20_i32_166 : i32
    %c2_i32_167 = arith.constant 2 : i32
    %200 = arith.addi %199, %c2_i32_167 : i32
    %201 = arith.index_cast %200 : i32 to index
    %202 = memref.load %arg1[%201] : memref<80xi32, #tpu.memory_space<smem>>
    %c0_i32_168 = arith.constant 0 : i32
    %c1023_i32_169 = arith.constant 1023 : i32
    %203 = arith.maxsi %c0_i32_168, %202 : i32
    %204 = arith.minsi %c1023_i32_169, %203 : i32
    %c4_i32_170 = arith.constant 4 : i32
    %c0_i32_171 = arith.constant 0 : i32
    %205 = tpu.memref_slice %arg3[%204, %c0_i32_171] : memref<1024x128xf32, #tpu.memory_space<any>> -> memref<1x128xf32, #tpu.memory_space<any>>
    %c2_i32_172 = arith.constant 2 : i32
    %c0_i32_173 = arith.constant 0 : i32
    %206 = tpu.memref_slice %arg5[%c4_i32_170, %c2_i32_172, %c0_i32_173] : memref<8x5x128xf32, #tpu.memory_space<vmem>> -> memref<1x1x128xf32, #tpu.memory_space<vmem>>
    %207 = tpu.memref_squeeze %206 : memref<1x1x128xf32, #tpu.memory_space<vmem>> -> memref<1x128xf32, #tpu.memory_space<vmem>>
    tpu.enqueue_dma source(%205 : memref<1x128xf32, #tpu.memory_space<any>>) target(%207 : memref<1x128xf32, #tpu.memory_space<vmem>>) target_semaphore(%arg6 : memref<!tpu.dma_semaphore, #tpu.memory_space<semaphore_mem>>)
    %c20_i32_174 = arith.constant 20 : i32
    %208 = arith.addi %0, %c20_i32_174 : i32
    %c3_i32_175 = arith.constant 3 : i32
    %209 = arith.addi %208, %c3_i32_175 : i32
    %210 = arith.index_cast %209 : i32 to index
    %211 = memref.load %arg1[%210] : memref<80xi32, #tpu.memory_space<smem>>
    %c0_i32_176 = arith.constant 0 : i32
    %c1023_i32_177 = arith.constant 1023 : i32
    %212 = arith.maxsi %c0_i32_176, %211 : i32
    %213 = arith.minsi %c1023_i32_177, %212 : i32
    %c4_i32_178 = arith.constant 4 : i32
    %c0_i32_179 = arith.constant 0 : i32
    %214 = tpu.memref_slice %arg3[%213, %c0_i32_179] : memref<1024x128xf32, #tpu.memory_space<any>> -> memref<1x128xf32, #tpu.memory_space<any>>
    %c3_i32_180 = arith.constant 3 : i32
    %c0_i32_181 = arith.constant 0 : i32
    %215 = tpu.memref_slice %arg5[%c4_i32_178, %c3_i32_180, %c0_i32_181] : memref<8x5x128xf32, #tpu.memory_space<vmem>> -> memref<1x1x128xf32, #tpu.memory_space<vmem>>
    %216 = tpu.memref_squeeze %215 : memref<1x1x128xf32, #tpu.memory_space<vmem>> -> memref<1x128xf32, #tpu.memory_space<vmem>>
    tpu.enqueue_dma source(%214 : memref<1x128xf32, #tpu.memory_space<any>>) target(%216 : memref<1x128xf32, #tpu.memory_space<vmem>>) target_semaphore(%arg6 : memref<!tpu.dma_semaphore, #tpu.memory_space<semaphore_mem>>)
    %c20_i32_182 = arith.constant 20 : i32
    %217 = arith.addi %0, %c20_i32_182 : i32
    %c4_i32_183 = arith.constant 4 : i32
    %218 = arith.addi %217, %c4_i32_183 : i32
    %219 = arith.index_cast %218 : i32 to index
    %220 = memref.load %arg1[%219] : memref<80xi32, #tpu.memory_space<smem>>
    %c0_i32_184 = arith.constant 0 : i32
    %c1023_i32_185 = arith.constant 1023 : i32
    %221 = arith.maxsi %c0_i32_184, %220 : i32
    %222 = arith.minsi %c1023_i32_185, %221 : i32
    %c4_i32_186 = arith.constant 4 : i32
    %c0_i32_187 = arith.constant 0 : i32
    %223 = tpu.memref_slice %arg3[%222, %c0_i32_187] : memref<1024x128xf32, #tpu.memory_space<any>> -> memref<1x128xf32, #tpu.memory_space<any>>
    %c4_i32_188 = arith.constant 4 : i32
    %c0_i32_189 = arith.constant 0 : i32
    %224 = tpu.memref_slice %arg5[%c4_i32_186, %c4_i32_188, %c0_i32_189] : memref<8x5x128xf32, #tpu.memory_space<vmem>> -> memref<1x1x128xf32, #tpu.memory_space<vmem>>
    %225 = tpu.memref_squeeze %224 : memref<1x1x128xf32, #tpu.memory_space<vmem>> -> memref<1x128xf32, #tpu.memory_space<vmem>>
    tpu.enqueue_dma source(%223 : memref<1x128xf32, #tpu.memory_space<any>>) target(%225 : memref<1x128xf32, #tpu.memory_space<vmem>>) target_semaphore(%arg6 : memref<!tpu.dma_semaphore, #tpu.memory_space<semaphore_mem>>)
    %c25_i32 = arith.constant 25 : i32
    %226 = arith.addi %0, %c25_i32 : i32
    %c0_i32_190 = arith.constant 0 : i32
    %227 = arith.addi %226, %c0_i32_190 : i32
    %228 = arith.index_cast %227 : i32 to index
    %229 = memref.load %arg1[%228] : memref<80xi32, #tpu.memory_space<smem>>
    %c0_i32_191 = arith.constant 0 : i32
    %c1023_i32_192 = arith.constant 1023 : i32
    %230 = arith.maxsi %c0_i32_191, %229 : i32
    %231 = arith.minsi %c1023_i32_192, %230 : i32
    %c5_i32_193 = arith.constant 5 : i32
    %c0_i32_194 = arith.constant 0 : i32
    %232 = tpu.memref_slice %arg3[%231, %c0_i32_194] : memref<1024x128xf32, #tpu.memory_space<any>> -> memref<1x128xf32, #tpu.memory_space<any>>
    %c0_i32_195 = arith.constant 0 : i32
    %c0_i32_196 = arith.constant 0 : i32
    %233 = tpu.memref_slice %arg5[%c5_i32_193, %c0_i32_195, %c0_i32_196] : memref<8x5x128xf32, #tpu.memory_space<vmem>> -> memref<1x1x128xf32, #tpu.memory_space<vmem>>
    %234 = tpu.memref_squeeze %233 : memref<1x1x128xf32, #tpu.memory_space<vmem>> -> memref<1x128xf32, #tpu.memory_space<vmem>>
    tpu.enqueue_dma source(%232 : memref<1x128xf32, #tpu.memory_space<any>>) target(%234 : memref<1x128xf32, #tpu.memory_space<vmem>>) target_semaphore(%arg6 : memref<!tpu.dma_semaphore, #tpu.memory_space<semaphore_mem>>)
    %c25_i32_197 = arith.constant 25 : i32
    %235 = arith.addi %0, %c25_i32_197 : i32
    %c1_i32_198 = arith.constant 1 : i32
    %236 = arith.addi %235, %c1_i32_198 : i32
    %237 = arith.index_cast %236 : i32 to index
    %238 = memref.load %arg1[%237] : memref<80xi32, #tpu.memory_space<smem>>
    %c0_i32_199 = arith.constant 0 : i32
    %c1023_i32_200 = arith.constant 1023 : i32
    %239 = arith.maxsi %c0_i32_199, %238 : i32
    %240 = arith.minsi %c1023_i32_200, %239 : i32
    %c5_i32_201 = arith.constant 5 : i32
    %c0_i32_202 = arith.constant 0 : i32
    %241 = tpu.memref_slice %arg3[%240, %c0_i32_202] : memref<1024x128xf32, #tpu.memory_space<any>> -> memref<1x128xf32, #tpu.memory_space<any>>
    %c1_i32_203 = arith.constant 1 : i32
    %c0_i32_204 = arith.constant 0 : i32
    %242 = tpu.memref_slice %arg5[%c5_i32_201, %c1_i32_203, %c0_i32_204] : memref<8x5x128xf32, #tpu.memory_space<vmem>> -> memref<1x1x128xf32, #tpu.memory_space<vmem>>
    %243 = tpu.memref_squeeze %242 : memref<1x1x128xf32, #tpu.memory_space<vmem>> -> memref<1x128xf32, #tpu.memory_space<vmem>>
    tpu.enqueue_dma source(%241 : memref<1x128xf32, #tpu.memory_space<any>>) target(%243 : memref<1x128xf32, #tpu.memory_space<vmem>>) target_semaphore(%arg6 : memref<!tpu.dma_semaphore, #tpu.memory_space<semaphore_mem>>)
    %c25_i32_205 = arith.constant 25 : i32
    %244 = arith.addi %0, %c25_i32_205 : i32
    %c2_i32_206 = arith.constant 2 : i32
    %245 = arith.addi %244, %c2_i32_206 : i32
    %246 = arith.index_cast %245 : i32 to index
    %247 = memref.load %arg1[%246] : memref<80xi32, #tpu.memory_space<smem>>
    %c0_i32_207 = arith.constant 0 : i32
    %c1023_i32_208 = arith.constant 1023 : i32
    %248 = arith.maxsi %c0_i32_207, %247 : i32
    %249 = arith.minsi %c1023_i32_208, %248 : i32
    %c5_i32_209 = arith.constant 5 : i32
    %c0_i32_210 = arith.constant 0 : i32
    %250 = tpu.memref_slice %arg3[%249, %c0_i32_210] : memref<1024x128xf32, #tpu.memory_space<any>> -> memref<1x128xf32, #tpu.memory_space<any>>
    %c2_i32_211 = arith.constant 2 : i32
    %c0_i32_212 = arith.constant 0 : i32
    %251 = tpu.memref_slice %arg5[%c5_i32_209, %c2_i32_211, %c0_i32_212] : memref<8x5x128xf32, #tpu.memory_space<vmem>> -> memref<1x1x128xf32, #tpu.memory_space<vmem>>
    %252 = tpu.memref_squeeze %251 : memref<1x1x128xf32, #tpu.memory_space<vmem>> -> memref<1x128xf32, #tpu.memory_space<vmem>>
    tpu.enqueue_dma source(%250 : memref<1x128xf32, #tpu.memory_space<any>>) target(%252 : memref<1x128xf32, #tpu.memory_space<vmem>>) target_semaphore(%arg6 : memref<!tpu.dma_semaphore, #tpu.memory_space<semaphore_mem>>)
    %c25_i32_213 = arith.constant 25 : i32
    %253 = arith.addi %0, %c25_i32_213 : i32
    %c3_i32_214 = arith.constant 3 : i32
    %254 = arith.addi %253, %c3_i32_214 : i32
    %255 = arith.index_cast %254 : i32 to index
    %256 = memref.load %arg1[%255] : memref<80xi32, #tpu.memory_space<smem>>
    %c0_i32_215 = arith.constant 0 : i32
    %c1023_i32_216 = arith.constant 1023 : i32
    %257 = arith.maxsi %c0_i32_215, %256 : i32
    %258 = arith.minsi %c1023_i32_216, %257 : i32
    %c5_i32_217 = arith.constant 5 : i32
    %c0_i32_218 = arith.constant 0 : i32
    %259 = tpu.memref_slice %arg3[%258, %c0_i32_218] : memref<1024x128xf32, #tpu.memory_space<any>> -> memref<1x128xf32, #tpu.memory_space<any>>
    %c3_i32_219 = arith.constant 3 : i32
    %c0_i32_220 = arith.constant 0 : i32
    %260 = tpu.memref_slice %arg5[%c5_i32_217, %c3_i32_219, %c0_i32_220] : memref<8x5x128xf32, #tpu.memory_space<vmem>> -> memref<1x1x128xf32, #tpu.memory_space<vmem>>
    %261 = tpu.memref_squeeze %260 : memref<1x1x128xf32, #tpu.memory_space<vmem>> -> memref<1x128xf32, #tpu.memory_space<vmem>>
    tpu.enqueue_dma source(%259 : memref<1x128xf32, #tpu.memory_space<any>>) target(%261 : memref<1x128xf32, #tpu.memory_space<vmem>>) target_semaphore(%arg6 : memref<!tpu.dma_semaphore, #tpu.memory_space<semaphore_mem>>)
    %c25_i32_221 = arith.constant 25 : i32
    %262 = arith.addi %0, %c25_i32_221 : i32
    %c4_i32_222 = arith.constant 4 : i32
    %263 = arith.addi %262, %c4_i32_222 : i32
    %264 = arith.index_cast %263 : i32 to index
    %265 = memref.load %arg1[%264] : memref<80xi32, #tpu.memory_space<smem>>
    %c0_i32_223 = arith.constant 0 : i32
    %c1023_i32_224 = arith.constant 1023 : i32
    %266 = arith.maxsi %c0_i32_223, %265 : i32
    %267 = arith.minsi %c1023_i32_224, %266 : i32
    %c5_i32_225 = arith.constant 5 : i32
    %c0_i32_226 = arith.constant 0 : i32
    %268 = tpu.memref_slice %arg3[%267, %c0_i32_226] : memref<1024x128xf32, #tpu.memory_space<any>> -> memref<1x128xf32, #tpu.memory_space<any>>
    %c4_i32_227 = arith.constant 4 : i32
    %c0_i32_228 = arith.constant 0 : i32
    %269 = tpu.memref_slice %arg5[%c5_i32_225, %c4_i32_227, %c0_i32_228] : memref<8x5x128xf32, #tpu.memory_space<vmem>> -> memref<1x1x128xf32, #tpu.memory_space<vmem>>
    %270 = tpu.memref_squeeze %269 : memref<1x1x128xf32, #tpu.memory_space<vmem>> -> memref<1x128xf32, #tpu.memory_space<vmem>>
    tpu.enqueue_dma source(%268 : memref<1x128xf32, #tpu.memory_space<any>>) target(%270 : memref<1x128xf32, #tpu.memory_space<vmem>>) target_semaphore(%arg6 : memref<!tpu.dma_semaphore, #tpu.memory_space<semaphore_mem>>)
    %c30_i32 = arith.constant 30 : i32
    %271 = arith.addi %0, %c30_i32 : i32
    %c0_i32_229 = arith.constant 0 : i32
    %272 = arith.addi %271, %c0_i32_229 : i32
    %273 = arith.index_cast %272 : i32 to index
    %274 = memref.load %arg1[%273] : memref<80xi32, #tpu.memory_space<smem>>
    %c0_i32_230 = arith.constant 0 : i32
    %c1023_i32_231 = arith.constant 1023 : i32
    %275 = arith.maxsi %c0_i32_230, %274 : i32
    %276 = arith.minsi %c1023_i32_231, %275 : i32
    %c6_i32 = arith.constant 6 : i32
    %c0_i32_232 = arith.constant 0 : i32
    %277 = tpu.memref_slice %arg3[%276, %c0_i32_232] : memref<1024x128xf32, #tpu.memory_space<any>> -> memref<1x128xf32, #tpu.memory_space<any>>
    %c0_i32_233 = arith.constant 0 : i32
    %c0_i32_234 = arith.constant 0 : i32
    %278 = tpu.memref_slice %arg5[%c6_i32, %c0_i32_233, %c0_i32_234] : memref<8x5x128xf32, #tpu.memory_space<vmem>> -> memref<1x1x128xf32, #tpu.memory_space<vmem>>
    %279 = tpu.memref_squeeze %278 : memref<1x1x128xf32, #tpu.memory_space<vmem>> -> memref<1x128xf32, #tpu.memory_space<vmem>>
    tpu.enqueue_dma source(%277 : memref<1x128xf32, #tpu.memory_space<any>>) target(%279 : memref<1x128xf32, #tpu.memory_space<vmem>>) target_semaphore(%arg6 : memref<!tpu.dma_semaphore, #tpu.memory_space<semaphore_mem>>)
    %c30_i32_235 = arith.constant 30 : i32
    %280 = arith.addi %0, %c30_i32_235 : i32
    %c1_i32_236 = arith.constant 1 : i32
    %281 = arith.addi %280, %c1_i32_236 : i32
    %282 = arith.index_cast %281 : i32 to index
    %283 = memref.load %arg1[%282] : memref<80xi32, #tpu.memory_space<smem>>
    %c0_i32_237 = arith.constant 0 : i32
    %c1023_i32_238 = arith.constant 1023 : i32
    %284 = arith.maxsi %c0_i32_237, %283 : i32
    %285 = arith.minsi %c1023_i32_238, %284 : i32
    %c6_i32_239 = arith.constant 6 : i32
    %c0_i32_240 = arith.constant 0 : i32
    %286 = tpu.memref_slice %arg3[%285, %c0_i32_240] : memref<1024x128xf32, #tpu.memory_space<any>> -> memref<1x128xf32, #tpu.memory_space<any>>
    %c1_i32_241 = arith.constant 1 : i32
    %c0_i32_242 = arith.constant 0 : i32
    %287 = tpu.memref_slice %arg5[%c6_i32_239, %c1_i32_241, %c0_i32_242] : memref<8x5x128xf32, #tpu.memory_space<vmem>> -> memref<1x1x128xf32, #tpu.memory_space<vmem>>
    %288 = tpu.memref_squeeze %287 : memref<1x1x128xf32, #tpu.memory_space<vmem>> -> memref<1x128xf32, #tpu.memory_space<vmem>>
    tpu.enqueue_dma source(%286 : memref<1x128xf32, #tpu.memory_space<any>>) target(%288 : memref<1x128xf32, #tpu.memory_space<vmem>>) target_semaphore(%arg6 : memref<!tpu.dma_semaphore, #tpu.memory_space<semaphore_mem>>)
    %c30_i32_243 = arith.constant 30 : i32
    %289 = arith.addi %0, %c30_i32_243 : i32
    %c2_i32_244 = arith.constant 2 : i32
    %290 = arith.addi %289, %c2_i32_244 : i32
    %291 = arith.index_cast %290 : i32 to index
    %292 = memref.load %arg1[%291] : memref<80xi32, #tpu.memory_space<smem>>
    %c0_i32_245 = arith.constant 0 : i32
    %c1023_i32_246 = arith.constant 1023 : i32
    %293 = arith.maxsi %c0_i32_245, %292 : i32
    %294 = arith.minsi %c1023_i32_246, %293 : i32
    %c6_i32_247 = arith.constant 6 : i32
    %c0_i32_248 = arith.constant 0 : i32
    %295 = tpu.memref_slice %arg3[%294, %c0_i32_248] : memref<1024x128xf32, #tpu.memory_space<any>> -> memref<1x128xf32, #tpu.memory_space<any>>
    %c2_i32_249 = arith.constant 2 : i32
    %c0_i32_250 = arith.constant 0 : i32
    %296 = tpu.memref_slice %arg5[%c6_i32_247, %c2_i32_249, %c0_i32_250] : memref<8x5x128xf32, #tpu.memory_space<vmem>> -> memref<1x1x128xf32, #tpu.memory_space<vmem>>
    %297 = tpu.memref_squeeze %296 : memref<1x1x128xf32, #tpu.memory_space<vmem>> -> memref<1x128xf32, #tpu.memory_space<vmem>>
    tpu.enqueue_dma source(%295 : memref<1x128xf32, #tpu.memory_space<any>>) target(%297 : memref<1x128xf32, #tpu.memory_space<vmem>>) target_semaphore(%arg6 : memref<!tpu.dma_semaphore, #tpu.memory_space<semaphore_mem>>)
    %c30_i32_251 = arith.constant 30 : i32
    %298 = arith.addi %0, %c30_i32_251 : i32
    %c3_i32_252 = arith.constant 3 : i32
    %299 = arith.addi %298, %c3_i32_252 : i32
    %300 = arith.index_cast %299 : i32 to index
    %301 = memref.load %arg1[%300] : memref<80xi32, #tpu.memory_space<smem>>
    %c0_i32_253 = arith.constant 0 : i32
    %c1023_i32_254 = arith.constant 1023 : i32
    %302 = arith.maxsi %c0_i32_253, %301 : i32
    %303 = arith.minsi %c1023_i32_254, %302 : i32
    %c6_i32_255 = arith.constant 6 : i32
    %c0_i32_256 = arith.constant 0 : i32
    %304 = tpu.memref_slice %arg3[%303, %c0_i32_256] : memref<1024x128xf32, #tpu.memory_space<any>> -> memref<1x128xf32, #tpu.memory_space<any>>
    %c3_i32_257 = arith.constant 3 : i32
    %c0_i32_258 = arith.constant 0 : i32
    %305 = tpu.memref_slice %arg5[%c6_i32_255, %c3_i32_257, %c0_i32_258] : memref<8x5x128xf32, #tpu.memory_space<vmem>> -> memref<1x1x128xf32, #tpu.memory_space<vmem>>
    %306 = tpu.memref_squeeze %305 : memref<1x1x128xf32, #tpu.memory_space<vmem>> -> memref<1x128xf32, #tpu.memory_space<vmem>>
    tpu.enqueue_dma source(%304 : memref<1x128xf32, #tpu.memory_space<any>>) target(%306 : memref<1x128xf32, #tpu.memory_space<vmem>>) target_semaphore(%arg6 : memref<!tpu.dma_semaphore, #tpu.memory_space<semaphore_mem>>)
    %c30_i32_259 = arith.constant 30 : i32
    %307 = arith.addi %0, %c30_i32_259 : i32
    %c4_i32_260 = arith.constant 4 : i32
    %308 = arith.addi %307, %c4_i32_260 : i32
    %309 = arith.index_cast %308 : i32 to index
    %310 = memref.load %arg1[%309] : memref<80xi32, #tpu.memory_space<smem>>
    %c0_i32_261 = arith.constant 0 : i32
    %c1023_i32_262 = arith.constant 1023 : i32
    %311 = arith.maxsi %c0_i32_261, %310 : i32
    %312 = arith.minsi %c1023_i32_262, %311 : i32
    %c6_i32_263 = arith.constant 6 : i32
    %c0_i32_264 = arith.constant 0 : i32
    %313 = tpu.memref_slice %arg3[%312, %c0_i32_264] : memref<1024x128xf32, #tpu.memory_space<any>> -> memref<1x128xf32, #tpu.memory_space<any>>
    %c4_i32_265 = arith.constant 4 : i32
    %c0_i32_266 = arith.constant 0 : i32
    %314 = tpu.memref_slice %arg5[%c6_i32_263, %c4_i32_265, %c0_i32_266] : memref<8x5x128xf32, #tpu.memory_space<vmem>> -> memref<1x1x128xf32, #tpu.memory_space<vmem>>
    %315 = tpu.memref_squeeze %314 : memref<1x1x128xf32, #tpu.memory_space<vmem>> -> memref<1x128xf32, #tpu.memory_space<vmem>>
    tpu.enqueue_dma source(%313 : memref<1x128xf32, #tpu.memory_space<any>>) target(%315 : memref<1x128xf32, #tpu.memory_space<vmem>>) target_semaphore(%arg6 : memref<!tpu.dma_semaphore, #tpu.memory_space<semaphore_mem>>)
    %c35_i32 = arith.constant 35 : i32
    %316 = arith.addi %0, %c35_i32 : i32
    %c0_i32_267 = arith.constant 0 : i32
    %317 = arith.addi %316, %c0_i32_267 : i32
    %318 = arith.index_cast %317 : i32 to index
    %319 = memref.load %arg1[%318] : memref<80xi32, #tpu.memory_space<smem>>
    %c0_i32_268 = arith.constant 0 : i32
    %c1023_i32_269 = arith.constant 1023 : i32
    %320 = arith.maxsi %c0_i32_268, %319 : i32
    %321 = arith.minsi %c1023_i32_269, %320 : i32
    %c7_i32 = arith.constant 7 : i32
    %c0_i32_270 = arith.constant 0 : i32
    %322 = tpu.memref_slice %arg3[%321, %c0_i32_270] : memref<1024x128xf32, #tpu.memory_space<any>> -> memref<1x128xf32, #tpu.memory_space<any>>
    %c0_i32_271 = arith.constant 0 : i32
    %c0_i32_272 = arith.constant 0 : i32
    %323 = tpu.memref_slice %arg5[%c7_i32, %c0_i32_271, %c0_i32_272] : memref<8x5x128xf32, #tpu.memory_space<vmem>> -> memref<1x1x128xf32, #tpu.memory_space<vmem>>
    %324 = tpu.memref_squeeze %323 : memref<1x1x128xf32, #tpu.memory_space<vmem>> -> memref<1x128xf32, #tpu.memory_space<vmem>>
    tpu.enqueue_dma source(%322 : memref<1x128xf32, #tpu.memory_space<any>>) target(%324 : memref<1x128xf32, #tpu.memory_space<vmem>>) target_semaphore(%arg6 : memref<!tpu.dma_semaphore, #tpu.memory_space<semaphore_mem>>)
    %c35_i32_273 = arith.constant 35 : i32
    %325 = arith.addi %0, %c35_i32_273 : i32
    %c1_i32_274 = arith.constant 1 : i32
    %326 = arith.addi %325, %c1_i32_274 : i32
    %327 = arith.index_cast %326 : i32 to index
    %328 = memref.load %arg1[%327] : memref<80xi32, #tpu.memory_space<smem>>
    %c0_i32_275 = arith.constant 0 : i32
    %c1023_i32_276 = arith.constant 1023 : i32
    %329 = arith.maxsi %c0_i32_275, %328 : i32
    %330 = arith.minsi %c1023_i32_276, %329 : i32
    %c7_i32_277 = arith.constant 7 : i32
    %c0_i32_278 = arith.constant 0 : i32
    %331 = tpu.memref_slice %arg3[%330, %c0_i32_278] : memref<1024x128xf32, #tpu.memory_space<any>> -> memref<1x128xf32, #tpu.memory_space<any>>
    %c1_i32_279 = arith.constant 1 : i32
    %c0_i32_280 = arith.constant 0 : i32
    %332 = tpu.memref_slice %arg5[%c7_i32_277, %c1_i32_279, %c0_i32_280] : memref<8x5x128xf32, #tpu.memory_space<vmem>> -> memref<1x1x128xf32, #tpu.memory_space<vmem>>
    %333 = tpu.memref_squeeze %332 : memref<1x1x128xf32, #tpu.memory_space<vmem>> -> memref<1x128xf32, #tpu.memory_space<vmem>>
    tpu.enqueue_dma source(%331 : memref<1x128xf32, #tpu.memory_space<any>>) target(%333 : memref<1x128xf32, #tpu.memory_space<vmem>>) target_semaphore(%arg6 : memref<!tpu.dma_semaphore, #tpu.memory_space<semaphore_mem>>)
    %c35_i32_281 = arith.constant 35 : i32
    %334 = arith.addi %0, %c35_i32_281 : i32
    %c2_i32_282 = arith.constant 2 : i32
    %335 = arith.addi %334, %c2_i32_282 : i32
    %336 = arith.index_cast %335 : i32 to index
    %337 = memref.load %arg1[%336] : memref<80xi32, #tpu.memory_space<smem>>
    %c0_i32_283 = arith.constant 0 : i32
    %c1023_i32_284 = arith.constant 1023 : i32
    %338 = arith.maxsi %c0_i32_283, %337 : i32
    %339 = arith.minsi %c1023_i32_284, %338 : i32
    %c7_i32_285 = arith.constant 7 : i32
    %c0_i32_286 = arith.constant 0 : i32
    %340 = tpu.memref_slice %arg3[%339, %c0_i32_286] : memref<1024x128xf32, #tpu.memory_space<any>> -> memref<1x128xf32, #tpu.memory_space<any>>
    %c2_i32_287 = arith.constant 2 : i32
    %c0_i32_288 = arith.constant 0 : i32
    %341 = tpu.memref_slice %arg5[%c7_i32_285, %c2_i32_287, %c0_i32_288] : memref<8x5x128xf32, #tpu.memory_space<vmem>> -> memref<1x1x128xf32, #tpu.memory_space<vmem>>
    %342 = tpu.memref_squeeze %341 : memref<1x1x128xf32, #tpu.memory_space<vmem>> -> memref<1x128xf32, #tpu.memory_space<vmem>>
    tpu.enqueue_dma source(%340 : memref<1x128xf32, #tpu.memory_space<any>>) target(%342 : memref<1x128xf32, #tpu.memory_space<vmem>>) target_semaphore(%arg6 : memref<!tpu.dma_semaphore, #tpu.memory_space<semaphore_mem>>)
    %c35_i32_289 = arith.constant 35 : i32
    %343 = arith.addi %0, %c35_i32_289 : i32
    %c3_i32_290 = arith.constant 3 : i32
    %344 = arith.addi %343, %c3_i32_290 : i32
    %345 = arith.index_cast %344 : i32 to index
    %346 = memref.load %arg1[%345] : memref<80xi32, #tpu.memory_space<smem>>
    %c0_i32_291 = arith.constant 0 : i32
    %c1023_i32_292 = arith.constant 1023 : i32
    %347 = arith.maxsi %c0_i32_291, %346 : i32
    %348 = arith.minsi %c1023_i32_292, %347 : i32
    %c7_i32_293 = arith.constant 7 : i32
    %c0_i32_294 = arith.constant 0 : i32
    %349 = tpu.memref_slice %arg3[%348, %c0_i32_294] : memref<1024x128xf32, #tpu.memory_space<any>> -> memref<1x128xf32, #tpu.memory_space<any>>
    %c3_i32_295 = arith.constant 3 : i32
    %c0_i32_296 = arith.constant 0 : i32
    %350 = tpu.memref_slice %arg5[%c7_i32_293, %c3_i32_295, %c0_i32_296] : memref<8x5x128xf32, #tpu.memory_space<vmem>> -> memref<1x1x128xf32, #tpu.memory_space<vmem>>
    %351 = tpu.memref_squeeze %350 : memref<1x1x128xf32, #tpu.memory_space<vmem>> -> memref<1x128xf32, #tpu.memory_space<vmem>>
    tpu.enqueue_dma source(%349 : memref<1x128xf32, #tpu.memory_space<any>>) target(%351 : memref<1x128xf32, #tpu.memory_space<vmem>>) target_semaphore(%arg6 : memref<!tpu.dma_semaphore, #tpu.memory_space<semaphore_mem>>)
    %c35_i32_297 = arith.constant 35 : i32
    %352 = arith.addi %0, %c35_i32_297 : i32
    %c4_i32_298 = arith.constant 4 : i32
    %353 = arith.addi %352, %c4_i32_298 : i32
    %354 = arith.index_cast %353 : i32 to index
    %355 = memref.load %arg1[%354] : memref<80xi32, #tpu.memory_space<smem>>
    %c0_i32_299 = arith.constant 0 : i32
    %c1023_i32_300 = arith.constant 1023 : i32
    %356 = arith.maxsi %c0_i32_299, %355 : i32
    %357 = arith.minsi %c1023_i32_300, %356 : i32
    %c7_i32_301 = arith.constant 7 : i32
    %c0_i32_302 = arith.constant 0 : i32
    %358 = tpu.memref_slice %arg3[%357, %c0_i32_302] : memref<1024x128xf32, #tpu.memory_space<any>> -> memref<1x128xf32, #tpu.memory_space<any>>
    %c4_i32_303 = arith.constant 4 : i32
    %c0_i32_304 = arith.constant 0 : i32
    %359 = tpu.memref_slice %arg5[%c7_i32_301, %c4_i32_303, %c0_i32_304] : memref<8x5x128xf32, #tpu.memory_space<vmem>> -> memref<1x1x128xf32, #tpu.memory_space<vmem>>
    %360 = tpu.memref_squeeze %359 : memref<1x1x128xf32, #tpu.memory_space<vmem>> -> memref<1x128xf32, #tpu.memory_space<vmem>>
    tpu.enqueue_dma source(%358 : memref<1x128xf32, #tpu.memory_space<any>>) target(%360 : memref<1x128xf32, #tpu.memory_space<vmem>>) target_semaphore(%arg6 : memref<!tpu.dma_semaphore, #tpu.memory_space<semaphore_mem>>)
    %c0_i32_305 = arith.constant 0 : i32
    %c0_i32_306 = arith.constant 0 : i32
    %c0_i32_307 = arith.constant 0 : i32
    %361 = tpu.memref_slice %arg3[%c0_i32_306, %c0_i32_307] : memref<1024x128xf32, #tpu.memory_space<any>> -> memref<1x128xf32, #tpu.memory_space<any>>
    %c0_i32_308 = arith.constant 0 : i32
    %c0_i32_309 = arith.constant 0 : i32
    %362 = tpu.memref_slice %arg5[%c0_i32_305, %c0_i32_308, %c0_i32_309] : memref<8x5x128xf32, #tpu.memory_space<vmem>> -> memref<1x1x128xf32, #tpu.memory_space<vmem>>
    %363 = tpu.memref_squeeze %362 : memref<1x1x128xf32, #tpu.memory_space<vmem>> -> memref<1x128xf32, #tpu.memory_space<vmem>>
    tpu.wait_dma2 semaphore(%arg6 : memref<!tpu.dma_semaphore, #tpu.memory_space<semaphore_mem>>) src(%361 : memref<1x128xf32, #tpu.memory_space<any>>) dst(%363 : memref<1x128xf32, #tpu.memory_space<vmem>>)
    %c0_i32_310 = arith.constant 0 : i32
    %c0_i32_311 = arith.constant 0 : i32
    %c0_i32_312 = arith.constant 0 : i32
    %364 = tpu.memref_slice %arg3[%c0_i32_311, %c0_i32_312] : memref<1024x128xf32, #tpu.memory_space<any>> -> memref<1x128xf32, #tpu.memory_space<any>>
    %c1_i32_313 = arith.constant 1 : i32
    %c0_i32_314 = arith.constant 0 : i32
    %365 = tpu.memref_slice %arg5[%c0_i32_310, %c1_i32_313, %c0_i32_314] : memref<8x5x128xf32, #tpu.memory_space<vmem>> -> memref<1x1x128xf32, #tpu.memory_space<vmem>>
    %366 = tpu.memref_squeeze %365 : memref<1x1x128xf32, #tpu.memory_space<vmem>> -> memref<1x128xf32, #tpu.memory_space<vmem>>
    tpu.wait_dma2 semaphore(%arg6 : memref<!tpu.dma_semaphore, #tpu.memory_space<semaphore_mem>>) src(%364 : memref<1x128xf32, #tpu.memory_space<any>>) dst(%366 : memref<1x128xf32, #tpu.memory_space<vmem>>)
    %c0_i32_315 = arith.constant 0 : i32
    %c0_i32_316 = arith.constant 0 : i32
    %c0_i32_317 = arith.constant 0 : i32
    %367 = tpu.memref_slice %arg3[%c0_i32_316, %c0_i32_317] : memref<1024x128xf32, #tpu.memory_space<any>> -> memref<1x128xf32, #tpu.memory_space<any>>
    %c2_i32_318 = arith.constant 2 : i32
    %c0_i32_319 = arith.constant 0 : i32
    %368 = tpu.memref_slice %arg5[%c0_i32_315, %c2_i32_318, %c0_i32_319] : memref<8x5x128xf32, #tpu.memory_space<vmem>> -> memref<1x1x128xf32, #tpu.memory_space<vmem>>
    %369 = tpu.memref_squeeze %368 : memref<1x1x128xf32, #tpu.memory_space<vmem>> -> memref<1x128xf32, #tpu.memory_space<vmem>>
    tpu.wait_dma2 semaphore(%arg6 : memref<!tpu.dma_semaphore, #tpu.memory_space<semaphore_mem>>) src(%367 : memref<1x128xf32, #tpu.memory_space<any>>) dst(%369 : memref<1x128xf32, #tpu.memory_space<vmem>>)
    %c0_i32_320 = arith.constant 0 : i32
    %c0_i32_321 = arith.constant 0 : i32
    %c0_i32_322 = arith.constant 0 : i32
    %370 = tpu.memref_slice %arg3[%c0_i32_321, %c0_i32_322] : memref<1024x128xf32, #tpu.memory_space<any>> -> memref<1x128xf32, #tpu.memory_space<any>>
    %c3_i32_323 = arith.constant 3 : i32
    %c0_i32_324 = arith.constant 0 : i32
    %371 = tpu.memref_slice %arg5[%c0_i32_320, %c3_i32_323, %c0_i32_324] : memref<8x5x128xf32, #tpu.memory_space<vmem>> -> memref<1x1x128xf32, #tpu.memory_space<vmem>>
    %372 = tpu.memref_squeeze %371 : memref<1x1x128xf32, #tpu.memory_space<vmem>> -> memref<1x128xf32, #tpu.memory_space<vmem>>
    tpu.wait_dma2 semaphore(%arg6 : memref<!tpu.dma_semaphore, #tpu.memory_space<semaphore_mem>>) src(%370 : memref<1x128xf32, #tpu.memory_space<any>>) dst(%372 : memref<1x128xf32, #tpu.memory_space<vmem>>)
    %c0_i32_325 = arith.constant 0 : i32
    %c0_i32_326 = arith.constant 0 : i32
    %c0_i32_327 = arith.constant 0 : i32
    %373 = tpu.memref_slice %arg3[%c0_i32_326, %c0_i32_327] : memref<1024x128xf32, #tpu.memory_space<any>> -> memref<1x128xf32, #tpu.memory_space<any>>
    %c4_i32_328 = arith.constant 4 : i32
    %c0_i32_329 = arith.constant 0 : i32
    %374 = tpu.memref_slice %arg5[%c0_i32_325, %c4_i32_328, %c0_i32_329] : memref<8x5x128xf32, #tpu.memory_space<vmem>> -> memref<1x1x128xf32, #tpu.memory_space<vmem>>
    %375 = tpu.memref_squeeze %374 : memref<1x1x128xf32, #tpu.memory_space<vmem>> -> memref<1x128xf32, #tpu.memory_space<vmem>>
    tpu.wait_dma2 semaphore(%arg6 : memref<!tpu.dma_semaphore, #tpu.memory_space<semaphore_mem>>) src(%373 : memref<1x128xf32, #tpu.memory_space<any>>) dst(%375 : memref<1x128xf32, #tpu.memory_space<vmem>>)
    %c1_i32_330 = arith.constant 1 : i32
    %c0_i32_331 = arith.constant 0 : i32
    %c0_i32_332 = arith.constant 0 : i32
    %376 = tpu.memref_slice %arg3[%c0_i32_331, %c0_i32_332] : memref<1024x128xf32, #tpu.memory_space<any>> -> memref<1x128xf32, #tpu.memory_space<any>>
    %c0_i32_333 = arith.constant 0 : i32
    %c0_i32_334 = arith.constant 0 : i32
    %377 = tpu.memref_slice %arg5[%c1_i32_330, %c0_i32_333, %c0_i32_334] : memref<8x5x128xf32, #tpu.memory_space<vmem>> -> memref<1x1x128xf32, #tpu.memory_space<vmem>>
    %378 = tpu.memref_squeeze %377 : memref<1x1x128xf32, #tpu.memory_space<vmem>> -> memref<1x128xf32, #tpu.memory_space<vmem>>
    tpu.wait_dma2 semaphore(%arg6 : memref<!tpu.dma_semaphore, #tpu.memory_space<semaphore_mem>>) src(%376 : memref<1x128xf32, #tpu.memory_space<any>>) dst(%378 : memref<1x128xf32, #tpu.memory_space<vmem>>)
    %c1_i32_335 = arith.constant 1 : i32
    %c0_i32_336 = arith.constant 0 : i32
    %c0_i32_337 = arith.constant 0 : i32
    %379 = tpu.memref_slice %arg3[%c0_i32_336, %c0_i32_337] : memref<1024x128xf32, #tpu.memory_space<any>> -> memref<1x128xf32, #tpu.memory_space<any>>
    %c1_i32_338 = arith.constant 1 : i32
    %c0_i32_339 = arith.constant 0 : i32
    %380 = tpu.memref_slice %arg5[%c1_i32_335, %c1_i32_338, %c0_i32_339] : memref<8x5x128xf32, #tpu.memory_space<vmem>> -> memref<1x1x128xf32, #tpu.memory_space<vmem>>
    %381 = tpu.memref_squeeze %380 : memref<1x1x128xf32, #tpu.memory_space<vmem>> -> memref<1x128xf32, #tpu.memory_space<vmem>>
    tpu.wait_dma2 semaphore(%arg6 : memref<!tpu.dma_semaphore, #tpu.memory_space<semaphore_mem>>) src(%379 : memref<1x128xf32, #tpu.memory_space<any>>) dst(%381 : memref<1x128xf32, #tpu.memory_space<vmem>>)
    %c1_i32_340 = arith.constant 1 : i32
    %c0_i32_341 = arith.constant 0 : i32
    %c0_i32_342 = arith.constant 0 : i32
    %382 = tpu.memref_slice %arg3[%c0_i32_341, %c0_i32_342] : memref<1024x128xf32, #tpu.memory_space<any>> -> memref<1x128xf32, #tpu.memory_space<any>>
    %c2_i32_343 = arith.constant 2 : i32
    %c0_i32_344 = arith.constant 0 : i32
    %383 = tpu.memref_slice %arg5[%c1_i32_340, %c2_i32_343, %c0_i32_344] : memref<8x5x128xf32, #tpu.memory_space<vmem>> -> memref<1x1x128xf32, #tpu.memory_space<vmem>>
    %384 = tpu.memref_squeeze %383 : memref<1x1x128xf32, #tpu.memory_space<vmem>> -> memref<1x128xf32, #tpu.memory_space<vmem>>
    tpu.wait_dma2 semaphore(%arg6 : memref<!tpu.dma_semaphore, #tpu.memory_space<semaphore_mem>>) src(%382 : memref<1x128xf32, #tpu.memory_space<any>>) dst(%384 : memref<1x128xf32, #tpu.memory_space<vmem>>)
    %c1_i32_345 = arith.constant 1 : i32
    %c0_i32_346 = arith.constant 0 : i32
    %c0_i32_347 = arith.constant 0 : i32
    %385 = tpu.memref_slice %arg3[%c0_i32_346, %c0_i32_347] : memref<1024x128xf32, #tpu.memory_space<any>> -> memref<1x128xf32, #tpu.memory_space<any>>
    %c3_i32_348 = arith.constant 3 : i32
    %c0_i32_349 = arith.constant 0 : i32
    %386 = tpu.memref_slice %arg5[%c1_i32_345, %c3_i32_348, %c0_i32_349] : memref<8x5x128xf32, #tpu.memory_space<vmem>> -> memref<1x1x128xf32, #tpu.memory_space<vmem>>
    %387 = tpu.memref_squeeze %386 : memref<1x1x128xf32, #tpu.memory_space<vmem>> -> memref<1x128xf32, #tpu.memory_space<vmem>>
    tpu.wait_dma2 semaphore(%arg6 : memref<!tpu.dma_semaphore, #tpu.memory_space<semaphore_mem>>) src(%385 : memref<1x128xf32, #tpu.memory_space<any>>) dst(%387 : memref<1x128xf32, #tpu.memory_space<vmem>>)
    %c1_i32_350 = arith.constant 1 : i32
    %c0_i32_351 = arith.constant 0 : i32
    %c0_i32_352 = arith.constant 0 : i32
    %388 = tpu.memref_slice %arg3[%c0_i32_351, %c0_i32_352] : memref<1024x128xf32, #tpu.memory_space<any>> -> memref<1x128xf32, #tpu.memory_space<any>>
    %c4_i32_353 = arith.constant 4 : i32
    %c0_i32_354 = arith.constant 0 : i32
    %389 = tpu.memref_slice %arg5[%c1_i32_350, %c4_i32_353, %c0_i32_354] : memref<8x5x128xf32, #tpu.memory_space<vmem>> -> memref<1x1x128xf32, #tpu.memory_space<vmem>>
    %390 = tpu.memref_squeeze %389 : memref<1x1x128xf32, #tpu.memory_space<vmem>> -> memref<1x128xf32, #tpu.memory_space<vmem>>
    tpu.wait_dma2 semaphore(%arg6 : memref<!tpu.dma_semaphore, #tpu.memory_space<semaphore_mem>>) src(%388 : memref<1x128xf32, #tpu.memory_space<any>>) dst(%390 : memref<1x128xf32, #tpu.memory_space<vmem>>)
    %c2_i32_355 = arith.constant 2 : i32
    %c0_i32_356 = arith.constant 0 : i32
    %c0_i32_357 = arith.constant 0 : i32
    %391 = tpu.memref_slice %arg3[%c0_i32_356, %c0_i32_357] : memref<1024x128xf32, #tpu.memory_space<any>> -> memref<1x128xf32, #tpu.memory_space<any>>
    %c0_i32_358 = arith.constant 0 : i32
    %c0_i32_359 = arith.constant 0 : i32
    %392 = tpu.memref_slice %arg5[%c2_i32_355, %c0_i32_358, %c0_i32_359] : memref<8x5x128xf32, #tpu.memory_space<vmem>> -> memref<1x1x128xf32, #tpu.memory_space<vmem>>
    %393 = tpu.memref_squeeze %392 : memref<1x1x128xf32, #tpu.memory_space<vmem>> -> memref<1x128xf32, #tpu.memory_space<vmem>>
    tpu.wait_dma2 semaphore(%arg6 : memref<!tpu.dma_semaphore, #tpu.memory_space<semaphore_mem>>) src(%391 : memref<1x128xf32, #tpu.memory_space<any>>) dst(%393 : memref<1x128xf32, #tpu.memory_space<vmem>>)
    %c2_i32_360 = arith.constant 2 : i32
    %c0_i32_361 = arith.constant 0 : i32
    %c0_i32_362 = arith.constant 0 : i32
    %394 = tpu.memref_slice %arg3[%c0_i32_361, %c0_i32_362] : memref<1024x128xf32, #tpu.memory_space<any>> -> memref<1x128xf32, #tpu.memory_space<any>>
    %c1_i32_363 = arith.constant 1 : i32
    %c0_i32_364 = arith.constant 0 : i32
    %395 = tpu.memref_slice %arg5[%c2_i32_360, %c1_i32_363, %c0_i32_364] : memref<8x5x128xf32, #tpu.memory_space<vmem>> -> memref<1x1x128xf32, #tpu.memory_space<vmem>>
    %396 = tpu.memref_squeeze %395 : memref<1x1x128xf32, #tpu.memory_space<vmem>> -> memref<1x128xf32, #tpu.memory_space<vmem>>
    tpu.wait_dma2 semaphore(%arg6 : memref<!tpu.dma_semaphore, #tpu.memory_space<semaphore_mem>>) src(%394 : memref<1x128xf32, #tpu.memory_space<any>>) dst(%396 : memref<1x128xf32, #tpu.memory_space<vmem>>)
    %c2_i32_365 = arith.constant 2 : i32
    %c0_i32_366 = arith.constant 0 : i32
    %c0_i32_367 = arith.constant 0 : i32
    %397 = tpu.memref_slice %arg3[%c0_i32_366, %c0_i32_367] : memref<1024x128xf32, #tpu.memory_space<any>> -> memref<1x128xf32, #tpu.memory_space<any>>
    %c2_i32_368 = arith.constant 2 : i32
    %c0_i32_369 = arith.constant 0 : i32
    %398 = tpu.memref_slice %arg5[%c2_i32_365, %c2_i32_368, %c0_i32_369] : memref<8x5x128xf32, #tpu.memory_space<vmem>> -> memref<1x1x128xf32, #tpu.memory_space<vmem>>
    %399 = tpu.memref_squeeze %398 : memref<1x1x128xf32, #tpu.memory_space<vmem>> -> memref<1x128xf32, #tpu.memory_space<vmem>>
    tpu.wait_dma2 semaphore(%arg6 : memref<!tpu.dma_semaphore, #tpu.memory_space<semaphore_mem>>) src(%397 : memref<1x128xf32, #tpu.memory_space<any>>) dst(%399 : memref<1x128xf32, #tpu.memory_space<vmem>>)
    %c2_i32_370 = arith.constant 2 : i32
    %c0_i32_371 = arith.constant 0 : i32
    %c0_i32_372 = arith.constant 0 : i32
    %400 = tpu.memref_slice %arg3[%c0_i32_371, %c0_i32_372] : memref<1024x128xf32, #tpu.memory_space<any>> -> memref<1x128xf32, #tpu.memory_space<any>>
    %c3_i32_373 = arith.constant 3 : i32
    %c0_i32_374 = arith.constant 0 : i32
    %401 = tpu.memref_slice %arg5[%c2_i32_370, %c3_i32_373, %c0_i32_374] : memref<8x5x128xf32, #tpu.memory_space<vmem>> -> memref<1x1x128xf32, #tpu.memory_space<vmem>>
    %402 = tpu.memref_squeeze %401 : memref<1x1x128xf32, #tpu.memory_space<vmem>> -> memref<1x128xf32, #tpu.memory_space<vmem>>
    tpu.wait_dma2 semaphore(%arg6 : memref<!tpu.dma_semaphore, #tpu.memory_space<semaphore_mem>>) src(%400 : memref<1x128xf32, #tpu.memory_space<any>>) dst(%402 : memref<1x128xf32, #tpu.memory_space<vmem>>)
    %c2_i32_375 = arith.constant 2 : i32
    %c0_i32_376 = arith.constant 0 : i32
    %c0_i32_377 = arith.constant 0 : i32
    %403 = tpu.memref_slice %arg3[%c0_i32_376, %c0_i32_377] : memref<1024x128xf32, #tpu.memory_space<any>> -> memref<1x128xf32, #tpu.memory_space<any>>
    %c4_i32_378 = arith.constant 4 : i32
    %c0_i32_379 = arith.constant 0 : i32
    %404 = tpu.memref_slice %arg5[%c2_i32_375, %c4_i32_378, %c0_i32_379] : memref<8x5x128xf32, #tpu.memory_space<vmem>> -> memref<1x1x128xf32, #tpu.memory_space<vmem>>
    %405 = tpu.memref_squeeze %404 : memref<1x1x128xf32, #tpu.memory_space<vmem>> -> memref<1x128xf32, #tpu.memory_space<vmem>>
    tpu.wait_dma2 semaphore(%arg6 : memref<!tpu.dma_semaphore, #tpu.memory_space<semaphore_mem>>) src(%403 : memref<1x128xf32, #tpu.memory_space<any>>) dst(%405 : memref<1x128xf32, #tpu.memory_space<vmem>>)
    %c3_i32_380 = arith.constant 3 : i32
    %c0_i32_381 = arith.constant 0 : i32
    %c0_i32_382 = arith.constant 0 : i32
    %406 = tpu.memref_slice %arg3[%c0_i32_381, %c0_i32_382] : memref<1024x128xf32, #tpu.memory_space<any>> -> memref<1x128xf32, #tpu.memory_space<any>>
    %c0_i32_383 = arith.constant 0 : i32
    %c0_i32_384 = arith.constant 0 : i32
    %407 = tpu.memref_slice %arg5[%c3_i32_380, %c0_i32_383, %c0_i32_384] : memref<8x5x128xf32, #tpu.memory_space<vmem>> -> memref<1x1x128xf32, #tpu.memory_space<vmem>>
    %408 = tpu.memref_squeeze %407 : memref<1x1x128xf32, #tpu.memory_space<vmem>> -> memref<1x128xf32, #tpu.memory_space<vmem>>
    tpu.wait_dma2 semaphore(%arg6 : memref<!tpu.dma_semaphore, #tpu.memory_space<semaphore_mem>>) src(%406 : memref<1x128xf32, #tpu.memory_space<any>>) dst(%408 : memref<1x128xf32, #tpu.memory_space<vmem>>)
    %c3_i32_385 = arith.constant 3 : i32
    %c0_i32_386 = arith.constant 0 : i32
    %c0_i32_387 = arith.constant 0 : i32
    %409 = tpu.memref_slice %arg3[%c0_i32_386, %c0_i32_387] : memref<1024x128xf32, #tpu.memory_space<any>> -> memref<1x128xf32, #tpu.memory_space<any>>
    %c1_i32_388 = arith.constant 1 : i32
    %c0_i32_389 = arith.constant 0 : i32
    %410 = tpu.memref_slice %arg5[%c3_i32_385, %c1_i32_388, %c0_i32_389] : memref<8x5x128xf32, #tpu.memory_space<vmem>> -> memref<1x1x128xf32, #tpu.memory_space<vmem>>
    %411 = tpu.memref_squeeze %410 : memref<1x1x128xf32, #tpu.memory_space<vmem>> -> memref<1x128xf32, #tpu.memory_space<vmem>>
    tpu.wait_dma2 semaphore(%arg6 : memref<!tpu.dma_semaphore, #tpu.memory_space<semaphore_mem>>) src(%409 : memref<1x128xf32, #tpu.memory_space<any>>) dst(%411 : memref<1x128xf32, #tpu.memory_space<vmem>>)
    %c3_i32_390 = arith.constant 3 : i32
    %c0_i32_391 = arith.constant 0 : i32
    %c0_i32_392 = arith.constant 0 : i32
    %412 = tpu.memref_slice %arg3[%c0_i32_391, %c0_i32_392] : memref<1024x128xf32, #tpu.memory_space<any>> -> memref<1x128xf32, #tpu.memory_space<any>>
    %c2_i32_393 = arith.constant 2 : i32
    %c0_i32_394 = arith.constant 0 : i32
    %413 = tpu.memref_slice %arg5[%c3_i32_390, %c2_i32_393, %c0_i32_394] : memref<8x5x128xf32, #tpu.memory_space<vmem>> -> memref<1x1x128xf32, #tpu.memory_space<vmem>>
    %414 = tpu.memref_squeeze %413 : memref<1x1x128xf32, #tpu.memory_space<vmem>> -> memref<1x128xf32, #tpu.memory_space<vmem>>
    tpu.wait_dma2 semaphore(%arg6 : memref<!tpu.dma_semaphore, #tpu.memory_space<semaphore_mem>>) src(%412 : memref<1x128xf32, #tpu.memory_space<any>>) dst(%414 : memref<1x128xf32, #tpu.memory_space<vmem>>)
    %c3_i32_395 = arith.constant 3 : i32
    %c0_i32_396 = arith.constant 0 : i32
    %c0_i32_397 = arith.constant 0 : i32
    %415 = tpu.memref_slice %arg3[%c0_i32_396, %c0_i32_397] : memref<1024x128xf32, #tpu.memory_space<any>> -> memref<1x128xf32, #tpu.memory_space<any>>
    %c3_i32_398 = arith.constant 3 : i32
    %c0_i32_399 = arith.constant 0 : i32
    %416 = tpu.memref_slice %arg5[%c3_i32_395, %c3_i32_398, %c0_i32_399] : memref<8x5x128xf32, #tpu.memory_space<vmem>> -> memref<1x1x128xf32, #tpu.memory_space<vmem>>
    %417 = tpu.memref_squeeze %416 : memref<1x1x128xf32, #tpu.memory_space<vmem>> -> memref<1x128xf32, #tpu.memory_space<vmem>>
    tpu.wait_dma2 semaphore(%arg6 : memref<!tpu.dma_semaphore, #tpu.memory_space<semaphore_mem>>) src(%415 : memref<1x128xf32, #tpu.memory_space<any>>) dst(%417 : memref<1x128xf32, #tpu.memory_space<vmem>>)
    %c3_i32_400 = arith.constant 3 : i32
    %c0_i32_401 = arith.constant 0 : i32
    %c0_i32_402 = arith.constant 0 : i32
    %418 = tpu.memref_slice %arg3[%c0_i32_401, %c0_i32_402] : memref<1024x128xf32, #tpu.memory_space<any>> -> memref<1x128xf32, #tpu.memory_space<any>>
    %c4_i32_403 = arith.constant 4 : i32
    %c0_i32_404 = arith.constant 0 : i32
    %419 = tpu.memref_slice %arg5[%c3_i32_400, %c4_i32_403, %c0_i32_404] : memref<8x5x128xf32, #tpu.memory_space<vmem>> -> memref<1x1x128xf32, #tpu.memory_space<vmem>>
    %420 = tpu.memref_squeeze %419 : memref<1x1x128xf32, #tpu.memory_space<vmem>> -> memref<1x128xf32, #tpu.memory_space<vmem>>
    tpu.wait_dma2 semaphore(%arg6 : memref<!tpu.dma_semaphore, #tpu.memory_space<semaphore_mem>>) src(%418 : memref<1x128xf32, #tpu.memory_space<any>>) dst(%420 : memref<1x128xf32, #tpu.memory_space<vmem>>)
    %c4_i32_405 = arith.constant 4 : i32
    %c0_i32_406 = arith.constant 0 : i32
    %c0_i32_407 = arith.constant 0 : i32
    %421 = tpu.memref_slice %arg3[%c0_i32_406, %c0_i32_407] : memref<1024x128xf32, #tpu.memory_space<any>> -> memref<1x128xf32, #tpu.memory_space<any>>
    %c0_i32_408 = arith.constant 0 : i32
    %c0_i32_409 = arith.constant 0 : i32
    %422 = tpu.memref_slice %arg5[%c4_i32_405, %c0_i32_408, %c0_i32_409] : memref<8x5x128xf32, #tpu.memory_space<vmem>> -> memref<1x1x128xf32, #tpu.memory_space<vmem>>
    %423 = tpu.memref_squeeze %422 : memref<1x1x128xf32, #tpu.memory_space<vmem>> -> memref<1x128xf32, #tpu.memory_space<vmem>>
    tpu.wait_dma2 semaphore(%arg6 : memref<!tpu.dma_semaphore, #tpu.memory_space<semaphore_mem>>) src(%421 : memref<1x128xf32, #tpu.memory_space<any>>) dst(%423 : memref<1x128xf32, #tpu.memory_space<vmem>>)
    %c4_i32_410 = arith.constant 4 : i32
    %c0_i32_411 = arith.constant 0 : i32
    %c0_i32_412 = arith.constant 0 : i32
    %424 = tpu.memref_slice %arg3[%c0_i32_411, %c0_i32_412] : memref<1024x128xf32, #tpu.memory_space<any>> -> memref<1x128xf32, #tpu.memory_space<any>>
    %c1_i32_413 = arith.constant 1 : i32
    %c0_i32_414 = arith.constant 0 : i32
    %425 = tpu.memref_slice %arg5[%c4_i32_410, %c1_i32_413, %c0_i32_414] : memref<8x5x128xf32, #tpu.memory_space<vmem>> -> memref<1x1x128xf32, #tpu.memory_space<vmem>>
    %426 = tpu.memref_squeeze %425 : memref<1x1x128xf32, #tpu.memory_space<vmem>> -> memref<1x128xf32, #tpu.memory_space<vmem>>
    tpu.wait_dma2 semaphore(%arg6 : memref<!tpu.dma_semaphore, #tpu.memory_space<semaphore_mem>>) src(%424 : memref<1x128xf32, #tpu.memory_space<any>>) dst(%426 : memref<1x128xf32, #tpu.memory_space<vmem>>)
    %c4_i32_415 = arith.constant 4 : i32
    %c0_i32_416 = arith.constant 0 : i32
    %c0_i32_417 = arith.constant 0 : i32
    %427 = tpu.memref_slice %arg3[%c0_i32_416, %c0_i32_417] : memref<1024x128xf32, #tpu.memory_space<any>> -> memref<1x128xf32, #tpu.memory_space<any>>
    %c2_i32_418 = arith.constant 2 : i32
    %c0_i32_419 = arith.constant 0 : i32
    %428 = tpu.memref_slice %arg5[%c4_i32_415, %c2_i32_418, %c0_i32_419] : memref<8x5x128xf32, #tpu.memory_space<vmem>> -> memref<1x1x128xf32, #tpu.memory_space<vmem>>
    %429 = tpu.memref_squeeze %428 : memref<1x1x128xf32, #tpu.memory_space<vmem>> -> memref<1x128xf32, #tpu.memory_space<vmem>>
    tpu.wait_dma2 semaphore(%arg6 : memref<!tpu.dma_semaphore, #tpu.memory_space<semaphore_mem>>) src(%427 : memref<1x128xf32, #tpu.memory_space<any>>) dst(%429 : memref<1x128xf32, #tpu.memory_space<vmem>>)
    %c4_i32_420 = arith.constant 4 : i32
    %c0_i32_421 = arith.constant 0 : i32
    %c0_i32_422 = arith.constant 0 : i32
    %430 = tpu.memref_slice %arg3[%c0_i32_421, %c0_i32_422] : memref<1024x128xf32, #tpu.memory_space<any>> -> memref<1x128xf32, #tpu.memory_space<any>>
    %c3_i32_423 = arith.constant 3 : i32
    %c0_i32_424 = arith.constant 0 : i32
    %431 = tpu.memref_slice %arg5[%c4_i32_420, %c3_i32_423, %c0_i32_424] : memref<8x5x128xf32, #tpu.memory_space<vmem>> -> memref<1x1x128xf32, #tpu.memory_space<vmem>>
    %432 = tpu.memref_squeeze %431 : memref<1x1x128xf32, #tpu.memory_space<vmem>> -> memref<1x128xf32, #tpu.memory_space<vmem>>
    tpu.wait_dma2 semaphore(%arg6 : memref<!tpu.dma_semaphore, #tpu.memory_space<semaphore_mem>>) src(%430 : memref<1x128xf32, #tpu.memory_space<any>>) dst(%432 : memref<1x128xf32, #tpu.memory_space<vmem>>)
    %c4_i32_425 = arith.constant 4 : i32
    %c0_i32_426 = arith.constant 0 : i32
    %c0_i32_427 = arith.constant 0 : i32
    %433 = tpu.memref_slice %arg3[%c0_i32_426, %c0_i32_427] : memref<1024x128xf32, #tpu.memory_space<any>> -> memref<1x128xf32, #tpu.memory_space<any>>
    %c4_i32_428 = arith.constant 4 : i32
    %c0_i32_429 = arith.constant 0 : i32
    %434 = tpu.memref_slice %arg5[%c4_i32_425, %c4_i32_428, %c0_i32_429] : memref<8x5x128xf32, #tpu.memory_space<vmem>> -> memref<1x1x128xf32, #tpu.memory_space<vmem>>
    %435 = tpu.memref_squeeze %434 : memref<1x1x128xf32, #tpu.memory_space<vmem>> -> memref<1x128xf32, #tpu.memory_space<vmem>>
    tpu.wait_dma2 semaphore(%arg6 : memref<!tpu.dma_semaphore, #tpu.memory_space<semaphore_mem>>) src(%433 : memref<1x128xf32, #tpu.memory_space<any>>) dst(%435 : memref<1x128xf32, #tpu.memory_space<vmem>>)
    %c5_i32_430 = arith.constant 5 : i32
    %c0_i32_431 = arith.constant 0 : i32
    %c0_i32_432 = arith.constant 0 : i32
    %436 = tpu.memref_slice %arg3[%c0_i32_431, %c0_i32_432] : memref<1024x128xf32, #tpu.memory_space<any>> -> memref<1x128xf32, #tpu.memory_space<any>>
    %c0_i32_433 = arith.constant 0 : i32
    %c0_i32_434 = arith.constant 0 : i32
    %437 = tpu.memref_slice %arg5[%c5_i32_430, %c0_i32_433, %c0_i32_434] : memref<8x5x128xf32, #tpu.memory_space<vmem>> -> memref<1x1x128xf32, #tpu.memory_space<vmem>>
    %438 = tpu.memref_squeeze %437 : memref<1x1x128xf32, #tpu.memory_space<vmem>> -> memref<1x128xf32, #tpu.memory_space<vmem>>
    tpu.wait_dma2 semaphore(%arg6 : memref<!tpu.dma_semaphore, #tpu.memory_space<semaphore_mem>>) src(%436 : memref<1x128xf32, #tpu.memory_space<any>>) dst(%438 : memref<1x128xf32, #tpu.memory_space<vmem>>)
    %c5_i32_435 = arith.constant 5 : i32
    %c0_i32_436 = arith.constant 0 : i32
    %c0_i32_437 = arith.constant 0 : i32
    %439 = tpu.memref_slice %arg3[%c0_i32_436, %c0_i32_437] : memref<1024x128xf32, #tpu.memory_space<any>> -> memref<1x128xf32, #tpu.memory_space<any>>
    %c1_i32_438 = arith.constant 1 : i32
    %c0_i32_439 = arith.constant 0 : i32
    %440 = tpu.memref_slice %arg5[%c5_i32_435, %c1_i32_438, %c0_i32_439] : memref<8x5x128xf32, #tpu.memory_space<vmem>> -> memref<1x1x128xf32, #tpu.memory_space<vmem>>
    %441 = tpu.memref_squeeze %440 : memref<1x1x128xf32, #tpu.memory_space<vmem>> -> memref<1x128xf32, #tpu.memory_space<vmem>>
    tpu.wait_dma2 semaphore(%arg6 : memref<!tpu.dma_semaphore, #tpu.memory_space<semaphore_mem>>) src(%439 : memref<1x128xf32, #tpu.memory_space<any>>) dst(%441 : memref<1x128xf32, #tpu.memory_space<vmem>>)
    %c5_i32_440 = arith.constant 5 : i32
    %c0_i32_441 = arith.constant 0 : i32
    %c0_i32_442 = arith.constant 0 : i32
    %442 = tpu.memref_slice %arg3[%c0_i32_441, %c0_i32_442] : memref<1024x128xf32, #tpu.memory_space<any>> -> memref<1x128xf32, #tpu.memory_space<any>>
    %c2_i32_443 = arith.constant 2 : i32
    %c0_i32_444 = arith.constant 0 : i32
    %443 = tpu.memref_slice %arg5[%c5_i32_440, %c2_i32_443, %c0_i32_444] : memref<8x5x128xf32, #tpu.memory_space<vmem>> -> memref<1x1x128xf32, #tpu.memory_space<vmem>>
    %444 = tpu.memref_squeeze %443 : memref<1x1x128xf32, #tpu.memory_space<vmem>> -> memref<1x128xf32, #tpu.memory_space<vmem>>
    tpu.wait_dma2 semaphore(%arg6 : memref<!tpu.dma_semaphore, #tpu.memory_space<semaphore_mem>>) src(%442 : memref<1x128xf32, #tpu.memory_space<any>>) dst(%444 : memref<1x128xf32, #tpu.memory_space<vmem>>)
    %c5_i32_445 = arith.constant 5 : i32
    %c0_i32_446 = arith.constant 0 : i32
    %c0_i32_447 = arith.constant 0 : i32
    %445 = tpu.memref_slice %arg3[%c0_i32_446, %c0_i32_447] : memref<1024x128xf32, #tpu.memory_space<any>> -> memref<1x128xf32, #tpu.memory_space<any>>
    %c3_i32_448 = arith.constant 3 : i32
    %c0_i32_449 = arith.constant 0 : i32
    %446 = tpu.memref_slice %arg5[%c5_i32_445, %c3_i32_448, %c0_i32_449] : memref<8x5x128xf32, #tpu.memory_space<vmem>> -> memref<1x1x128xf32, #tpu.memory_space<vmem>>
    %447 = tpu.memref_squeeze %446 : memref<1x1x128xf32, #tpu.memory_space<vmem>> -> memref<1x128xf32, #tpu.memory_space<vmem>>
    tpu.wait_dma2 semaphore(%arg6 : memref<!tpu.dma_semaphore, #tpu.memory_space<semaphore_mem>>) src(%445 : memref<1x128xf32, #tpu.memory_space<any>>) dst(%447 : memref<1x128xf32, #tpu.memory_space<vmem>>)
    %c5_i32_450 = arith.constant 5 : i32
    %c0_i32_451 = arith.constant 0 : i32
    %c0_i32_452 = arith.constant 0 : i32
    %448 = tpu.memref_slice %arg3[%c0_i32_451, %c0_i32_452] : memref<1024x128xf32, #tpu.memory_space<any>> -> memref<1x128xf32, #tpu.memory_space<any>>
    %c4_i32_453 = arith.constant 4 : i32
    %c0_i32_454 = arith.constant 0 : i32
    %449 = tpu.memref_slice %arg5[%c5_i32_450, %c4_i32_453, %c0_i32_454] : memref<8x5x128xf32, #tpu.memory_space<vmem>> -> memref<1x1x128xf32, #tpu.memory_space<vmem>>
    %450 = tpu.memref_squeeze %449 : memref<1x1x128xf32, #tpu.memory_space<vmem>> -> memref<1x128xf32, #tpu.memory_space<vmem>>
    tpu.wait_dma2 semaphore(%arg6 : memref<!tpu.dma_semaphore, #tpu.memory_space<semaphore_mem>>) src(%448 : memref<1x128xf32, #tpu.memory_space<any>>) dst(%450 : memref<1x128xf32, #tpu.memory_space<vmem>>)
    %c6_i32_455 = arith.constant 6 : i32
    %c0_i32_456 = arith.constant 0 : i32
    %c0_i32_457 = arith.constant 0 : i32
    %451 = tpu.memref_slice %arg3[%c0_i32_456, %c0_i32_457] : memref<1024x128xf32, #tpu.memory_space<any>> -> memref<1x128xf32, #tpu.memory_space<any>>
    %c0_i32_458 = arith.constant 0 : i32
    %c0_i32_459 = arith.constant 0 : i32
    %452 = tpu.memref_slice %arg5[%c6_i32_455, %c0_i32_458, %c0_i32_459] : memref<8x5x128xf32, #tpu.memory_space<vmem>> -> memref<1x1x128xf32, #tpu.memory_space<vmem>>
    %453 = tpu.memref_squeeze %452 : memref<1x1x128xf32, #tpu.memory_space<vmem>> -> memref<1x128xf32, #tpu.memory_space<vmem>>
    tpu.wait_dma2 semaphore(%arg6 : memref<!tpu.dma_semaphore, #tpu.memory_space<semaphore_mem>>) src(%451 : memref<1x128xf32, #tpu.memory_space<any>>) dst(%453 : memref<1x128xf32, #tpu.memory_space<vmem>>)
    %c6_i32_460 = arith.constant 6 : i32
    %c0_i32_461 = arith.constant 0 : i32
    %c0_i32_462 = arith.constant 0 : i32
    %454 = tpu.memref_slice %arg3[%c0_i32_461, %c0_i32_462] : memref<1024x128xf32, #tpu.memory_space<any>> -> memref<1x128xf32, #tpu.memory_space<any>>
    %c1_i32_463 = arith.constant 1 : i32
    %c0_i32_464 = arith.constant 0 : i32
    %455 = tpu.memref_slice %arg5[%c6_i32_460, %c1_i32_463, %c0_i32_464] : memref<8x5x128xf32, #tpu.memory_space<vmem>> -> memref<1x1x128xf32, #tpu.memory_space<vmem>>
    %456 = tpu.memref_squeeze %455 : memref<1x1x128xf32, #tpu.memory_space<vmem>> -> memref<1x128xf32, #tpu.memory_space<vmem>>
    tpu.wait_dma2 semaphore(%arg6 : memref<!tpu.dma_semaphore, #tpu.memory_space<semaphore_mem>>) src(%454 : memref<1x128xf32, #tpu.memory_space<any>>) dst(%456 : memref<1x128xf32, #tpu.memory_space<vmem>>)
    %c6_i32_465 = arith.constant 6 : i32
    %c0_i32_466 = arith.constant 0 : i32
    %c0_i32_467 = arith.constant 0 : i32
    %457 = tpu.memref_slice %arg3[%c0_i32_466, %c0_i32_467] : memref<1024x128xf32, #tpu.memory_space<any>> -> memref<1x128xf32, #tpu.memory_space<any>>
    %c2_i32_468 = arith.constant 2 : i32
    %c0_i32_469 = arith.constant 0 : i32
    %458 = tpu.memref_slice %arg5[%c6_i32_465, %c2_i32_468, %c0_i32_469] : memref<8x5x128xf32, #tpu.memory_space<vmem>> -> memref<1x1x128xf32, #tpu.memory_space<vmem>>
    %459 = tpu.memref_squeeze %458 : memref<1x1x128xf32, #tpu.memory_space<vmem>> -> memref<1x128xf32, #tpu.memory_space<vmem>>
    tpu.wait_dma2 semaphore(%arg6 : memref<!tpu.dma_semaphore, #tpu.memory_space<semaphore_mem>>) src(%457 : memref<1x128xf32, #tpu.memory_space<any>>) dst(%459 : memref<1x128xf32, #tpu.memory_space<vmem>>)
    %c6_i32_470 = arith.constant 6 : i32
    %c0_i32_471 = arith.constant 0 : i32
    %c0_i32_472 = arith.constant 0 : i32
    %460 = tpu.memref_slice %arg3[%c0_i32_471, %c0_i32_472] : memref<1024x128xf32, #tpu.memory_space<any>> -> memref<1x128xf32, #tpu.memory_space<any>>
    %c3_i32_473 = arith.constant 3 : i32
    %c0_i32_474 = arith.constant 0 : i32
    %461 = tpu.memref_slice %arg5[%c6_i32_470, %c3_i32_473, %c0_i32_474] : memref<8x5x128xf32, #tpu.memory_space<vmem>> -> memref<1x1x128xf32, #tpu.memory_space<vmem>>
    %462 = tpu.memref_squeeze %461 : memref<1x1x128xf32, #tpu.memory_space<vmem>> -> memref<1x128xf32, #tpu.memory_space<vmem>>
    tpu.wait_dma2 semaphore(%arg6 : memref<!tpu.dma_semaphore, #tpu.memory_space<semaphore_mem>>) src(%460 : memref<1x128xf32, #tpu.memory_space<any>>) dst(%462 : memref<1x128xf32, #tpu.memory_space<vmem>>)
    %c6_i32_475 = arith.constant 6 : i32
    %c0_i32_476 = arith.constant 0 : i32
    %c0_i32_477 = arith.constant 0 : i32
    %463 = tpu.memref_slice %arg3[%c0_i32_476, %c0_i32_477] : memref<1024x128xf32, #tpu.memory_space<any>> -> memref<1x128xf32, #tpu.memory_space<any>>
    %c4_i32_478 = arith.constant 4 : i32
    %c0_i32_479 = arith.constant 0 : i32
    %464 = tpu.memref_slice %arg5[%c6_i32_475, %c4_i32_478, %c0_i32_479] : memref<8x5x128xf32, #tpu.memory_space<vmem>> -> memref<1x1x128xf32, #tpu.memory_space<vmem>>
    %465 = tpu.memref_squeeze %464 : memref<1x1x128xf32, #tpu.memory_space<vmem>> -> memref<1x128xf32, #tpu.memory_space<vmem>>
    tpu.wait_dma2 semaphore(%arg6 : memref<!tpu.dma_semaphore, #tpu.memory_space<semaphore_mem>>) src(%463 : memref<1x128xf32, #tpu.memory_space<any>>) dst(%465 : memref<1x128xf32, #tpu.memory_space<vmem>>)
    %c7_i32_480 = arith.constant 7 : i32
    %c0_i32_481 = arith.constant 0 : i32
    %c0_i32_482 = arith.constant 0 : i32
    %466 = tpu.memref_slice %arg3[%c0_i32_481, %c0_i32_482] : memref<1024x128xf32, #tpu.memory_space<any>> -> memref<1x128xf32, #tpu.memory_space<any>>
    %c0_i32_483 = arith.constant 0 : i32
    %c0_i32_484 = arith.constant 0 : i32
    %467 = tpu.memref_slice %arg5[%c7_i32_480, %c0_i32_483, %c0_i32_484] : memref<8x5x128xf32, #tpu.memory_space<vmem>> -> memref<1x1x128xf32, #tpu.memory_space<vmem>>
    %468 = tpu.memref_squeeze %467 : memref<1x1x128xf32, #tpu.memory_space<vmem>> -> memref<1x128xf32, #tpu.memory_space<vmem>>
    tpu.wait_dma2 semaphore(%arg6 : memref<!tpu.dma_semaphore, #tpu.memory_space<semaphore_mem>>) src(%466 : memref<1x128xf32, #tpu.memory_space<any>>) dst(%468 : memref<1x128xf32, #tpu.memory_space<vmem>>)
    %c7_i32_485 = arith.constant 7 : i32
    %c0_i32_486 = arith.constant 0 : i32
    %c0_i32_487 = arith.constant 0 : i32
    %469 = tpu.memref_slice %arg3[%c0_i32_486, %c0_i32_487] : memref<1024x128xf32, #tpu.memory_space<any>> -> memref<1x128xf32, #tpu.memory_space<any>>
    %c1_i32_488 = arith.constant 1 : i32
    %c0_i32_489 = arith.constant 0 : i32
    %470 = tpu.memref_slice %arg5[%c7_i32_485, %c1_i32_488, %c0_i32_489] : memref<8x5x128xf32, #tpu.memory_space<vmem>> -> memref<1x1x128xf32, #tpu.memory_space<vmem>>
    %471 = tpu.memref_squeeze %470 : memref<1x1x128xf32, #tpu.memory_space<vmem>> -> memref<1x128xf32, #tpu.memory_space<vmem>>
    tpu.wait_dma2 semaphore(%arg6 : memref<!tpu.dma_semaphore, #tpu.memory_space<semaphore_mem>>) src(%469 : memref<1x128xf32, #tpu.memory_space<any>>) dst(%471 : memref<1x128xf32, #tpu.memory_space<vmem>>)
    %c7_i32_490 = arith.constant 7 : i32
    %c0_i32_491 = arith.constant 0 : i32
    %c0_i32_492 = arith.constant 0 : i32
    %472 = tpu.memref_slice %arg3[%c0_i32_491, %c0_i32_492] : memref<1024x128xf32, #tpu.memory_space<any>> -> memref<1x128xf32, #tpu.memory_space<any>>
    %c2_i32_493 = arith.constant 2 : i32
    %c0_i32_494 = arith.constant 0 : i32
    %473 = tpu.memref_slice %arg5[%c7_i32_490, %c2_i32_493, %c0_i32_494] : memref<8x5x128xf32, #tpu.memory_space<vmem>> -> memref<1x1x128xf32, #tpu.memory_space<vmem>>
    %474 = tpu.memref_squeeze %473 : memref<1x1x128xf32, #tpu.memory_space<vmem>> -> memref<1x128xf32, #tpu.memory_space<vmem>>
    tpu.wait_dma2 semaphore(%arg6 : memref<!tpu.dma_semaphore, #tpu.memory_space<semaphore_mem>>) src(%472 : memref<1x128xf32, #tpu.memory_space<any>>) dst(%474 : memref<1x128xf32, #tpu.memory_space<vmem>>)
    %c7_i32_495 = arith.constant 7 : i32
    %c0_i32_496 = arith.constant 0 : i32
    %c0_i32_497 = arith.constant 0 : i32
    %475 = tpu.memref_slice %arg3[%c0_i32_496, %c0_i32_497] : memref<1024x128xf32, #tpu.memory_space<any>> -> memref<1x128xf32, #tpu.memory_space<any>>
    %c3_i32_498 = arith.constant 3 : i32
    %c0_i32_499 = arith.constant 0 : i32
    %476 = tpu.memref_slice %arg5[%c7_i32_495, %c3_i32_498, %c0_i32_499] : memref<8x5x128xf32, #tpu.memory_space<vmem>> -> memref<1x1x128xf32, #tpu.memory_space<vmem>>
    %477 = tpu.memref_squeeze %476 : memref<1x1x128xf32, #tpu.memory_space<vmem>> -> memref<1x128xf32, #tpu.memory_space<vmem>>
    tpu.wait_dma2 semaphore(%arg6 : memref<!tpu.dma_semaphore, #tpu.memory_space<semaphore_mem>>) src(%475 : memref<1x128xf32, #tpu.memory_space<any>>) dst(%477 : memref<1x128xf32, #tpu.memory_space<vmem>>)
    %c7_i32_500 = arith.constant 7 : i32
    %c0_i32_501 = arith.constant 0 : i32
    %c0_i32_502 = arith.constant 0 : i32
    %478 = tpu.memref_slice %arg3[%c0_i32_501, %c0_i32_502] : memref<1024x128xf32, #tpu.memory_space<any>> -> memref<1x128xf32, #tpu.memory_space<any>>
    %c4_i32_503 = arith.constant 4 : i32
    %c0_i32_504 = arith.constant 0 : i32
    %479 = tpu.memref_slice %arg5[%c7_i32_500, %c4_i32_503, %c0_i32_504] : memref<8x5x128xf32, #tpu.memory_space<vmem>> -> memref<1x1x128xf32, #tpu.memory_space<vmem>>
    %480 = tpu.memref_squeeze %479 : memref<1x1x128xf32, #tpu.memory_space<vmem>> -> memref<1x128xf32, #tpu.memory_space<vmem>>
    tpu.wait_dma2 semaphore(%arg6 : memref<!tpu.dma_semaphore, #tpu.memory_space<semaphore_mem>>) src(%478 : memref<1x128xf32, #tpu.memory_space<any>>) dst(%480 : memref<1x128xf32, #tpu.memory_space<vmem>>)
    %c0 = arith.constant 0 : index
    %c0_505 = arith.constant 0 : index
    %481 = vector.load %arg2[%c0, %c0_505] : memref<8x128xf32, #tpu.memory_space<vmem>>, vector<8x128xf32>
    %c0_506 = arith.constant 0 : index
    %c0_507 = arith.constant 0 : index
    %c0_508 = arith.constant 0 : index
    %482 = vector.load %arg5[%c0_506, %c0_507, %c0_508] : memref<8x5x128xf32, #tpu.memory_space<vmem>>, vector<8x5x128xf32>
    %483 = vector.shape_cast %481 : vector<8x128xf32> to vector<8x1x128xf32>
    %484 = vector.broadcast %483 : vector<8x1x128xf32> to vector<8x5x128xf32>
    %485 = arith.mulf %484, %482 : vector<8x5x128xf32>
    %cst = arith.constant dense<0.000000e+00> : vector<8x5xf32>
    %486 = vector.multi_reduction <add>, %485, %cst [2] : vector<8x5x128xf32> to vector<8x5xf32>
    %c0_509 = arith.constant 0 : index
    %c0_510 = arith.constant 0 : index
    %487 = vector.load %arg4[%c0_509, %c0_510] : memref<8x5xf32, #tpu.memory_space<vmem>>, vector<8x5xf32>
    tpu.vector_store %arg4[%c0_509, %c0_510], %486 {strides = array<i32>} : memref<8x5xf32, #tpu.memory_space<vmem>>, vector<8x5xf32>,
    return
  }
  func.func @transform_0(%arg0: i32, %arg1: memref<80xi32, #tpu.memory_space<smem>>) -> (i32, i32) {
    %c0_i32 = arith.constant 0 : i32
    %c0_i32_0 = arith.constant 0 : i32
    return %arg0, %c0_i32 : i32, i32
  }
  func.func @transform_2(%arg0: i32, %arg1: memref<80xi32, #tpu.memory_space<smem>>) -> (i32, i32) {
    %c0_i32 = arith.constant 0 : i32
    %c0_i32_0 = arith.constant 0 : i32
    return %arg0, %c0_i32 : i32, i32
  }
}

</mosaic_0001>

<bundles_post_ra>
// kernel: mf_forward.1
= control target key start
LH: loop header
LB: loop body
LE: loop exit
PB: predicated region body
PF: predicated region fallthrough
CT: control target
= control target key end

     0   :  { %s3615_s0 = inlined_call_operand.vmem [shape: s32[80], index: 0, kind: input, shape index: {}]   ;;  %s3616_s1 = inlined_call_operand.vmem [shape: f32[16,128], index: 1, kind: input, shape index: {}]   ;;  %s3617_s2 = inlined_call_operand.hbm [shape: f32[1024,128], index: 2, kind: input, shape index: {}]   ;;  %s3618_s3 = inlined_call_operand.vmem [shape: f32[16,5], index: 3, kind: output, shape index: {}]  }
   0x1   :  { %s8_s14 = sshll.u32 %s3615_s0, 4  ;;  %s9_s14 = int_to_ptr.vmem [resolvable:$true] %s8_s14 }
   0x2   :  { %s1711_s15 = scalar_lea.vmem %s9_s14, 16  ;;  %p1716_p1 = scmp.lt.s32.totalorder %s9_s14, %s9_s14 }
   0x3   :  { %p1712_p0 = scmp.ne.s32.totalorder %s9_s14, %s1711_s15  ;;  %p1717_p2 = scmp.lt.s32.totalorder %s1711_s15, %s1711_s15 }
   0x5   :  { %p1718_p3 = por %p1717_p2, %p1716_p1 }
   0x7   :  { %p1719_p4 = pnand %p1718_p3, %p1712_p0 }
   0x9   :  { %1722 = shalt.err (!%p1719_p4)  }
   0xa   :  { %s2615_s16 = smov [#allocation5]  }
   0xb   :  { %11 = dma.vmem_to_smem %s9_s14, 16, %s2615_s16, [#allocation4] }
   0xc   :  { %2607 = dma.done.wait [#allocation4], 16 }
   0xd   :  { %2608 = vsyncadd [#allocation4], 4294967280 }
   0xe   :  { %13 = sfence }
   0xf   :  { %s2680_s17 = smov 0  }
  0x10 LB: > { %s1330_s0 = sadd.s32 4294967295, %s2613_s17   ;;  %p1334_p5 = scmp.ge.s32.totalorder %s2613_s17, 1  ;;  %s2613_s17 = sphi %s2680_s17, %s19_s17  }
  0x11   : > { %p94_p6 = scmp.lt.s32.totalorder %s2613_s17, 3 }
  0x13   : > { %p95_p7 = pnand %p1334_p5, %p94_p6 }
  0x14   : > { %p112_p8 = scmp.lt.s32.totalorder (!%p95_p7), %s1330_s0, 1  ;;  %s2688_s18 = smul.u32 (!%p95_p7), 40, %s1330_s0 }
  0x15   : > { %98 = sbr.rel (%p95_p7) target bundleno = 1112 (0x458), region = 24  ;;  %s2616_s20 = smov (!%p95_p7), [#allocation2]  }
  0x16   : > { %s121_s19 = sld [smem:[#allocation5 + %s2688_s18]] (!%p95_p7)  ;;  %s135_s21 = sshll.u32 (!%p95_p7), %s2616_s20, 4  ;;  %s2691_s21 = int_to_ptr.vmem [resolvable:$true] %s135_s21 }
  0x17   : > { %s139_s29 = sadd.s32 (!%p95_p7), 1, %s2688_s18  ;;  %s2617_s30 = smov (!%p95_p7), [#allocation2 + $0x1]  }
  0x18   : > { %s155_s4 = sshll.u32 (!%p95_p7), %s2617_s30, 4  ;;  %s2704_s5 = sld [smem:[#allocation5 + %s139_s29]] (!%p95_p7)  ;;  %s2706_s4 = int_to_ptr.vmem [resolvable:$true] %s155_s4 }
  0x19   : > { %s159_s6 = sadd.s32 (!%p95_p7), 2, %s2688_s18  ;;  %s2618_s8 = smov (!%p95_p7), [#allocation2 + $0x2]  }
  0x1a   : > { %s3620_s0 = smov (!%p112_p8, %s1330_s0), 1  ;;  %s2709_s7 = sld [smem:[#allocation5 + %s159_s6]] }
  0x1b   : > { %s1335_s22 = sshll.u32 %s3620_s0, 3  ;;  %s175_s9 = sshll.u32 %s2618_s8, 4  ;;  %s2711_s9 = int_to_ptr.vmem [resolvable:$true] %s175_s9 }
  0x1c   : > { %s2696_s25 = scalar_lea.vmem %s3616_s1, %s1335_s22  ;;  %s2701_s28 = scalar_lea.vmem %s3618_s3, %s1335_s22 }
  0x1d   : > { %p122_p9 = scmp.gt.s32.totalorder %s121_s19, 0  ;;  %p1337_p10 = scmp.lt.s32.totalorder %s121_s19, 1023 }
  0x1e   : > { %s179_s10 = sadd.s32 3, %s2688_s18  ;;  %p141_p11 = scmp.gt.s32.totalorder %s2704_s5, 0 }
  0x1f   : > { %s3622_s19 = smov (!%p122_p9, %s121_s19), 0  ;;  %p1343_p12 = scmp.lt.s32.totalorder %s2704_s5, 1023 }
  0x20   : > { %s3624_s19 = smov (!%p1337_p10, %s3622_s19), 1023  ;;  %s2716_s12 = sld [smem:[#allocation5 + %s179_s10]] }
  0x21   : > { %s1342_s11 = sshll.u32 %s3624_s19, 4  ;;  %p161_p13 = scmp.gt.s32.totalorder %s2709_s7, 0 }
  0x22   : > { %s127_s15 = scalar_lea.hbm %s3617_s2, %s1342_s11  ;;  %s2725_s22 = scalar_lea.hbm %s3617_s2, 16384 }
  0x23   : > { %s1723_s16 = scalar_lea.hbm %s127_s15, 16  ;;  %p1726_p1 = scmp.lt.s32.totalorder %s127_s15, %s3617_s2 }
  0x24   : > { %p1724_p0 = scmp.ne.s32.totalorder %s127_s15, %s1723_s16  ;;  %p1727_p2 = scmp.lt.s32.totalorder %s2725_s22, %s1723_s16 }
  0x26   : > { %p1728_p3 = por %p1727_p2, %p1726_p1 }
  0x28   : > { %p1729_p4 = pnand %p1728_p3, %p1724_p0 }
  0x2a   : > { %1732 = shalt.err (!%p1729_p4)  }
  0x2b   : > { %s1733_s19 = scalar_lea.vmem %s2691_s21, 16  ;;  %s2734_s26 = scalar_lea.vmem %s2691_s21, 1024 }
  0x2c   : > { %p1734_p5 = scmp.ne.s32.totalorder %s2691_s21, %s1733_s19  ;;  %p1738_p6 = scmp.lt.s32.totalorder %s2691_s21, %s2691_s21 }
  0x2d   : > { %p1739_p7 = scmp.lt.s32.totalorder %s2734_s26, %s1733_s19 }
  0x2f   : > { %p1740_p8 = por %p1739_p7, %p1738_p6 }
  0x31   : > { %p1741_p9 = pnand %p1740_p8, %p1734_p5 }
  0x33   : > { %1744 = shalt.err (!%p1741_p9)  }
  0x34   : > { %138 = dma.hbm_to_vmem [thread:$0]  %s127_s15, 16, %s2691_s21, [#allocation3] }
  0x35   : > { %s142_s27 = scalar_select %p141_p11, %s2704_s5, 0 }
  0x36   : > { %s162_s29 = scalar_select %p161_p13, %s2709_s7, 0 }
  0x37   : > { %s3626_s27 = smov (!%p1343_p12, %s142_s27), 1023  ;;  %p1349_p10 = scmp.lt.s32.totalorder %s2709_s7, 1023 }
  0x38   : > { %p181_p0 = scmp.gt.s32.totalorder %s2716_s12, 0  ;;  %s1348_s30 = sshll.u32 %s3626_s27, 4 }
  0x39   : > { %p1355_p1 = scmp.lt.s32.totalorder %s2716_s12, 1023  ;;  %s146_s10 = scalar_lea.hbm %s3617_s2, %s1348_s30 }
  0x3a   : > { %s1745_s11 = scalar_lea.hbm %s146_s10, 16  ;;  %p1748_p3 = scmp.lt.s32.totalorder %s146_s10, %s3617_s2 }
  0x3b   : > { %p1746_p2 = scmp.ne.s32.totalorder %s146_s10, %s1745_s11  ;;  %p1749_p4 = scmp.lt.s32.totalorder %s2725_s22, %s1745_s11 }
  0x3d   : > { %p1750_p11 = por %p1749_p4, %p1748_p3 }
  0x3f   : > { %p1751_p5 = pnand %p1750_p11, %p1746_p2 }
  0x41   : > { %1754 = shalt.err (!%p1751_p5)  }
  0x42   : > { %s1755_s5 = scalar_lea.vmem %s2706_s4, 16  ;;  %p1760_p13 = scmp.lt.s32.totalorder %s2706_s4, %s2691_s21 }
  0x43   : > { %p1756_p12 = scmp.ne.s32.totalorder %s2706_s4, %s1755_s5  ;;  %p1761_p6 = scmp.lt.s32.totalorder %s2734_s26, %s1755_s5 }
  0x45   : > { %p1762_p7 = por %p1761_p6, %p1760_p13 }
  0x47   : > { %p1763_p8 = pnand %p1762_p7, %p1756_p12 }
  0x49   : > { %1766 = shalt.err (!%p1763_p8)  }
  0x4a   : > { %158 = dma.hbm_to_vmem [thread:$0]  %s146_s10, 16, %s2706_s4, [#allocation3] }
  0x4b   : > { %s3628_s29 = smov (!%p1349_p10, %s162_s29), 1023  ;;  %s2619_s0 = smov [#allocation2 + $0x3]  }
  0x4c   : > { %s182_s15 = scalar_select %p181_p0, %s2716_s12, 0 }
  0x4d   : > { %s1354_s16 = sshll.u32 %s3628_s29, 4  ;;  %s195_s20 = sshll.u32 %s2619_s0, 4  ;;  %s2772_s20 = int_to_ptr.vmem [resolvable:$true] %s195_s20 }
  0x4e   : > { %s166_s19 = scalar_lea.hbm %s3617_s2, %s1354_s16 }
  0x4f   : > { %s1767_s27 = scalar_lea.hbm %s166_s19, 16  ;;  %p1770_p2 = scmp.lt.s32.totalorder %s166_s19, %s3617_s2 }
  0x50   : > { %p1768_p9 = scmp.ne.s32.totalorder %s166_s19, %s1767_s27  ;;  %p1771_p3 = scmp.lt.s32.totalorder %s2725_s22, %s1767_s27 }
  0x52   : > { %p1772_p4 = por %p1771_p3, %p1770_p2 }
  0x54   : > { %p1773_p10 = pnand %p1772_p4, %p1768_p9 }
  0x56   : > { %1776 = shalt.err (!%p1773_p10)  }
  0x57   : > { %s1777_s4 = scalar_lea.vmem %s2711_s9, 16  ;;  %p1782_p11 = scmp.lt.s32.totalorder %s2711_s9, %s2691_s21 }
  0x58   : > { %p1778_p0 = scmp.ne.s32.totalorder %s2711_s9, %s1777_s4  ;;  %p1783_p5 = scmp.lt.s32.totalorder %s2734_s26, %s1777_s4 }
  0x5a   : > { %p1784_p12 = por %p1783_p5, %p1782_p11 }
  0x5c   : > { %p1785_p13 = pnand %p1784_p12, %p1778_p0 }
  0x5e   : > { %1788 = shalt.err (!%p1785_p13)  }
  0x5f   : > { %178 = dma.hbm_to_vmem [thread:$0]  %s166_s19, 16, %s2711_s9, [#allocation3] }
  0x60   : > { %s3630_s15 = smov (!%p1355_p1, %s182_s15), 1023  ;;  %s199_s7 = sadd.s32 4, %s2688_s18 }
  0x61   : > { %s1360_s29 = sshll.u32 %s3630_s15, 4  ;;  %s2787_s8 = sld [smem:[#allocation5 + %s199_s7]] }
  0x62   : > { %s186_s13 = scalar_lea.hbm %s3617_s2, %s1360_s29  ;;  %s2620_s14 = smov [#allocation2 + $0x4]  }
  0x63   : > { %s215_s5 = sshll.u32 %s2620_s14, 4  ;;  %s1789_s16 = scalar_lea.hbm %s186_s13, 16  ;;  %s2802_s5 = int_to_ptr.vmem [resolvable:$true] %s215_s5 }
  0x64   : > { %p1790_p6 = scmp.ne.s32.totalorder %s186_s13, %s1789_s16  ;;  %p1792_p7 = scmp.lt.s32.totalorder %s186_s13, %s3617_s2 }
  0x65   : > { %p1793_p8 = scmp.lt.s32.totalorder %s2725_s22, %s1789_s16 }
  0x67   : > { %p1794_p9 = por %p1793_p8, %p1792_p7 }
  0x69   : > { %p1795_p2 = pnand %p1794_p9, %p1790_p6 }
  0x6b   : > { %1798 = shalt.err (!%p1795_p2)  }
  0x6c   : > { %s1799_s9 = scalar_lea.vmem %s2772_s20, 16  ;;  %p1804_p3 = scmp.lt.s32.totalorder %s2772_s20, %s2691_s21 }
  0x6d   : > { %p1800_p1 = scmp.ne.s32.totalorder %s2772_s20, %s1799_s9  ;;  %p1805_p4 = scmp.lt.s32.totalorder %s2734_s26, %s1799_s9 }
  0x6f   : > { %p1806_p10 = por %p1805_p4, %p1804_p3 }
  0x71   : > { %p1807_p0 = pnand %p1806_p10, %p1800_p1 }
  0x73   : > { %1810 = shalt.err (!%p1807_p0)  }
  0x74   : > { %198 = dma.hbm_to_vmem [thread:$0]  %s186_s13, 16, %s2772_s20, [#allocation3] }
  0x75   : > { %s219_s12 = sadd.s32 5, %s2688_s18  ;;  %s2621_s24 = smov [#allocation2 + $0x8]  }
  0x76   : > { %s2805_s15 = sld [smem:[#allocation5 + %s219_s12]]  ;;  %s235_s19 = sshll.u32 %s2621_s24, 4  ;;  %s2810_s19 = int_to_ptr.vmem [resolvable:$true] %s235_s19 }
  0x77   : > { %s239_s27 = sadd.s32 6, %s2688_s18  ;;  %p201_p11 = scmp.gt.s32.totalorder %s2787_s8, 0 }
  0x78   : > { %p1361_p5 = scmp.lt.s32.totalorder %s2787_s8, 1023  ;;  %s2812_s30 = sld [smem:[#allocation5 + %s239_s27]] }
  0x79   : > { %s3632_s8 = smov (!%p201_p11, %s2787_s8), 0  ;;  %s259_s20 = sadd.s32 7, %s2688_s18 }
  0x7a   : > { %s3634_s8 = smov (!%p1361_p5, %s3632_s8), 1023  ;;  %s2622_s4 = smov [#allocation2 + $0x9]  }
  0x7b   : > { %s1366_s6 = sshll.u32 %s3634_s8, 4  ;;  %s255_s7 = sshll.u32 %s2622_s4, 4  ;;  %s2841_s7 = int_to_ptr.vmem [resolvable:$true] %s255_s7 }
  0x7c   : > { %p221_p12 = scmp.gt.s32.totalorder %s2805_s15, 0  ;;  %p1367_p13 = scmp.lt.s32.totalorder %s2805_s15, 1023 }
  0x7d   : > { %s206_s11 = scalar_lea.hbm %s3617_s2, %s1366_s6 }
  0x7e   : > { %p241_p6 = scmp.gt.s32.totalorder %s2812_s30, 0  ;;  %s1811_s13 = scalar_lea.hbm %s206_s11, 16 }
  0x7f   : > { %p1812_p7 = scmp.ne.s32.totalorder %s206_s11, %s1811_s13  ;;  %p1814_p8 = scmp.lt.s32.totalorder %s206_s11, %s3617_s2 }
  0x80   : > { %p1815_p9 = scmp.lt.s32.totalorder %s2725_s22, %s1811_s13 }
  0x82   : > { %p1816_p2 = por %p1815_p9, %p1814_p8 }
  0x84   : > { %p1817_p1 = pnand %p1816_p2, %p1812_p7 }
  0x86   : > { %1820 = shalt.err (!%p1817_p1)  }
  0x87   : > { %s1821_s8 = scalar_lea.vmem %s2802_s5, 16  ;;  %p1826_p4 = scmp.lt.s32.totalorder %s2802_s5, %s2691_s21 }
  0x88   : > { %p1822_p3 = scmp.ne.s32.totalorder %s2802_s5, %s1821_s8  ;;  %p1827_p10 = scmp.lt.s32.totalorder %s2734_s26, %s1821_s8 }
  0x8a   : > { %p1828_p0 = por %p1827_p10, %p1826_p4 }
  0x8c   : > { %p1829_p11 = pnand %p1828_p0, %p1822_p3 }
  0x8e   : > { %1832 = shalt.err (!%p1829_p11)  }
  0x8f   : > { %218 = dma.hbm_to_vmem [thread:$0]  %s206_s11, 16, %s2802_s5, [#allocation3] }
  0x90   : > { %s222_s0 = scalar_select %p221_p12, %s2805_s15, 0 }
  0x91   : > { %s242_s23 = scalar_select %p241_p6, %s2812_s30, 0 }
  0x92   : > { %s3636_s0 = smov (!%p1367_p13, %s222_s0), 1023  ;;  %p1373_p5 = scmp.lt.s32.totalorder %s2812_s30, 1023 }
  0x93   : > { %s1372_s9 = sshll.u32 %s3636_s0, 4  ;;  %s2845_s12 = sld [smem:[#allocation5 + %s259_s20]] }
  0x94   : > { %s226_s6 = scalar_lea.hbm %s3617_s2, %s1372_s9 }
  0x95   : > { %s1833_s4 = scalar_lea.hbm %s226_s6, 16  ;;  %p1836_p12 = scmp.lt.s32.totalorder %s226_s6, %s3617_s2 }
  0x96   : > { %p1834_p7 = scmp.ne.s32.totalorder %s226_s6, %s1833_s4  ;;  %p1837_p6 = scmp.lt.s32.totalorder %s2725_s22, %s1833_s4 }
  0x98   : > { %p1838_p8 = por %p1837_p6, %p1836_p12 }
  0x9a   : > { %p1839_p13 = pnand %p1838_p8, %p1834_p7 }
  0x9c   : > { %1842 = shalt.err (!%p1839_p13)  }
  0x9d   : > { %s1843_s15 = scalar_lea.vmem %s2810_s19, 16  ;;  %p1848_p2 = scmp.lt.s32.totalorder %s2810_s19, %s2691_s21 }
  0x9e   : > { %p1844_p9 = scmp.ne.s32.totalorder %s2810_s19, %s1843_s15  ;;  %p1849_p1 = scmp.lt.s32.totalorder %s2734_s26, %s1843_s15 }
  0xa0   : > { %p1850_p3 = por %p1849_p1, %p1848_p2 }
  0xa2   : > { %p1851_p4 = pnand %p1850_p3, %p1844_p9 }
  0xa4   : > { %1854 = shalt.err (!%p1851_p4)  }
  0xa5   : > { %238 = dma.hbm_to_vmem [thread:$0]  %s226_s6, 16, %s2810_s19, [#allocation3] }
  0xa6   : > { %s3638_s23 = smov (!%p1373_p5, %s242_s23), 1023  ;;  %s2623_s20 = smov [#allocation2 + $0xa]  }
  0xa7   : > { %s275_s10 = sshll.u32 %s2623_s20, 4  ;;  %s279_s11 = sadd.s32 8, %s2688_s18  ;;  %s2863_s10 = int_to_ptr.vmem [resolvable:$true] %s275_s10 }
  0xa8   : > { %s1378_s13 = sshll.u32 %s3638_s23, 4  ;;  %p261_p10 = scmp.gt.s32.totalorder %s2845_s12, 0 }
  0xa9   : > { %s246_s8 = scalar_lea.hbm %s3617_s2, %s1378_s13 }
  0xaa   : > { %s1855_s0 = scalar_lea.hbm %s246_s8, 16  ;;  %p1858_p11 = scmp.lt.s32.totalorder %s246_s8, %s3617_s2 }
  0xab   : > { %p1856_p0 = scmp.ne.s32.totalorder %s246_s8, %s1855_s0  ;;  %p1859_p7 = scmp.lt.s32.totalorder %s2725_s22, %s1855_s0 }
  0xad   : > { %p1860_p12 = por %p1859_p7, %p1858_p11 }
  0xaf   : > { %p1861_p5 = pnand %p1860_p12, %p1856_p0 }
  0xb1   : > { %1864 = shalt.err (!%p1861_p5)  }
  0xb2   : > { %s1865_s19 = scalar_lea.vmem %s2841_s7, 16  ;;  %p1870_p8 = scmp.lt.s32.totalorder %s2841_s7, %s2691_s21 }
  0xb3   : > { %p1866_p6 = scmp.ne.s32.totalorder %s2841_s7, %s1865_s19  ;;  %p1871_p13 = scmp.lt.s32.totalorder %s2734_s26, %s1865_s19 }
  0xb5   : > { %p1872_p9 = por %p1871_p13, %p1870_p8 }
  0xb7   : > { %p1873_p2 = pnand %p1872_p9, %p1866_p6 }
  0xb9   : > { %1876 = shalt.err (!%p1873_p2)  }
  0xba   : > { %258 = dma.hbm_to_vmem [thread:$0]  %s246_s8, 16, %s2841_s7, [#allocation3] }
  0xbb   : > { %s262_s30 = scalar_select %p261_p10, %s2845_s12, 0 }
  0xbc   : > { %p1379_p1 = scmp.lt.s32.totalorder %s2845_s12, 1023  ;;  %s2883_s23 = sld [smem:[#allocation5 + %s279_s11]] }
  0xbd   : > { %s299_s27 = sadd.s32 9, %s2688_s18  ;;  %s2624_s6 = smov [#allocation2 + $0xb]  }
  0xbe   : > { %s3640_s30 = smov (!%p1379_p1, %s262_s30), 1023  ;;  %s295_s4 = sshll.u32 %s2624_s6, 4  ;;  %s2888_s4 = int_to_ptr.vmem [resolvable:$true] %s295_s4 }
  0xbf   : > { %s2886_s5 = sld [smem:[#allocation5 + %s299_s27]]  ;;  %s1384_s29 = sshll.u32 %s3640_s30, 4 }
  0xc0   : > { %s266_s13 = scalar_lea.hbm %s3617_s2, %s1384_s29 }
  0xc1   : > { %s1877_s14 = scalar_lea.hbm %s266_s13, 16  ;;  %p1880_p4 = scmp.lt.s32.totalorder %s266_s13, %s3617_s2 }
  0xc2   : > { %p1878_p3 = scmp.ne.s32.totalorder %s266_s13, %s1877_s14  ;;  %p1881_p10 = scmp.lt.s32.totalorder %s2725_s22, %s1877_s14 }
  0xc4   : > { %p1882_p0 = por %p1881_p10, %p1880_p4 }
  0xc6   : > { %p1883_p11 = pnand %p1882_p0, %p1878_p3 }
  0xc8   : > { %1886 = shalt.err (!%p1883_p11)  }
  0xc9   : > { %s1887_s12 = scalar_lea.vmem %s2863_s10, 16  ;;  %p1892_p12 = scmp.lt.s32.totalorder %s2863_s10, %s2691_s21 }
  0xca   : > { %p1888_p7 = scmp.ne.s32.totalorder %s2863_s10, %s1887_s12  ;;  %p1893_p5 = scmp.lt.s32.totalorder %s2734_s26, %s1887_s12 }
  0xcc   : > { %p1894_p6 = por %p1893_p5, %p1892_p12 }
  0xce   : > { %p1895_p8 = pnand %p1894_p6, %p1888_p7 }
  0xd0   : > { %1898 = shalt.err (!%p1895_p8)  }
  0xd1   : > { %278 = dma.hbm_to_vmem [thread:$0]  %s266_s13, 16, %s2863_s10, [#allocation3] }
  0xd2   : > { %p281_p13 = scmp.gt.s32.totalorder %s2883_s23, 0  ;;  %p1385_p9 = scmp.lt.s32.totalorder %s2883_s23, 1023 }
  0xd3   : > { %s2625_s11 = smov [#allocation2 + $0xc]   ;;  %s319_s0 = sadd.s32 10, %s2688_s18 }
  0xd4   : > { %s315_s8 = sshll.u32 %s2625_s11, 4  ;;  %s3642_s23 = smov (!%p281_p13, %s2883_s23), 0  ;;  %s2910_s8 = int_to_ptr.vmem [resolvable:$true] %s315_s8 }
  0xd5   : > { %p301_p2 = scmp.gt.s32.totalorder %s2886_s5, 0  ;;  %p1391_p1 = scmp.lt.s32.totalorder %s2886_s5, 1023 }
  0xd6   : > { %s3644_s23 = smov (!%p1385_p9, %s3642_s23), 1023  ;;  %s2915_s6 = sld [smem:[#allocation5 + %s319_s0]] }
  0xd7   : > { %s302_s9 = scalar_select %p301_p2, %s2886_s5, 0 }
  0xd8   : > { %s1390_s24 = sshll.u32 %s3644_s23, 4 }
  0xd9   : > { %s286_s27 = scalar_lea.hbm %s3617_s2, %s1390_s24 }
  0xda   : > { %s1899_s10 = scalar_lea.hbm %s286_s27, 16  ;;  %p1902_p4 = scmp.lt.s32.totalorder %s286_s27, %s3617_s2 }
  0xdb   : > { %p1900_p3 = scmp.ne.s32.totalorder %s286_s27, %s1899_s10  ;;  %p1903_p10 = scmp.lt.s32.totalorder %s2725_s22, %s1899_s10 }
  0xdd   : > { %p1904_p0 = por %p1903_p10, %p1902_p4 }
  0xdf   : > { %p1905_p11 = pnand %p1904_p0, %p1900_p3 }
  0xe1   : > { %1908 = shalt.err (!%p1905_p11)  }
  0xe2   : > { %s1909_s23 = scalar_lea.vmem %s2888_s4, 16  ;;  %p1914_p12 = scmp.lt.s32.totalorder %s2888_s4, %s2691_s21 }
  0xe3   : > { %p1910_p7 = scmp.ne.s32.totalorder %s2888_s4, %s1909_s23  ;;  %p1915_p5 = scmp.lt.s32.totalorder %s2734_s26, %s1909_s23 }
  0xe5   : > { %p1916_p6 = por %p1915_p5, %p1914_p12 }
  0xe7   : > { %p1917_p8 = pnand %p1916_p6, %p1910_p7 }
  0xe9   : > { %1920 = shalt.err (!%p1917_p8)  }
  0xea   : > { %298 = dma.hbm_to_vmem [thread:$0]  %s286_s27, 16, %s2888_s4, [#allocation3] }
  0xeb   : > { %s3646_s9 = smov (!%p1391_p1, %s302_s9), 1023  ;;  %s339_s20 = sadd.s32 11, %s2688_s18 }
  0xec   : > { %s1396_s13 = sshll.u32 %s3646_s9, 4  ;;  %s2626_s14 = smov [#allocation2 + $0x10]  }
  0xed   : > { %s335_s7 = sshll.u32 %s2626_s14, 4  ;;  %s306_s11 = scalar_lea.hbm %s3617_s2, %s1396_s13  ;;  %s2933_s7 = int_to_ptr.vmem [resolvable:$true] %s335_s7 }
  0xee   : > { %s1921_s0 = scalar_lea.hbm %s306_s11, 16  ;;  %p1924_p9 = scmp.lt.s32.totalorder %s306_s11, %s3617_s2 }
  0xef   : > { %p1922_p13 = scmp.ne.s32.totalorder %s306_s11, %s1921_s0  ;;  %p1925_p2 = scmp.lt.s32.totalorder %s2725_s22, %s1921_s0 }
  0xf1   : > { %p1926_p3 = por %p1925_p2, %p1924_p9 }
  0xf3   : > { %p1927_p4 = pnand %p1926_p3, %p1922_p13 }
  0xf5   : > { %1930 = shalt.err (!%p1927_p4)  }
  0xf6   : > { %s1931_s4 = scalar_lea.vmem %s2910_s8, 16  ;;  %p1936_p10 = scmp.lt.s32.totalorder %s2910_s8, %s2691_s21 }
  0xf7   : > { %p1932_p1 = scmp.ne.s32.totalorder %s2910_s8, %s1931_s4  ;;  %p1937_p0 = scmp.lt.s32.totalorder %s2734_s26, %s1931_s4 }
  0xf9   : > { %p1938_p11 = por %p1937_p0, %p1936_p10 }
  0xfb   : > { %p1939_p7 = pnand %p1938_p11, %p1932_p1 }
  0xfd   : > { %1942 = shalt.err (!%p1939_p7)  }
  0xfe   : > { %318 = dma.hbm_to_vmem [thread:$0]  %s306_s11, 16, %s2910_s8, [#allocation3] }
  0xff   : > { %p321_p12 = scmp.gt.s32.totalorder %s2915_s6, 0  ;;  %p1397_p5 = scmp.lt.s32.totalorder %s2915_s6, 1023 }
 0x100   : > { %s2947_s5 = sld [smem:[#allocation5 + %s339_s20]]  ;;  %s2627_s9 = smov [#allocation2 + $0x11]  }
 0x101   : > { %s3648_s6 = smov (!%p321_p12, %s2915_s6), 0  ;;  %s355_s30 = sshll.u32 %s2627_s9, 4  ;;  %s2951_s30 = int_to_ptr.vmem [resolvable:$true] %s355_s30 }
 0x102   : > { %s359_s27 = sadd.s32 12, %s2688_s18  ;;  %s3650_s6 = smov (!%p1397_p5, %s3648_s6), 1023 }
 0x103   : > { %s2953_s10 = sld [smem:[#allocation5 + %s359_s27]]  ;;  %s1402_s29 = sshll.u32 %s3650_s6, 4 }
 0x104   : > { %s326_s8 = scalar_lea.hbm %s3617_s2, %s1402_s29 }
 0x105   : > { %s1943_s13 = scalar_lea.hbm %s326_s8, 16  ;;  %p1946_p13 = scmp.lt.s32.totalorder %s326_s8, %s3617_s2 }
 0x106   : > { %p341_p6 = scmp.gt.s32.totalorder %s2947_s5, 0  ;;  %p1944_p8 = scmp.ne.s32.totalorder %s326_s8, %s1943_s13 }
 0x107   : > { %p1947_p9 = scmp.lt.s32.totalorder %s2725_s22, %s1943_s13 }
 0x109   : > { %p1948_p2 = por %p1947_p9, %p1946_p13 }
 0x10b   : > { %p1949_p3 = pnand %p1948_p2, %p1944_p8 }
 0x10d   : > { %1952 = shalt.err (!%p1949_p3)  }
 0x10e   : > { %s1953_s6 = scalar_lea.vmem %s2933_s7, 16  ;;  %p1958_p1 = scmp.lt.s32.totalorder %s2933_s7, %s2691_s21 }
 0x10f   : > { %p1954_p4 = scmp.ne.s32.totalorder %s2933_s7, %s1953_s6  ;;  %p1959_p10 = scmp.lt.s32.totalorder %s2734_s26, %s1953_s6 }
 0x111   : > { %p1960_p0 = por %p1959_p10, %p1958_p1 }
 0x113   : > { %p1961_p11 = pnand %p1960_p0, %p1954_p4 }
 0x115   : > { %1964 = shalt.err (!%p1961_p11)  }
 0x116   : > { %338 = dma.hbm_to_vmem [thread:$0]  %s326_s8, 16, %s2933_s7, [#allocation3] }
 0x117   : > { %s342_s16 = scalar_select %p341_p6, %s2947_s5, 0 }
 0x118   : > { %p1403_p7 = scmp.lt.s32.totalorder %s2947_s5, 1023  ;;  %s2628_s12 = smov [#allocation2 + $0x12]  }
 0x119   : > { %s375_s11 = sshll.u32 %s2628_s12, 4  ;;  %p361_p12 = scmp.gt.s32.totalorder %s2953_s10, 0  ;;  %s2976_s11 = int_to_ptr.vmem [resolvable:$true] %s375_s11 }
 0x11a   : > { %p1409_p5 = scmp.lt.s32.totalorder %s2953_s10, 1023  ;;  %s3652_s16 = smov (!%p1403_p7, %s342_s16), 1023 }
 0x11b   : > { %s362_s0 = scalar_select %p361_p12, %s2953_s10, 0 }
 0x11c   : > { %s1408_s24 = sshll.u32 %s3652_s16, 4  ;;  %s379_s27 = sadd.s32 13, %s2688_s18 }
 0x11d   : > { %s346_s9 = scalar_lea.hbm %s3617_s2, %s1408_s24 }
 0x11e   : > { %s1965_s29 = scalar_lea.hbm %s346_s9, 16  ;;  %p1968_p6 = scmp.lt.s32.totalorder %s346_s9, %s3617_s2 }
 0x11f   : > { %p1966_p8 = scmp.ne.s32.totalorder %s346_s9, %s1965_s29  ;;  %p1969_p13 = scmp.lt.s32.totalorder %s2725_s22, %s1965_s29 }
 0x121   : > { %p1970_p9 = por %p1969_p13, %p1968_p6 }
 0x123   : > { %p1971_p2 = pnand %p1970_p9, %p1966_p8 }
 0x125   : > { %1974 = shalt.err (!%p1971_p2)  }
 0x126   : > { %s1975_s5 = scalar_lea.vmem %s2951_s30, 16  ;;  %p1980_p4 = scmp.lt.s32.totalorder %s2951_s30, %s2691_s21 }
 0x127   : > { %p1976_p3 = scmp.ne.s32.totalorder %s2951_s30, %s1975_s5  ;;  %p1981_p1 = scmp.lt.s32.totalorder %s2734_s26, %s1975_s5 }
 0x129   : > { %p1982_p10 = por %p1981_p1, %p1980_p4 }
 0x12b   : > { %p1983_p0 = pnand %p1982_p10, %p1976_p3 }
 0x12d   : > { %1986 = shalt.err (!%p1983_p0)  }
 0x12e   : > { %358 = dma.hbm_to_vmem [thread:$0]  %s346_s9, 16, %s2951_s30, [#allocation3] }
 0x12f   : > { %s3654_s0 = smov (!%p1409_p5, %s362_s0), 1023  ;;  %s2994_s23 = sld [smem:[#allocation5 + %s379_s27]] }
 0x130   : > { %s1414_s8 = sshll.u32 %s3654_s0, 4  ;;  %s2629_s13 = smov [#allocation2 + $0x13]  }
 0x131   : > { %s395_s20 = sshll.u32 %s2629_s13, 4  ;;  %s366_s16 = scalar_lea.hbm %s3617_s2, %s1414_s8  ;;  %s2999_s20 = int_to_ptr.vmem [resolvable:$true] %s395_s20 }
 0x132   : > { %s1987_s12 = scalar_lea.hbm %s366_s16, 16  ;;  %p1990_p7 = scmp.lt.s32.totalorder %s366_s16, %s3617_s2 }
 0x133   : > { %p1988_p11 = scmp.ne.s32.totalorder %s366_s16, %s1987_s12  ;;  %p1991_p12 = scmp.lt.s32.totalorder %s2725_s22, %s1987_s12 }
 0x135   : > { %p1992_p8 = por %p1991_p12, %p1990_p7 }
 0x137   : > { %p1993_p5 = pnand %p1992_p8, %p1988_p11 }
 0x139   : > { %1996 = shalt.err (!%p1993_p5)  }
 0x13a   : > { %s1997_s30 = scalar_lea.vmem %s2976_s11, 16  ;;  %p2002_p13 = scmp.lt.s32.totalorder %s2976_s11, %s2691_s21 }
 0x13b   : > { %p1998_p6 = scmp.ne.s32.totalorder %s2976_s11, %s1997_s30  ;;  %p2003_p9 = scmp.lt.s32.totalorder %s2734_s26, %s1997_s30 }
 0x13d   : > { %p2004_p2 = por %p2003_p9, %p2002_p13 }
 0x13f   : > { %p2005_p3 = pnand %p2004_p2, %p1998_p6 }
 0x141   : > { %2008 = shalt.err (!%p2005_p3)  }
 0x142   : > { %378 = dma.hbm_to_vmem [thread:$0]  %s366_s16, 16, %s2976_s11, [#allocation3] }
 0x143   : > { %s399_s10 = sadd.s32 14, %s2688_s18  ;;  %s2630_s4 = smov [#allocation2 + $0x14]  }
 0x144   : > { %s3012_s0 = sld [smem:[#allocation5 + %s399_s10]]  ;;  %s415_s9 = sshll.u32 %s2630_s4, 4  ;;  %s3016_s9 = int_to_ptr.vmem [resolvable:$true] %s415_s9 }
 0x145   : > { %p381_p4 = scmp.gt.s32.totalorder %s2994_s23, 0  ;;  %p1415_p1 = scmp.lt.s32.totalorder %s2994_s23, 1023 }
 0x146   : > { %s419_s27 = sadd.s32 15, %s2688_s18  ;;  %s2631_s7 = smov [#allocation2 + $0x18]  }
 0x147   : > { %s3656_s23 = smov (!%p381_p4, %s2994_s23), 0  ;;  %s3020_s29 = sld [smem:[#allocation5 + %s419_s27]] }
 0x148   : > { %s3658_s23 = smov (!%p1415_p1, %s3656_s23), 1023  ;;  %s435_s15 = sshll.u32 %s2631_s7, 4  ;;  %s3027_s15 = int_to_ptr.vmem [resolvable:$true] %s435_s15 }
 0x149   : > { %s1420_s11 = sshll.u32 %s3658_s23, 4 }
 0x14a   : > { %p401_p10 = scmp.gt.s32.totalorder %s3012_s0, 0  ;;  %p1421_p0 = scmp.lt.s32.totalorder %s3012_s0, 1023 }
 0x14b   : > { %s386_s13 = scalar_lea.hbm %s3617_s2, %s1420_s11 }
 0x14c   : > { %s2009_s14 = scalar_lea.hbm %s386_s13, 16  ;;  %p2012_p7 = scmp.lt.s32.totalorder %s386_s13, %s3617_s2 }
 0x14d   : > { %p2010_p11 = scmp.ne.s32.totalorder %s386_s13, %s2009_s14  ;;  %p2013_p12 = scmp.lt.s32.totalorder %s2725_s22, %s2009_s14 }
 0x14f   : > { %p2014_p8 = por %p2013_p12, %p2012_p7 }
 0x151   : > { %p2015_p5 = pnand %p2014_p8, %p2010_p11 }
 0x153   : > { %2018 = shalt.err (!%p2015_p5)  }
 0x154   : > { %s2019_s23 = scalar_lea.vmem %s2999_s20, 16  ;;  %p2024_p13 = scmp.lt.s32.totalorder %s2999_s20, %s2691_s21 }
 0x155   : > { %p2020_p6 = scmp.ne.s32.totalorder %s2999_s20, %s2019_s23  ;;  %p2025_p9 = scmp.lt.s32.totalorder %s2734_s26, %s2019_s23 }
 0x157   : > { %p2026_p2 = por %p2025_p9, %p2024_p13 }
 0x159   : > { %p2027_p3 = pnand %p2026_p2, %p2020_p6 }
 0x15b   : > { %2030 = shalt.err (!%p2027_p3)  }
 0x15c   : > { %398 = dma.hbm_to_vmem [thread:$0]  %s386_s13, 16, %s2999_s20, [#allocation3] }
 0x15d   : > { %s402_s12 = scalar_select %p401_p10, %s3012_s0, 0 }
 0x15e   : > { %p421_p4 = scmp.gt.s32.totalorder %s3020_s29, 0  ;;  %p1427_p1 = scmp.lt.s32.totalorder %s3020_s29, 1023 }
 0x15f   : > { %s3660_s12 = smov (!%p1421_p0, %s402_s12), 1023  ;;  %s439_s30 = sadd.s32 16, %s2688_s18 }
 0x160   : > { %s422_s24 = scalar_select %p421_p4, %s3020_s29, 0 }
 0x161   : > { %s1426_s19 = sshll.u32 %s3660_s12, 4  ;;  %s3051_s11 = sld [smem:[#allocation5 + %s439_s30]] }
 0x162   : > { %s406_s27 = scalar_lea.hbm %s3617_s2, %s1426_s19 }
 0x163   : > { %s2031_s7 = scalar_lea.hbm %s406_s27, 16  ;;  %p2034_p7 = scmp.lt.s32.totalorder %s406_s27, %s3617_s2 }
 0x164   : > { %p2032_p11 = scmp.ne.s32.totalorder %s406_s27, %s2031_s7  ;;  %p2035_p10 = scmp.lt.s32.totalorder %s2725_s22, %s2031_s7 }
 0x166   : > { %p2036_p12 = por %p2035_p10, %p2034_p7 }
 0x168   : > { %p2037_p8 = pnand %p2036_p12, %p2032_p11 }
 0x16a   : > { %2040 = shalt.err (!%p2037_p8)  }
 0x16b   : > { %s2041_s20 = scalar_lea.vmem %s3016_s9, 16  ;;  %p2046_p5 = scmp.lt.s32.totalorder %s3016_s9, %s2691_s21 }
 0x16c   : > { %p2042_p0 = scmp.ne.s32.totalorder %s3016_s9, %s2041_s20  ;;  %p2047_p6 = scmp.lt.s32.totalorder %s2734_s26, %s2041_s20 }
 0x16e   : > { %p2048_p13 = por %p2047_p6, %p2046_p5 }
 0x170   : > { %p2049_p9 = pnand %p2048_p13, %p2042_p0 }
 0x172   : > { %2052 = shalt.err (!%p2049_p9)  }
 0x173   : > { %418 = dma.hbm_to_vmem [thread:$0]  %s406_s27, 16, %s3016_s9, [#allocation3] }
 0x174   : > { %s3662_s24 = smov (!%p1427_p1, %s422_s24), 1023  ;;  %s459_s0 = sadd.s32 17, %s2688_s18 }
 0x175   : > { %s1432_s13 = sshll.u32 %s3662_s24, 4  ;;  %s2632_s14 = smov [#allocation2 + $0x19]  }
 0x176   : > { %s455_s6 = sshll.u32 %s2632_s14, 4  ;;  %s426_s12 = scalar_lea.hbm %s3617_s2, %s1432_s13  ;;  %s3069_s6 = int_to_ptr.vmem [resolvable:$true] %s455_s6 }
 0x177   : > { %s2053_s19 = scalar_lea.hbm %s426_s12, 16  ;;  %p2056_p3 = scmp.lt.s32.totalorder %s426_s12, %s3617_s2 }
 0x178   : > { %p2054_p2 = scmp.ne.s32.totalorder %s426_s12, %s2053_s19  ;;  %p2057_p4 = scmp.lt.s32.totalorder %s2725_s22, %s2053_s19 }
 0x17a   : > { %p2058_p11 = por %p2057_p4, %p2056_p3 }
 0x17c   : > { %p2059_p7 = pnand %p2058_p11, %p2054_p2 }
 0x17e   : > { %2062 = shalt.err (!%p2059_p7)  }
 0x17f   : > { %s2063_s9 = scalar_lea.vmem %s3027_s15, 16  ;;  %p2068_p10 = scmp.lt.s32.totalorder %s3027_s15, %s2691_s21 }
 0x180   : > { %p2064_p1 = scmp.ne.s32.totalorder %s3027_s15, %s2063_s9  ;;  %p2069_p12 = scmp.lt.s32.totalorder %s2734_s26, %s2063_s9 }
 0x182   : > { %p2070_p8 = por %p2069_p12, %p2068_p10 }
 0x184   : > { %p2071_p0 = pnand %p2070_p8, %p2064_p1 }
 0x186   : > { %2074 = shalt.err (!%p2071_p0)  }
 0x187   : > { %438 = dma.hbm_to_vmem [thread:$0]  %s426_s12, 16, %s3027_s15, [#allocation3] }
 0x188   : > { %p441_p5 = scmp.gt.s32.totalorder %s3051_s11, 0  ;;  %p1433_p6 = scmp.lt.s32.totalorder %s3051_s11, 1023 }
 0x189   : > { %s3083_s29 = sld [smem:[#allocation5 + %s459_s0]]  ;;  %s2633_s24 = smov [#allocation2 + $0x1a]  }
 0x18a   : > { %s3664_s11 = smov (!%p441_p5, %s3051_s11), 0  ;;  %s475_s4 = sshll.u32 %s2633_s24, 4  ;;  %s3087_s4 = int_to_ptr.vmem [resolvable:$true] %s475_s4 }
 0x18b   : > { %s479_s27 = sadd.s32 18, %s2688_s18  ;;  %s3666_s11 = smov (!%p1433_p6, %s3664_s11), 1023 }
 0x18c   : > { %s3089_s7 = sld [smem:[#allocation5 + %s479_s27]]  ;;  %s1438_s5 = sshll.u32 %s3666_s11, 4 }
 0x18d   : > { %s446_s15 = scalar_lea.hbm %s3617_s2, %s1438_s5 }
 0x18e   : > { %s2075_s13 = scalar_lea.hbm %s446_s15, 16  ;;  %p2078_p2 = scmp.lt.s32.totalorder %s446_s15, %s3617_s2 }
 0x18f   : > { %p461_p13 = scmp.gt.s32.totalorder %s3083_s29, 0  ;;  %p2076_p9 = scmp.ne.s32.totalorder %s446_s15, %s2075_s13 }
 0x190   : > { %p2079_p3 = scmp.lt.s32.totalorder %s2725_s22, %s2075_s13 }
 0x192   : > { %p2080_p4 = por %p2079_p3, %p2078_p2 }
 0x194   : > { %p2081_p11 = pnand %p2080_p4, %p2076_p9 }
 0x196   : > { %2084 = shalt.err (!%p2081_p11)  }
 0x197   : > { %s2085_s11 = scalar_lea.vmem %s3069_s6, 16  ;;  %p2090_p1 = scmp.lt.s32.totalorder %s3069_s6, %s2691_s21 }
 0x198   : > { %p2086_p7 = scmp.ne.s32.totalorder %s3069_s6, %s2085_s11  ;;  %p2091_p10 = scmp.lt.s32.totalorder %s2734_s26, %s2085_s11 }
 0x19a   : > { %p2092_p12 = por %p2091_p10, %p2090_p1 }
 0x19c   : > { %p2093_p8 = pnand %p2092_p12, %p2086_p7 }
 0x19e   : > { %2096 = shalt.err (!%p2093_p8)  }
 0x19f   : > { %458 = dma.hbm_to_vmem [thread:$0]  %s446_s15, 16, %s3069_s6, [#allocation3] }
 0x1a0   : > { %s462_s16 = scalar_select %p461_p13, %s3083_s29, 0 }
 0x1a1   : > { %p1439_p0 = scmp.lt.s32.totalorder %s3083_s29, 1023  ;;  %s2634_s23 = smov [#allocation2 + $0x1b]  }
 0x1a2   : > { %s495_s12 = sshll.u32 %s2634_s23, 4  ;;  %p481_p5 = scmp.gt.s32.totalorder %s3089_s7, 0  ;;  %s3112_s12 = int_to_ptr.vmem [resolvable:$true] %s495_s12 }
 0x1a3   : > { %p1445_p6 = scmp.lt.s32.totalorder %s3089_s7, 1023  ;;  %s3668_s16 = smov (!%p1439_p0, %s462_s16), 1023 }
 0x1a4   : > { %s482_s19 = scalar_select %p481_p5, %s3089_s7, 0 }
 0x1a5   : > { %s1444_s30 = sshll.u32 %s3668_s16, 4  ;;  %s499_s27 = sadd.s32 19, %s2688_s18 }
 0x1a6   : > { %s466_s24 = scalar_lea.hbm %s3617_s2, %s1444_s30 }
 0x1a7   : > { %s2097_s5 = scalar_lea.hbm %s466_s24, 16  ;;  %p2100_p13 = scmp.lt.s32.totalorder %s466_s24, %s3617_s2 }
 0x1a8   : > { %p2098_p9 = scmp.ne.s32.totalorder %s466_s24, %s2097_s5  ;;  %p2101_p2 = scmp.lt.s32.totalorder %s2725_s22, %s2097_s5 }
 0x1aa   : > { %p2102_p3 = por %p2101_p2, %p2100_p13 }
 0x1ac   : > { %p2103_p4 = pnand %p2102_p3, %p2098_p9 }
 0x1ae   : > { %2106 = shalt.err (!%p2103_p4)  }
 0x1af   : > { %s2107_s29 = scalar_lea.vmem %s3087_s4, 16  ;;  %p2112_p7 = scmp.lt.s32.totalorder %s3087_s4, %s2691_s21 }
 0x1b0   : > { %p2108_p11 = scmp.ne.s32.totalorder %s3087_s4, %s2107_s29  ;;  %p2113_p1 = scmp.lt.s32.totalorder %s2734_s26, %s2107_s29 }
 0x1b2   : > { %p2114_p10 = por %p2113_p1, %p2112_p7 }
 0x1b4   : > { %p2115_p12 = pnand %p2114_p10, %p2108_p11 }
 0x1b6   : > { %2118 = shalt.err (!%p2115_p12)  }
 0x1b7   : > { %478 = dma.hbm_to_vmem [thread:$0]  %s466_s24, 16, %s3087_s4, [#allocation3] }
 0x1b8   : > { %s3670_s19 = smov (!%p1445_p6, %s482_s19), 1023  ;;  %s3130_s20 = sld [smem:[#allocation5 + %s499_s27]] }
 0x1b9   : > { %s1450_s15 = sshll.u32 %s3670_s19, 4  ;;  %s2635_s13 = smov [#allocation2 + $0x1c]  }
 0x1ba   : > { %s515_s0 = sshll.u32 %s2635_s13, 4  ;;  %s486_s16 = scalar_lea.hbm %s3617_s2, %s1450_s15  ;;  %s3135_s0 = int_to_ptr.vmem [resolvable:$true] %s515_s0 }
 0x1bb   : > { %s2119_s23 = scalar_lea.hbm %s486_s16, 16  ;;  %p2122_p0 = scmp.lt.s32.totalorder %s486_s16, %s3617_s2 }
 0x1bc   : > { %p2120_p8 = scmp.ne.s32.totalorder %s486_s16, %s2119_s23  ;;  %p2123_p5 = scmp.lt.s32.totalorder %s2725_s22, %s2119_s23 }
 0x1be   : > { %p2124_p9 = por %p2123_p5, %p2122_p0 }
 0x1c0   : > { %p2125_p6 = pnand %p2124_p9, %p2120_p8 }
 0x1c2   : > { %2128 = shalt.err (!%p2125_p6)  }
 0x1c3   : > { %s2129_s4 = scalar_lea.vmem %s3112_s12, 16  ;;  %p2134_p2 = scmp.lt.s32.totalorder %s3112_s12, %s2691_s21 }
 0x1c4   : > { %p2130_p13 = scmp.ne.s32.totalorder %s3112_s12, %s2129_s4  ;;  %p2135_p3 = scmp.lt.s32.totalorder %s2734_s26, %s2129_s4 }
 0x1c6   : > { %p2136_p4 = por %p2135_p3, %p2134_p2 }
 0x1c8   : > { %p2137_p11 = pnand %p2136_p4, %p2130_p13 }
 0x1ca   : > { %2140 = shalt.err (!%p2137_p11)  }
 0x1cb   : > { %498 = dma.hbm_to_vmem [thread:$0]  %s486_s16, 16, %s3112_s12, [#allocation3] }
 0x1cc   : > { %s519_s7 = sadd.s32 20, %s2688_s18  ;;  %s2636_s9 = smov [#allocation2 + $0x20]  }
 0x1cd   : > { %s3148_s19 = sld [smem:[#allocation5 + %s519_s7]]  ;;  %s535_s24 = sshll.u32 %s2636_s9, 4  ;;  %s3152_s24 = int_to_ptr.vmem [resolvable:$true] %s535_s24 }
 0x1ce   : > { %p501_p7 = scmp.gt.s32.totalorder %s3130_s20, 0  ;;  %p1451_p1 = scmp.lt.s32.totalorder %s3130_s20, 1023 }
 0x1cf   : > { %s539_s27 = sadd.s32 21, %s2688_s18  ;;  %s2637_s6 = smov [#allocation2 + $0x21]  }
 0x1d0   : > { %s3672_s20 = smov (!%p501_p7, %s3130_s20), 0  ;;  %s3156_s5 = sld [smem:[#allocation5 + %s539_s27]] }
 0x1d1   : > { %s3674_s20 = smov (!%p1451_p1, %s3672_s20), 1023  ;;  %s555_s8 = sshll.u32 %s2637_s6, 4  ;;  %s3163_s8 = int_to_ptr.vmem [resolvable:$true] %s555_s8 }
 0x1d2   : > { %s1456_s12 = sshll.u32 %s3674_s20, 4 }
 0x1d3   : > { %p521_p10 = scmp.gt.s32.totalorder %s3148_s19, 0  ;;  %p1457_p12 = scmp.lt.s32.totalorder %s3148_s19, 1023 }
 0x1d4   : > { %s506_s13 = scalar_lea.hbm %s3617_s2, %s1456_s12 }
 0x1d5   : > { %s2141_s14 = scalar_lea.hbm %s506_s13, 16  ;;  %p2144_p0 = scmp.lt.s32.totalorder %s506_s13, %s3617_s2 }
 0x1d6   : > { %p2142_p8 = scmp.ne.s32.totalorder %s506_s13, %s2141_s14  ;;  %p2145_p5 = scmp.lt.s32.totalorder %s2725_s22, %s2141_s14 }
 0x1d8   : > { %p2146_p9 = por %p2145_p5, %p2144_p0 }
 0x1da   : > { %p2147_p6 = pnand %p2146_p9, %p2142_p8 }
 0x1dc   : > { %2150 = shalt.err (!%p2147_p6)  }
 0x1dd   : > { %s2151_s20 = scalar_lea.vmem %s3135_s0, 16  ;;  %p2156_p2 = scmp.lt.s32.totalorder %s3135_s0, %s2691_s21 }
 0x1de   : > { %p2152_p13 = scmp.ne.s32.totalorder %s3135_s0, %s2151_s20  ;;  %p2157_p3 = scmp.lt.s32.totalorder %s2734_s26, %s2151_s20 }
 0x1e0   : > { %p2158_p4 = por %p2157_p3, %p2156_p2 }
 0x1e2   : > { %p2159_p11 = pnand %p2158_p4, %p2152_p13 }
 0x1e4   : > { %2162 = shalt.err (!%p2159_p11)  }
 0x1e5   : > { %518 = dma.hbm_to_vmem [thread:$0]  %s506_s13, 16, %s3135_s0, [#allocation3] }
 0x1e6   : > { %s522_s23 = scalar_select %p521_p10, %s3148_s19, 0 }
 0x1e7   : > { %p541_p7 = scmp.gt.s32.totalorder %s3156_s5, 0  ;;  %p1463_p1 = scmp.lt.s32.totalorder %s3156_s5, 1023 }
 0x1e8   : > { %s3676_s23 = smov (!%p1457_p12, %s522_s23), 1023  ;;  %s559_s4 = sadd.s32 22, %s2688_s18 }
 0x1e9   : > { %s542_s30 = scalar_select %p541_p7, %s3156_s5, 0 }
 0x1ea   : > { %s1462_s10 = sshll.u32 %s3676_s23, 4  ;;  %s3187_s12 = sld [smem:[#allocation5 + %s559_s4]] }
 0x1eb   : > { %s526_s27 = scalar_lea.hbm %s3617_s2, %s1462_s10 }
 0x1ec   : > { %s2163_s6 = scalar_lea.hbm %s526_s27, 16  ;;  %p2166_p0 = scmp.lt.s32.totalorder %s526_s27, %s3617_s2 }
 0x1ed   : > { %p2164_p8 = scmp.ne.s32.totalorder %s526_s27, %s2163_s6  ;;  %p2167_p10 = scmp.lt.s32.totalorder %s2725_s22, %s2163_s6 }
 0x1ef   : > { %p2168_p5 = por %p2167_p10, %p2166_p0 }
 0x1f1   : > { %p2169_p9 = pnand %p2168_p5, %p2164_p8 }
 0x1f3   : > { %2172 = shalt.err (!%p2169_p9)  }
 0x1f4   : > { %s2173_s0 = scalar_lea.vmem %s3152_s24, 16  ;;  %p2178_p6 = scmp.lt.s32.totalorder %s3152_s24, %s2691_s21 }
 0x1f5   : > { %p2174_p12 = scmp.ne.s32.totalorder %s3152_s24, %s2173_s0  ;;  %p2179_p13 = scmp.lt.s32.totalorder %s2734_s26, %s2173_s0 }
 0x1f7   : > { %p2180_p2 = por %p2179_p13, %p2178_p6 }
 0x1f9   : > { %p2181_p3 = pnand %p2180_p2, %p2174_p12 }
 0x1fb   : > { %2184 = shalt.err (!%p2181_p3)  }
 0x1fc   : > { %538 = dma.hbm_to_vmem [thread:$0]  %s526_s27, 16, %s3152_s24, [#allocation3] }
 0x1fd   : > { %s3678_s30 = smov (!%p1463_p1, %s542_s30), 1023  ;;  %s579_s19 = sadd.s32 23, %s2688_s18 }
 0x1fe   : > { %s1468_s13 = sshll.u32 %s3678_s30, 4  ;;  %s2638_s14 = smov [#allocation2 + $0x22]  }
 0x1ff   : > { %s575_s11 = sshll.u32 %s2638_s14, 4  ;;  %s546_s23 = scalar_lea.hbm %s3617_s2, %s1468_s13  ;;  %s3205_s11 = int_to_ptr.vmem [resolvable:$true] %s575_s11 }
 0x200   : > { %s2185_s10 = scalar_lea.hbm %s546_s23, 16  ;;  %p2188_p11 = scmp.lt.s32.totalorder %s546_s23, %s3617_s2 }
 0x201   : > { %p2186_p4 = scmp.ne.s32.totalorder %s546_s23, %s2185_s10  ;;  %p2189_p7 = scmp.lt.s32.totalorder %s2725_s22, %s2185_s10 }
 0x203   : > { %p2190_p8 = por %p2189_p7, %p2188_p11 }
 0x205   : > { %p2191_p0 = pnand %p2190_p8, %p2186_p4 }
 0x207   : > { %2194 = shalt.err (!%p2191_p0)  }
 0x208   : > { %s2195_s24 = scalar_lea.vmem %s3163_s8, 16  ;;  %p2200_p10 = scmp.lt.s32.totalorder %s3163_s8, %s2691_s21 }
 0x209   : > { %p2196_p1 = scmp.ne.s32.totalorder %s3163_s8, %s2195_s24  ;;  %p2201_p5 = scmp.lt.s32.totalorder %s2734_s26, %s2195_s24 }
 0x20b   : > { %p2202_p9 = por %p2201_p5, %p2200_p10 }
 0x20d   : > { %p2203_p12 = pnand %p2202_p9, %p2196_p1 }
 0x20f   : > { %2206 = shalt.err (!%p2203_p12)  }
 0x210   : > { %558 = dma.hbm_to_vmem [thread:$0]  %s546_s23, 16, %s3163_s8, [#allocation3] }
 0x211   : > { %p561_p6 = scmp.gt.s32.totalorder %s3187_s12, 0  ;;  %p1469_p13 = scmp.lt.s32.totalorder %s3187_s12, 1023 }
 0x212   : > { %s3219_s5 = sld [smem:[#allocation5 + %s579_s19]]  ;;  %s2639_s30 = smov [#allocation2 + $0x23]  }
 0x213   : > { %s3680_s12 = smov (!%p561_p6, %s3187_s12), 0  ;;  %s595_s9 = sshll.u32 %s2639_s30, 4  ;;  %s3223_s9 = int_to_ptr.vmem [resolvable:$true] %s595_s9 }
 0x214   : > { %s599_s27 = sadd.s32 24, %s2688_s18  ;;  %s3682_s12 = smov (!%p1469_p13, %s3680_s12), 1023 }
 0x215   : > { %s3225_s6 = sld [smem:[#allocation5 + %s599_s27]]  ;;  %s1474_s29 = sshll.u32 %s3682_s12, 4 }
 0x216   : > { %s566_s8 = scalar_lea.hbm %s3617_s2, %s1474_s29 }
 0x217   : > { %s2207_s13 = scalar_lea.hbm %s566_s8, 16  ;;  %p2210_p4 = scmp.lt.s32.totalorder %s566_s8, %s3617_s2 }
 0x218   : > { %p581_p2 = scmp.gt.s32.totalorder %s3219_s5, 0  ;;  %p2208_p3 = scmp.ne.s32.totalorder %s566_s8, %s2207_s13 }
 0x219   : > { %p2211_p11 = scmp.lt.s32.totalorder %s2725_s22, %s2207_s13 }
 0x21b   : > { %p2212_p7 = por %p2211_p11, %p2210_p4 }
 0x21d   : > { %p2213_p8 = pnand %p2212_p7, %p2208_p3 }
 0x21f   : > { %2216 = shalt.err (!%p2213_p8)  }
 0x220   : > { %s2217_s12 = scalar_lea.vmem %s3205_s11, 16  ;;  %p2222_p1 = scmp.lt.s32.totalorder %s3205_s11, %s2691_s21 }
 0x221   : > { %p2218_p0 = scmp.ne.s32.totalorder %s3205_s11, %s2217_s12  ;;  %p2223_p10 = scmp.lt.s32.totalorder %s2734_s26, %s2217_s12 }
 0x223   : > { %p2224_p5 = por %p2223_p10, %p2222_p1 }
 0x225   : > { %p2225_p9 = pnand %p2224_p5, %p2218_p0 }
 0x227   : > { %2228 = shalt.err (!%p2225_p9)  }
 0x228   : > { %578 = dma.hbm_to_vmem [thread:$0]  %s566_s8, 16, %s3205_s11, [#allocation3] }
 0x229   : > { %s582_s16 = scalar_select %p581_p2, %s3219_s5, 0 }
 0x22a   : > { %p1475_p12 = scmp.lt.s32.totalorder %s3219_s5, 1023  ;;  %s2640_s20 = smov [#allocation2 + $0x24]  }
 0x22b   : > { %s615_s23 = sshll.u32 %s2640_s20, 4  ;;  %p601_p6 = scmp.gt.s32.totalorder %s3225_s6, 0  ;;  %s3248_s23 = int_to_ptr.vmem [resolvable:$true] %s615_s23 }
 0x22c   : > { %p1481_p13 = scmp.lt.s32.totalorder %s3225_s6, 1023  ;;  %s3684_s16 = smov (!%p1475_p12, %s582_s16), 1023 }
 0x22d   : > { %s602_s10 = scalar_select %p601_p6, %s3225_s6, 0 }
 0x22e   : > { %s1480_s4 = sshll.u32 %s3684_s16, 4  ;;  %s619_s27 = sadd.s32 25, %s2688_s18 }
 0x22f   : > { %s586_s30 = scalar_lea.hbm %s3617_s2, %s1480_s4 }
 0x230   : > { %s2229_s29 = scalar_lea.hbm %s586_s30, 16  ;;  %p2232_p2 = scmp.lt.s32.totalorder %s586_s30, %s3617_s2 }
 0x231   : > { %p2230_p3 = scmp.ne.s32.totalorder %s586_s30, %s2229_s29  ;;  %p2233_p4 = scmp.lt.s32.totalorder %s2725_s22, %s2229_s29 }
 0x233   : > { %p2234_p11 = por %p2233_p4, %p2232_p2 }
 0x235   : > { %p2235_p7 = pnand %p2234_p11, %p2230_p3 }
 0x237   : > { %2238 = shalt.err (!%p2235_p7)  }
 0x238   : > { %s2239_s5 = scalar_lea.vmem %s3223_s9, 16  ;;  %p2244_p0 = scmp.lt.s32.totalorder %s3223_s9, %s2691_s21 }
 0x239   : > { %p2240_p8 = scmp.ne.s32.totalorder %s3223_s9, %s2239_s5  ;;  %p2245_p1 = scmp.lt.s32.totalorder %s2734_s26, %s2239_s5 }
 0x23b   : > { %p2246_p10 = por %p2245_p1, %p2244_p0 }
 0x23d   : > { %p2247_p5 = pnand %p2246_p10, %p2240_p8 }
 0x23f   : > { %2250 = shalt.err (!%p2247_p5)  }
 0x240   : > { %598 = dma.hbm_to_vmem [thread:$0]  %s586_s30, 16, %s3223_s9, [#allocation3] }
 0x241   : > { %s3686_s10 = smov (!%p1481_p13, %s602_s10), 1023  ;;  %s3266_s0 = sld [smem:[#allocation5 + %s619_s27]] }
 0x242   : > { %s1486_s8 = sshll.u32 %s3686_s10, 4  ;;  %s2641_s13 = smov [#allocation2 + $0x28]  }
 0x243   : > { %s635_s19 = sshll.u32 %s2641_s13, 4  ;;  %s606_s16 = scalar_lea.hbm %s3617_s2, %s1486_s8  ;;  %s3271_s19 = int_to_ptr.vmem [resolvable:$true] %s635_s19 }
 0x244   : > { %s2251_s20 = scalar_lea.hbm %s606_s16, 16  ;;  %p2254_p12 = scmp.lt.s32.totalorder %s606_s16, %s3617_s2 }
 0x245   : > { %p2252_p9 = scmp.ne.s32.totalorder %s606_s16, %s2251_s20  ;;  %p2255_p6 = scmp.lt.s32.totalorder %s2725_s22, %s2251_s20 }
 0x247   : > { %p2256_p3 = por %p2255_p6, %p2254_p12 }
 0x249   : > { %p2257_p13 = pnand %p2256_p3, %p2252_p9 }
 0x24b   : > { %2260 = shalt.err (!%p2257_p13)  }
 0x24c   : > { %s2261_s9 = scalar_lea.vmem %s3248_s23, 16  ;;  %p2266_p4 = scmp.lt.s32.totalorder %s3248_s23, %s2691_s21 }
 0x24d   : > { %p2262_p2 = scmp.ne.s32.totalorder %s3248_s23, %s2261_s9  ;;  %p2267_p11 = scmp.lt.s32.totalorder %s2734_s26, %s2261_s9 }
 0x24f   : > { %p2268_p7 = por %p2267_p11, %p2266_p4 }
 0x251   : > { %p2269_p8 = pnand %p2268_p7, %p2262_p2 }
 0x253   : > { %2272 = shalt.err (!%p2269_p8)  }
 0x254   : > { %618 = dma.hbm_to_vmem [thread:$0]  %s606_s16, 16, %s3248_s23, [#allocation3] }
 0x255   : > { %s639_s6 = sadd.s32 26, %s2688_s18  ;;  %s2642_s24 = smov [#allocation2 + $0x29]  }
 0x256   : > { %s3284_s10 = sld [smem:[#allocation5 + %s639_s6]]  ;;  %s655_s30 = sshll.u32 %s2642_s24, 4  ;;  %s3288_s30 = int_to_ptr.vmem [resolvable:$true] %s655_s30 }
 0x257   : > { %p621_p0 = scmp.gt.s32.totalorder %s3266_s0, 0  ;;  %p1487_p1 = scmp.lt.s32.totalorder %s3266_s0, 1023 }
 0x258   : > { %s659_s27 = sadd.s32 27, %s2688_s18  ;;  %s2643_s11 = smov [#allocation2 + $0x2a]  }
 0x259   : > { %s3688_s0 = smov (!%p621_p0, %s3266_s0), 0  ;;  %s3292_s29 = sld [smem:[#allocation5 + %s659_s27]] }
 0x25a   : > { %s3690_s0 = smov (!%p1487_p1, %s3688_s0), 1023  ;;  %s675_s15 = sshll.u32 %s2643_s11, 4  ;;  %s3299_s15 = int_to_ptr.vmem [resolvable:$true] %s675_s15 }
 0x25b   : > { %s1492_s23 = sshll.u32 %s3690_s0, 4 }
 0x25c   : > { %p641_p10 = scmp.gt.s32.totalorder %s3284_s10, 0  ;;  %p1493_p5 = scmp.lt.s32.totalorder %s3284_s10, 1023 }
 0x25d   : > { %s626_s13 = scalar_lea.hbm %s3617_s2, %s1492_s23 }
 0x25e   : > { %s2273_s14 = scalar_lea.hbm %s626_s13, 16  ;;  %p2276_p12 = scmp.lt.s32.totalorder %s626_s13, %s3617_s2 }
 0x25f   : > { %p2274_p9 = scmp.ne.s32.totalorder %s626_s13, %s2273_s14  ;;  %p2277_p6 = scmp.lt.s32.totalorder %s2725_s22, %s2273_s14 }
 0x261   : > { %p2278_p3 = por %p2277_p6, %p2276_p12 }
 0x263   : > { %p2279_p13 = pnand %p2278_p3, %p2274_p9 }
 0x265   : > { %2282 = shalt.err (!%p2279_p13)  }
 0x266   : > { %s2283_s0 = scalar_lea.vmem %s3271_s19, 16  ;;  %p2288_p4 = scmp.lt.s32.totalorder %s3271_s19, %s2691_s21 }
 0x267   : > { %p2284_p2 = scmp.ne.s32.totalorder %s3271_s19, %s2283_s0  ;;  %p2289_p11 = scmp.lt.s32.totalorder %s2734_s26, %s2283_s0 }
 0x269   : > { %p2290_p7 = por %p2289_p11, %p2288_p4 }
 0x26b   : > { %p2291_p8 = pnand %p2290_p7, %p2284_p2 }
 0x26d   : > { %2294 = shalt.err (!%p2291_p8)  }
 0x26e   : > { %638 = dma.hbm_to_vmem [thread:$0]  %s626_s13, 16, %s3271_s19, [#allocation3] }
 0x26f   : > { %s642_s20 = scalar_select %p641_p10, %s3284_s10, 0 }
 0x270   : > { %p661_p0 = scmp.gt.s32.totalorder %s3292_s29, 0  ;;  %p1499_p1 = scmp.lt.s32.totalorder %s3292_s29, 1023 }
 0x271   : > { %s3692_s20 = smov (!%p1493_p5, %s642_s20), 1023  ;;  %s679_s9 = sadd.s32 28, %s2688_s18 }
 0x272   : > { %s662_s4 = scalar_select %p661_p0, %s3292_s29, 0 }
 0x273   : > { %s1498_s7 = sshll.u32 %s3692_s20, 4  ;;  %s3323_s23 = sld [smem:[#allocation5 + %s679_s9]] }
 0x274   : > { %s646_s27 = scalar_lea.hbm %s3617_s2, %s1498_s7 }
 0x275   : > { %s2295_s11 = scalar_lea.hbm %s646_s27, 16  ;;  %p2298_p12 = scmp.lt.s32.totalorder %s646_s27, %s3617_s2 }
 0x276   : > { %p2296_p9 = scmp.ne.s32.totalorder %s646_s27, %s2295_s11  ;;  %p2299_p10 = scmp.lt.s32.totalorder %s2725_s22, %s2295_s11 }
 0x278   : > { %p2300_p6 = por %p2299_p10, %p2298_p12 }
 0x27a   : > { %p2301_p3 = pnand %p2300_p6, %p2296_p9 }
 0x27c   : > { %2304 = shalt.err (!%p2301_p3)  }
 0x27d   : > { %s2305_s19 = scalar_lea.vmem %s3288_s30, 16  ;;  %p2310_p13 = scmp.lt.s32.totalorder %s3288_s30, %s2691_s21 }
 0x27e   : > { %p2306_p5 = scmp.ne.s32.totalorder %s3288_s30, %s2305_s19  ;;  %p2311_p2 = scmp.lt.s32.totalorder %s2734_s26, %s2305_s19 }
 0x280   : > { %p2312_p4 = por %p2311_p2, %p2310_p13 }
 0x282   : > { %p2313_p11 = pnand %p2312_p4, %p2306_p5 }
 0x284   : > { %2316 = shalt.err (!%p2313_p11)  }
 0x285   : > { %658 = dma.hbm_to_vmem [thread:$0]  %s646_s27, 16, %s3288_s30, [#allocation3] }
 0x286   : > { %s3694_s4 = smov (!%p1499_p1, %s662_s4), 1023  ;;  %s699_s10 = sadd.s32 29, %s2688_s18 }
 0x287   : > { %s1504_s13 = sshll.u32 %s3694_s4, 4  ;;  %s2644_s14 = smov [#allocation2 + $0x2b]  }
 0x288   : > { %s695_s12 = sshll.u32 %s2644_s14, 4  ;;  %s666_s20 = scalar_lea.hbm %s3617_s2, %s1504_s13  ;;  %s3341_s12 = int_to_ptr.vmem [resolvable:$true] %s695_s12 }
 0x289   : > { %s2317_s7 = scalar_lea.hbm %s666_s20, 16  ;;  %p2320_p8 = scmp.lt.s32.totalorder %s666_s20, %s3617_s2 }
 0x28a   : > { %p2318_p7 = scmp.ne.s32.totalorder %s666_s20, %s2317_s7  ;;  %p2321_p0 = scmp.lt.s32.totalorder %s2725_s22, %s2317_s7 }
 0x28c   : > { %p2322_p9 = por %p2321_p0, %p2320_p8 }
 0x28e   : > { %p2323_p12 = pnand %p2322_p9, %p2318_p7 }
 0x290   : > { %2326 = shalt.err (!%p2323_p12)  }
 0x291   : > { %s2327_s30 = scalar_lea.vmem %s3299_s15, 16  ;;  %p2332_p10 = scmp.lt.s32.totalorder %s3299_s15, %s2691_s21 }
 0x292   : > { %p2328_p1 = scmp.ne.s32.totalorder %s3299_s15, %s2327_s30  ;;  %p2333_p6 = scmp.lt.s32.totalorder %s2734_s26, %s2327_s30 }
 0x294   : > { %p2334_p3 = por %p2333_p6, %p2332_p10 }
 0x296   : > { %p2335_p5 = pnand %p2334_p3, %p2328_p1 }
 0x298   : > { %2338 = shalt.err (!%p2335_p5)  }
 0x299   : > { %678 = dma.hbm_to_vmem [thread:$0]  %s666_s20, 16, %s3299_s15, [#allocation3] }
 0x29a   : > { %p681_p13 = scmp.gt.s32.totalorder %s3323_s23, 0  ;;  %p1505_p2 = scmp.lt.s32.totalorder %s3323_s23, 1023 }
 0x29b   : > { %s3355_s29 = sld [smem:[#allocation5 + %s699_s10]]  ;;  %s2645_s4 = smov [#allocation2 + $0x2c]  }
 0x29c   : > { %s3696_s23 = smov (!%p681_p13, %s3323_s23), 0  ;;  %s715_s24 = sshll.u32 %s2645_s4, 4  ;;  %s3359_s24 = int_to_ptr.vmem [resolvable:$true] %s715_s24 }
 0x29d   : > { %s719_s27 = sadd.s32 30, %s2688_s18  ;;  %s3698_s23 = smov (!%p1505_p2, %s3696_s23), 1023 }
 0x29e   : > { %s3361_s11 = sld [smem:[#allocation5 + %s719_s27]]  ;;  %s1510_s5 = sshll.u32 %s3698_s23, 4 }
 0x29f   : > { %s686_s15 = scalar_lea.hbm %s3617_s2, %s1510_s5 }
 0x2a0   : > { %s2339_s13 = scalar_lea.hbm %s686_s15, 16  ;;  %p2342_p7 = scmp.lt.s32.totalorder %s686_s15, %s3617_s2 }
 0x2a1   : > { %p701_p4 = scmp.gt.s32.totalorder %s3355_s29, 0  ;;  %p2340_p11 = scmp.ne.s32.totalorder %s686_s15, %s2339_s13 }
 0x2a2   : > { %p2343_p8 = scmp.lt.s32.totalorder %s2725_s22, %s2339_s13 }
 0x2a4   : > { %p2344_p0 = por %p2343_p8, %p2342_p7 }
 0x2a6   : > { %p2345_p9 = pnand %p2344_p0, %p2340_p11 }
 0x2a8   : > { %2348 = shalt.err (!%p2345_p9)  }
 0x2a9   : > { %s2349_s23 = scalar_lea.vmem %s3341_s12, 16  ;;  %p2354_p1 = scmp.lt.s32.totalorder %s3341_s12, %s2691_s21 }
 0x2aa   : > { %p2350_p12 = scmp.ne.s32.totalorder %s3341_s12, %s2349_s23  ;;  %p2355_p10 = scmp.lt.s32.totalorder %s2734_s26, %s2349_s23 }
 0x2ac   : > { %p2356_p6 = por %p2355_p10, %p2354_p1 }
 0x2ae   : > { %p2357_p3 = pnand %p2356_p6, %p2350_p12 }
 0x2b0   : > { %2360 = shalt.err (!%p2357_p3)  }
 0x2b1   : > { %698 = dma.hbm_to_vmem [thread:$0]  %s686_s15, 16, %s3341_s12, [#allocation3] }
 0x2b2   : > { %s702_s16 = scalar_select %p701_p4, %s3355_s29, 0 }
 0x2b3   : > { %p1511_p5 = scmp.lt.s32.totalorder %s3355_s29, 1023  ;;  %s2646_s0 = smov [#allocation2 + $0x30]  }
 0x2b4   : > { %s735_s20 = sshll.u32 %s2646_s0, 4  ;;  %p721_p13 = scmp.gt.s32.totalorder %s3361_s11, 0  ;;  %s3384_s20 = int_to_ptr.vmem [resolvable:$true] %s735_s20 }
 0x2b5   : > { %p1517_p2 = scmp.lt.s32.totalorder %s3361_s11, 1023  ;;  %s3700_s16 = smov (!%p1511_p5, %s702_s16), 1023 }
 0x2b6   : > { %s722_s7 = scalar_select %p721_p13, %s3361_s11, 0 }
 0x2b7   : > { %s1516_s9 = sshll.u32 %s3700_s16, 4  ;;  %s739_s27 = sadd.s32 31, %s2688_s18 }
 0x2b8   : > { %s706_s4 = scalar_lea.hbm %s3617_s2, %s1516_s9 }
 0x2b9   : > { %s2361_s5 = scalar_lea.hbm %s706_s4, 16  ;;  %p2364_p4 = scmp.lt.s32.totalorder %s706_s4, %s3617_s2 }
 0x2ba   : > { %p2362_p11 = scmp.ne.s32.totalorder %s706_s4, %s2361_s5  ;;  %p2365_p7 = scmp.lt.s32.totalorder %s2725_s22, %s2361_s5 }
 0x2bc   : > { %p2366_p8 = por %p2365_p7, %p2364_p4 }
 0x2be   : > { %p2367_p0 = pnand %p2366_p8, %p2362_p11 }
 0x2c0   : > { %2370 = shalt.err (!%p2367_p0)  }
 0x2c1   : > { %s2371_s29 = scalar_lea.vmem %s3359_s24, 16  ;;  %p2376_p12 = scmp.lt.s32.totalorder %s3359_s24, %s2691_s21 }
 0x2c2   : > { %p2372_p9 = scmp.ne.s32.totalorder %s3359_s24, %s2371_s29  ;;  %p2377_p1 = scmp.lt.s32.totalorder %s2734_s26, %s2371_s29 }
 0x2c4   : > { %p2378_p10 = por %p2377_p1, %p2376_p12 }
 0x2c6   : > { %p2379_p6 = pnand %p2378_p10, %p2372_p9 }
 0x2c8   : > { %2382 = shalt.err (!%p2379_p6)  }
 0x2c9   : > { %718 = dma.hbm_to_vmem [thread:$0]  %s706_s4, 16, %s3359_s24, [#allocation3] }
 0x2ca   : > { %s3702_s7 = smov (!%p1517_p2, %s722_s7), 1023  ;;  %s3402_s19 = sld [smem:[#allocation5 + %s739_s27]] }
 0x2cb   : > { %s1522_s15 = sshll.u32 %s3702_s7, 4  ;;  %s2647_s23 = smov [#allocation2 + $0x31]  }
 0x2cc   : > { %s726_s14 = scalar_lea.hbm %s3617_s2, %s1522_s15  ;;  %s755_s16 = sshll.u32 %s2647_s23, 4  ;;  %s3418_s16 = int_to_ptr.vmem [resolvable:$true] %s755_s16 }
 0x2cd   : > { %s2383_s0 = scalar_lea.hbm %s726_s14, 16  ;;  %p2386_p5 = scmp.lt.s32.totalorder %s726_s14, %s3617_s2 }
 0x2ce   : > { %p2384_p3 = scmp.ne.s32.totalorder %s726_s14, %s2383_s0  ;;  %p2387_p13 = scmp.lt.s32.totalorder %s2725_s22, %s2383_s0 }
 0x2d0   : > { %p2388_p11 = por %p2387_p13, %p2386_p5 }
 0x2d2   : > { %p2389_p4 = pnand %p2388_p11, %p2384_p3 }
 0x2d4   : > { %2392 = shalt.err (!%p2389_p4)  }
 0x2d5   : > { %s2393_s24 = scalar_lea.vmem %s3384_s20, 16  ;;  %p2398_p7 = scmp.lt.s32.totalorder %s3384_s20, %s2691_s21 }
 0x2d6   : > { %p2394_p2 = scmp.ne.s32.totalorder %s3384_s20, %s2393_s24  ;;  %p2399_p8 = scmp.lt.s32.totalorder %s2734_s26, %s2393_s24 }
 0x2d8   : > { %p2400_p0 = por %p2399_p8, %p2398_p7 }
 0x2da   : > { %p2401_p9 = pnand %p2400_p0, %p2394_p2 }
 0x2dc   : > { %2404 = shalt.err (!%p2401_p9)  }
 0x2dd   : > { %738 = dma.hbm_to_vmem [thread:$0]  %s726_s14, 16, %s3384_s20, [#allocation3] }
 0x2de   : > { %s759_s11 = sadd.s32 32, %s2688_s18  ;;  %p741_p12 = scmp.gt.s32.totalorder %s3402_s19, 0 }
 0x2df   : > { %s3420_s7 = sld [smem:[#allocation5 + %s759_s11]]  ;;  %p1523_p1 = scmp.lt.s32.totalorder %s3402_s19, 1023 }
 0x2e0   : > { %s2648_s30 = smov [#allocation2 + $0x32]   ;;  %s779_s27 = sadd.s32 33, %s2688_s18 }
 0x2e1   : > { %s775_s4 = sshll.u32 %s2648_s30, 4  ;;  %s3704_s19 = smov (!%p741_p12, %s3402_s19), 0  ;;  %s3429_s4 = int_to_ptr.vmem [resolvable:$true] %s775_s4 }
 0x2e2   : > { %s3426_s5 = sld [smem:[#allocation5 + %s779_s27]]  ;;  %s3706_s19 = smov (!%p1523_p1, %s3704_s19), 1023 }
 0x2e3   : > { %s1528_s20 = sshll.u32 %s3706_s19, 4  ;;  %s2649_s15 = smov [#allocation2 + $0x33]  }
 0x2e4   : > { %s746_s29 = scalar_lea.hbm %s3617_s2, %s1528_s20  ;;  %s3435_s13 = sshll.u32 %s2649_s15, 4  ;;  %s796_s13 = int_to_ptr.vmem [resolvable:$true] %s3435_s13 }
 0x2e5   : > { %p761_p10 = scmp.gt.s32.totalorder %s3420_s7, 0  ;;  %p1529_p6 = scmp.lt.s32.totalorder %s3420_s7, 1023 }
 0x2e6   : > { %s2405_s10 = scalar_lea.hbm %s746_s29, 16  ;;  %p2408_p5 = scmp.lt.s32.totalorder %s746_s29, %s3617_s2 }
 0x2e7   : > { %p2406_p3 = scmp.ne.s32.totalorder %s746_s29, %s2405_s10  ;;  %p2409_p13 = scmp.lt.s32.totalorder %s2725_s22, %s2405_s10 }
 0x2e9   : > { %p2410_p11 = por %p2409_p13, %p2408_p5 }
 0x2eb   : > { %p2411_p4 = pnand %p2410_p11, %p2406_p3 }
 0x2ed   : > { %2414 = shalt.err (!%p2411_p4)  }
 0x2ee   : > { %s2415_s19 = scalar_lea.vmem %s3418_s16, 16  ;;  %p2420_p7 = scmp.lt.s32.totalorder %s3418_s16, %s2691_s21 }
 0x2ef   : > { %p2416_p2 = scmp.ne.s32.totalorder %s3418_s16, %s2415_s19  ;;  %p2421_p8 = scmp.lt.s32.totalorder %s2734_s26, %s2415_s19 }
 0x2f1   : > { %p2422_p0 = por %p2421_p8, %p2420_p7 }
 0x2f3   : > { %p2423_p9 = pnand %p2422_p0, %p2416_p2 }
 0x2f5   : > { %2426 = shalt.err (!%p2423_p9)  }
 0x2f6   : > { %758 = dma.hbm_to_vmem [thread:$0]  %s746_s29, 16, %s3418_s16, [#allocation3] }
 0x2f7   : > { %s762_s0 = scalar_select %p761_p10, %s3420_s7, 0 }
 0x2f8   : > { %p781_p12 = scmp.gt.s32.totalorder %s3426_s5, 0  ;;  %p1535_p1 = scmp.lt.s32.totalorder %s3426_s5, 1023 }
 0x2f9   : > { %s3708_s0 = smov (!%p1529_p6, %s762_s0), 1023  ;;  %s799_s24 = sadd.s32 34, %s2688_s18 }
 0x2fa   : > { %s782_s9 = scalar_select %p781_p12, %s3426_s5, 0 }
 0x2fb   : > { %s1534_s6 = sshll.u32 %s3708_s0, 4  ;;  %s3459_s20 = sld [smem:[#allocation5 + %s799_s24]] }
 0x2fc   : > { %s766_s27 = scalar_lea.hbm %s3617_s2, %s1534_s6 }
 0x2fd   : > { %s2427_s12 = scalar_lea.hbm %s766_s27, 16  ;;  %p2430_p5 = scmp.lt.s32.totalorder %s766_s27, %s3617_s2 }
 0x2fe   : > { %p2428_p3 = scmp.ne.s32.totalorder %s766_s27, %s2427_s12  ;;  %p2431_p10 = scmp.lt.s32.totalorder %s2725_s22, %s2427_s12 }
 0x300   : > { %p2432_p13 = por %p2431_p10, %p2430_p5 }
 0x302   : > { %p2433_p11 = pnand %p2432_p13, %p2428_p3 }
 0x304   : > { %2436 = shalt.err (!%p2433_p11)  }
 0x305   : > { %s2437_s16 = scalar_lea.vmem %s3429_s4, 16  ;;  %p2442_p4 = scmp.lt.s32.totalorder %s3429_s4, %s2691_s21 }
 0x306   : > { %p2438_p6 = scmp.ne.s32.totalorder %s3429_s4, %s2437_s16  ;;  %p2443_p2 = scmp.lt.s32.totalorder %s2734_s26, %s2437_s16 }
 0x308   : > { %p2444_p7 = por %p2443_p2, %p2442_p4 }
 0x30a   : > { %p2445_p8 = pnand %p2444_p7, %p2438_p6 }
 0x30c   : > { %2448 = shalt.err (!%p2445_p8)  }
 0x30d   : > { %778 = dma.hbm_to_vmem [thread:$0]  %s766_s27, 16, %s3429_s4, [#allocation3] }
 0x30e   : > { %s3710_s9 = smov (!%p1535_p1, %s782_s9), 1023  ;;  %s819_s29 = sadd.s32 35, %s2688_s18 }
 0x30f   : > { %s1540_s7 = sshll.u32 %s3710_s9, 4  ;;  %s2650_s19 = smov [#allocation2 + $0x34]  }
 0x310   : > { %s786_s23 = scalar_lea.hbm %s3617_s2, %s1540_s7  ;;  %s815_s0 = sshll.u32 %s2650_s19, 4  ;;  %s816_s0 = int_to_ptr.vmem [resolvable:$true] %s815_s0 }
 0x311   : > { %s2449_s6 = scalar_lea.hbm %s786_s23, 16  ;;  %p2452_p9 = scmp.lt.s32.totalorder %s786_s23, %s3617_s2 }
 0x312   : > { %p2450_p0 = scmp.ne.s32.totalorder %s786_s23, %s2449_s6  ;;  %p2453_p12 = scmp.lt.s32.totalorder %s2725_s22, %s2449_s6 }
 0x314   : > { %p2454_p3 = por %p2453_p12, %p2452_p9 }
 0x316   : > { %p2455_p5 = pnand %p2454_p3, %p2450_p0 }
 0x318   : > { %2458 = shalt.err (!%p2455_p5)  }
 0x319   : > { %s2459_s4 = scalar_lea.vmem %s796_s13, 16  ;;  %p2464_p10 = scmp.lt.s32.totalorder %s796_s13, %s2691_s21 }
 0x31a   : > { %p2460_p1 = scmp.ne.s32.totalorder %s796_s13, %s2459_s4  ;;  %p2465_p13 = scmp.lt.s32.totalorder %s2734_s26, %s2459_s4 }
 0x31c   : > { %p2466_p11 = por %p2465_p13, %p2464_p10 }
 0x31e   : > { %p2467_p6 = pnand %p2466_p11, %p2460_p1 }
 0x320   : > { %2470 = shalt.err (!%p2467_p6)  }
 0x321   : > { %798 = dma.hbm_to_vmem [thread:$0]  %s786_s23, 16, %s796_s13, [#allocation3] }
 0x322   : > { %p801_p4 = scmp.gt.s32.totalorder %s3459_s20, 0  ;;  %p1541_p2 = scmp.lt.s32.totalorder %s3459_s20, 1023 }
 0x323   : > { %s3486_s5 = sld [smem:[#allocation5 + %s819_s29]]  ;;  %s2651_s9 = smov [#allocation2 + $0x38]  }
 0x324   : > { %s3712_s20 = smov (!%p801_p4, %s3459_s20), 0  ;;  %s835_s30 = sshll.u32 %s2651_s9, 4  ;;  %s3492_s30 = int_to_ptr.vmem [resolvable:$true] %s835_s30 }
 0x325   : > { %s839_s27 = sadd.s32 36, %s2688_s18  ;;  %s3714_s20 = smov (!%p1541_p2, %s3712_s20), 1023 }
 0x326   : > { %s3490_s12 = sld [smem:[#allocation5 + %s839_s27]]  ;;  %s1546_s8 = sshll.u32 %s3714_s20, 4 }
 0x327   : > { %s806_s16 = scalar_lea.hbm %s3617_s2, %s1546_s8 }
 0x328   : > { %s2471_s7 = scalar_lea.hbm %s806_s16, 16  ;;  %p2474_p0 = scmp.lt.s32.totalorder %s806_s16, %s3617_s2 }
 0x329   : > { %p821_p7 = scmp.gt.s32.totalorder %s3486_s5, 0  ;;  %p2472_p8 = scmp.ne.s32.totalorder %s806_s16, %s2471_s7 }
 0x32a   : > { %p2475_p9 = scmp.lt.s32.totalorder %s2725_s22, %s2471_s7 }
 0x32c   : > { %p2476_p12 = por %p2475_p9, %p2474_p0 }
 0x32e   : > { %p2477_p3 = pnand %p2476_p12, %p2472_p8 }
 0x330   : > { %2480 = shalt.err (!%p2477_p3)  }
 0x331   : > { %s2481_s14 = scalar_lea.vmem %s816_s0, 16  ;;  %p2486_p1 = scmp.lt.s32.totalorder %s816_s0, %s2691_s21 }
 0x332   : > { %p2482_p5 = scmp.ne.s32.totalorder %s816_s0, %s2481_s14  ;;  %p2487_p10 = scmp.lt.s32.totalorder %s2734_s26, %s2481_s14 }
 0x334   : > { %p2488_p13 = por %p2487_p10, %p2486_p1 }
 0x336   : > { %p2489_p11 = pnand %p2488_p13, %p2482_p5 }
 0x338   : > { %2492 = shalt.err (!%p2489_p11)  }
 0x339   : > { %818 = dma.hbm_to_vmem [thread:$0]  %s806_s16, 16, %s816_s0, [#allocation3] }
 0x33a   : > { %s822_s20 = scalar_select %p821_p7, %s3486_s5, 0 }
 0x33b   : > { %p1547_p6 = scmp.lt.s32.totalorder %s3486_s5, 1023  ;;  %p841_p4 = scmp.gt.s32.totalorder %s3490_s12, 0 }
 0x33c   : > { %p1553_p2 = scmp.lt.s32.totalorder %s3490_s12, 1023  ;;  %s2652_s6 = smov [#allocation2 + $0x39]  }
 0x33d   : > { %s3716_s20 = smov (!%p1547_p6, %s822_s20), 1023  ;;  %s855_s24 = sshll.u32 %s2652_s6, 4  ;;  %s856_s24 = int_to_ptr.vmem [resolvable:$true] %s855_s24 }
 0x33e   : > { %s842_s23 = scalar_select %p841_p4, %s3490_s12, 0 }
 0x33f   : > { %s1552_s19 = sshll.u32 %s3716_s20, 4  ;;  %s859_s9 = sadd.s32 37, %s2688_s18 }
 0x340   : > { %s826_s4 = scalar_lea.hbm %s3617_s2, %s1552_s19 }
 0x341   : > { %s2493_s27 = scalar_lea.hbm %s826_s4, 16  ;;  %p2496_p0 = scmp.lt.s32.totalorder %s826_s4, %s3617_s2 }
 0x342   : > { %p2494_p8 = scmp.ne.s32.totalorder %s826_s4, %s2493_s27  ;;  %p2497_p7 = scmp.lt.s32.totalorder %s2725_s22, %s2493_s27 }
 0x344   : > { %p2498_p9 = por %p2497_p7, %p2496_p0 }
 0x346   : > { %p2499_p12 = pnand %p2498_p9, %p2494_p8 }
 0x348   : > { %2502 = shalt.err (!%p2499_p12)  }
 0x349   : > { %s2503_s5 = scalar_lea.vmem %s3492_s30, 16  ;;  %p2508_p5 = scmp.lt.s32.totalorder %s3492_s30, %s2691_s21 }
 0x34a   : > { %p2504_p3 = scmp.ne.s32.totalorder %s3492_s30, %s2503_s5  ;;  %p2509_p1 = scmp.lt.s32.totalorder %s2734_s26, %s2503_s5 }
 0x34c   : > { %p2510_p10 = por %p2509_p1, %p2508_p5 }
 0x34e   : > { %p2511_p13 = pnand %p2510_p10, %p2504_p3 }
 0x350   : > { %2514 = shalt.err (!%p2511_p13)  }
 0x351   : > { %838 = dma.hbm_to_vmem [thread:$0]  %s826_s4, 16, %s3492_s30, [#allocation3] }
 0x352   : > { %s3718_s23 = smov (!%p1553_p2, %s842_s23), 1023  ;;  %s3527_s15 = sld [smem:[#allocation5 + %s859_s9]] }
 0x353   : > { %s1558_s16 = sshll.u32 %s3718_s23, 4 }
 0x354   : > { %s846_s10 = scalar_lea.hbm %s3617_s2, %s1558_s16 }
 0x355   : > { %s2515_s14 = scalar_lea.hbm %s846_s10, 16  ;;  %p2518_p6 = scmp.lt.s32.totalorder %s846_s10, %s3617_s2 }
 0x356   : > { %p2516_p11 = scmp.ne.s32.totalorder %s846_s10, %s2515_s14  ;;  %p2519_p4 = scmp.lt.s32.totalorder %s2725_s22, %s2515_s14 }
 0x358   : > { %p2520_p8 = por %p2519_p4, %p2518_p6 }
 0x35a   : > { %p2521_p0 = pnand %p2520_p8, %p2516_p11 }
 0x35c   : > { %2524 = shalt.err (!%p2521_p0)  }
 0x35d   : > { %s2525_s30 = scalar_lea.vmem %s856_s24, 16  ;;  %p2530_p7 = scmp.lt.s32.totalorder %s856_s24, %s2691_s21 }
 0x35e   : > { %p2526_p2 = scmp.ne.s32.totalorder %s856_s24, %s2525_s30  ;;  %p2531_p9 = scmp.lt.s32.totalorder %s2734_s26, %s2525_s30 }
 0x360   : > { %p2532_p12 = por %p2531_p9, %p2530_p7 }
 0x362   : > { %p2533_p3 = pnand %p2532_p12, %p2526_p2 }
 0x364   : > { %2536 = shalt.err (!%p2533_p3)  }
 0x365   : > { %858 = dma.hbm_to_vmem [thread:$0]  %s846_s10, 16, %s856_s24, [#allocation3] }
 0x366   : > { %s879_s12 = sadd.s32 38, %s2688_s18  ;;  %s2653_s23 = smov [#allocation2 + $0x3a]  }
 0x367   : > { %s875_s6 = sshll.u32 %s2653_s23, 4  ;;  %s3539_s11 = sld [smem:[#allocation5 + %s879_s12]]  ;;  %s876_s6 = int_to_ptr.vmem [resolvable:$true] %s875_s6 }
 0x368   : > { %p861_p5 = scmp.gt.s32.totalorder %s3527_s15, 0  ;;  %p1559_p1 = scmp.lt.s32.totalorder %s3527_s15, 1023 }
 0x369   : > { %s2654_s0 = smov [#allocation2 + $0x3b]   ;;  %s899_s9 = sadd.s32 39, %s2688_s18 }
 0x36a   : > { %s895_s4 = sshll.u32 %s2654_s0, 4  ;;  %s3720_s15 = smov (!%p861_p5, %s3527_s15), 0  ;;  %s3548_s4 = int_to_ptr.vmem [resolvable:$true] %s895_s4 }
 0x36b   : > { %s3545_s24 = sld [smem:[#allocation5 + %s899_s9]]  ;;  %s3722_s15 = smov (!%p1559_p1, %s3720_s15), 1023 }
 0x36c   : > { %s1564_s27 = sshll.u32 %s3722_s15, 4 }
 0x36d   : > { %p881_p10 = scmp.gt.s32.totalorder %s3539_s11, 0  ;;  %s866_s5 = scalar_lea.hbm %s3617_s2, %s1564_s27 }
 0x36e   : > { %p1565_p13 = scmp.lt.s32.totalorder %s3539_s11, 1023  ;;  %s2537_s16 = scalar_lea.hbm %s866_s5, 16 }
 0x36f   : > { %p2538_p11 = scmp.ne.s32.totalorder %s866_s5, %s2537_s16  ;;  %p2540_p6 = scmp.lt.s32.totalorder %s866_s5, %s3617_s2 }
 0x370   : > { %p2541_p4 = scmp.lt.s32.totalorder %s2725_s22, %s2537_s16 }
 0x372   : > { %p2542_p8 = por %p2541_p4, %p2540_p6 }
 0x374   : > { %p2543_p0 = pnand %p2542_p8, %p2538_p11 }
 0x376   : > { %2546 = shalt.err (!%p2543_p0)  }
 0x377   : > { %s2547_s18 = scalar_lea.vmem %s876_s6, 16  ;;  %p2552_p7 = scmp.lt.s32.totalorder %s876_s6, %s2691_s21 }
 0x378   : > { %p2548_p2 = scmp.ne.s32.totalorder %s876_s6, %s2547_s18  ;;  %p2553_p9 = scmp.lt.s32.totalorder %s2734_s26, %s2547_s18 }
 0x37a   : > { %p2554_p12 = por %p2553_p9, %p2552_p7 }
 0x37c   : > { %p2555_p3 = pnand %p2554_p12, %p2548_p2 }
 0x37e   : > { %2558 = shalt.err (!%p2555_p3)  }
 0x37f   : > { %878 = dma.hbm_to_vmem [thread:$0]  %s866_s5, 16, %s876_s6, [#allocation3] }
 0x380   : > { %s882_s15 = scalar_select %p881_p10, %s3539_s11, 0 }
 0x381   : > { %p901_p5 = scmp.gt.s32.totalorder %s3545_s24, 0  ;;  %p1571_p1 = scmp.lt.s32.totalorder %s3545_s24, 1023 }
 0x382   : > { %s3724_s15 = smov (!%p1565_p13, %s882_s15), 1023  ;;  %s2655_s12 = smov [#allocation2 + $0x3c]  }
 0x383   : > { %s902_s10 = scalar_select %p901_p5, %s3545_s24, 0 }
 0x384   : > { %s1570_s14 = sshll.u32 %s3724_s15, 4  ;;  %s915_s23 = sshll.u32 %s2655_s12, 4  ;;  %s916_s23 = int_to_ptr.vmem [resolvable:$true] %s915_s23 }
 0x385   : > { %s886_s30 = scalar_lea.hbm %s3617_s2, %s1570_s14 }
 0x386   : > { %s2559_s6 = scalar_lea.hbm %s886_s30, 16  ;;  %p2562_p6 = scmp.lt.s32.totalorder %s886_s30, %s3617_s2 }
 0x387   : > { %p2560_p11 = scmp.ne.s32.totalorder %s886_s30, %s2559_s6  ;;  %p2563_p4 = scmp.lt.s32.totalorder %s2725_s22, %s2559_s6 }
 0x389   : > { %p2564_p10 = por %p2563_p4, %p2562_p6 }
 0x38b   : > { %p2565_p8 = pnand %p2564_p10, %p2560_p11 }
 0x38d   : > { %2568 = shalt.err (!%p2565_p8)  }
 0x38e   : > { %s2569_s11 = scalar_lea.vmem %s3548_s4, 16  ;;  %p2574_p0 = scmp.lt.s32.totalorder %s3548_s4, %s2691_s21 }
 0x38f   : > { %p2570_p13 = scmp.ne.s32.totalorder %s3548_s4, %s2569_s11  ;;  %p2575_p2 = scmp.lt.s32.totalorder %s2734_s26, %s2569_s11 }
 0x391   : > { %p2576_p7 = por %p2575_p2, %p2574_p0 }
 0x393   : > { %p2577_p9 = pnand %p2576_p7, %p2570_p13 }
 0x395   : > { %2580 = shalt.err (!%p2577_p9)  }
 0x396   : > { %898 = dma.hbm_to_vmem [thread:$0]  %s886_s30, 16, %s3548_s4, [#allocation3] }
 0x397   : > { %s3726_s10 = smov (!%p1571_p1, %s902_s10), 1023 }
 0x398   : > { %s1576_s27 = sshll.u32 %s3726_s10, 4 }
 0x399   : > { %s906_s5 = scalar_lea.hbm %s3617_s2, %s1576_s27 }
 0x39a   : > { %s2581_s16 = scalar_lea.hbm %s906_s5, 16  ;;  %p2584_p3 = scmp.lt.s32.totalorder %s906_s5, %s3617_s2 }
 0x39b   : > { %p2582_p12 = scmp.ne.s32.totalorder %s906_s5, %s2581_s16  ;;  %p2585_p5 = scmp.lt.s32.totalorder %s2725_s22, %s2581_s16 }
 0x39d   : > { %p2586_p11 = por %p2585_p5, %p2584_p3 }
 0x39f   : > { %p2587_p6 = pnand %p2586_p11, %p2582_p12 }
 0x3a1   : > { %2590 = shalt.err (!%p2587_p6)  }
 0x3a2   : > { %s2591_s18 = scalar_lea.vmem %s916_s23, 16  ;;  %p2596_p4 = scmp.lt.s32.totalorder %s916_s23, %s2691_s21 }
 0x3a3   : > { %p2592_p1 = scmp.ne.s32.totalorder %s916_s23, %s2591_s18  ;;  %p2597_p10 = scmp.lt.s32.totalorder %s2734_s26, %s2591_s18 }
 0x3a5   : > { %p2598_p8 = por %p2597_p10, %p2596_p4 }
 0x3a7   : > { %p2599_p13 = pnand %p2598_p8, %p2592_p1 }
 0x3a9   : > { %2602 = shalt.err (!%p2599_p13)  }
 0x3aa   : > { %918 = dma.hbm_to_vmem [thread:$0]  %s906_s5, 16, %s916_s23, [#allocation3] }
 0x3ab   : > { %2609 = dma.done.wait [#allocation3], 640 }
 0x3ac   : > { %2610 = vsyncadd [#allocation3], 4294966656  ;;  %v1014_v0 = vlaneseq  ;;  %v2656_v1 = vmov 1966171168   ;;  %v1000_v8 = vld [vmem:[%s2696_s25] sm:$0xff]  ;;  %vm1107_vm0 = vcmask 1044480  }
 0x3ad   : > { %v1012_v2 = vunpack.c.l.s4 %v2656_v1  ;;  %v1010_v11 = vcombine.high %v1000_v8, %v1000_v8  ;;  %v1001_v15 = vld [vmem:[#allocation2] sm:$0x1f]  ;;  %v1003_v20 = vld [vmem:[#allocation2 + $0x10] sm:$0x1f]  ;;  %v1002_v21 = vld [vmem:[#allocation2 + $0x8] sm:$0x1f] }
 0x3ae   : > { %v1015_v3 = vshrl.u32 %v1014_v0, 7  ;;  %v1141_v4 = vand.u32 127, %v1014_v0  ;;  %v1005_v27 = vld [vmem:[#allocation2 + $0x20] sm:$0x1f]  ;;  %v1004_v28 = vld [vmem:[#allocation2 + $0x18] sm:$0x1f] }
 0x3af   : > { %v1013_v5 = vunpack.c.0.s8 %v1012_v2  ;;  %v1006_v37 = vld [vmem:[#allocation2 + $0x28] sm:$0x1f]  ;;  %v1007_v44 = vld [vmem:[#allocation2 + $0x30] sm:$0x1f]  ;;  %v1008_v48 = vld [vmem:[#allocation2 + $0x38] sm:$0x1f] }
 0x3b0   : > { %v3592_v6 = vsub.s32 %v1141_v4, %v1015_v3  ;;  %v1061_v10 = vsub.s32 0, %v1015_v3  ;;  %vm1174_vm1 = vcmask 1041409   ;;  %vm1176_vm2 = vcmask 1042434  }
 0x3b1   : > { %v1016_v7 = vsub.s32 %v1013_v5, %v1015_v3  ;;  %vm1178_vm3 = vcmask 1043459   ;;  %vm1180_vm4 = vcmask 1044484   ;;  %vm1182_vm5 = vcmask 1045509  }
 0x3b2   : > { %vm1184_vm6 = vcmask 1046534   ;;  %vm1186_vm7 = vcmask 1047559   ;;  %vm1189_vm8 = vcmask 39936  }
 0x3b3   : > { %v1017_v9 = vrot.slane %v1000_v8, %v1016_v7  ;;  %v1024_v14 = vrot.slane %v1010_v11, %v1016_v7 }
 0x3b5   : > { %v1033_v12 = vrot.slane %v1017_v9, %v1016_v7  ;;  %v1025_v13 = vcombine.high %v1017_v9, %v1017_v9  ;;  %v1040_v19 = vrot.slane %v1024_v14, %v1016_v7  ;;  %v1026_v22 = vcombine.high %v1024_v14, %v1024_v14 }
 0x3b7   : > { %v1062_v16 = vrot.slane %v1033_v12, %v1061_v10  ;;  %v1055_v17 = vcombine.high %v1033_v12, %v1033_v12  ;;  %v1047_v18 = vrot.slane %v1025_v13, %v1016_v7  ;;  %v1078_v29 = vrot.slane %v1040_v19, %v1061_v10 }
 0x3b8   : > { %v1054_v30 = vrot.slane %v1026_v22, %v1016_v7  ;;  %v1056_v31 = vcombine.high %v1040_v19, %v1040_v19 }
 0x3b9   : > { %v1099_v23 = vmul.f32 %v1062_v16, %v1001_v15  ;;  %v1070_v24 = vrot.slane %v1055_v17, %v1061_v10  ;;  %v1066_v25 = vrot.slane %v1047_v18, %v1061_v10  ;;  %v1057_v26 = vcombine.high %v1047_v18, %v1047_v18 }
 0x3ba   : > { %v1103_v36 = vmul.f32 %v1078_v29, %v1005_v27  ;;  %v1082_v38 = vrot.slane %v1054_v30, %v1061_v10  ;;  %v1058_v39 = vcombine.high %v1054_v30, %v1054_v30  ;;  %v1086_v43 = vrot.slane %v1056_v31, %v1061_v10 }
 0x3bb   : > { %v1108_v32 = vsel %vm1107_vm0, %v1099_v23, 0.0  ;;  %v1101_v33 = vmul.f32 %v1070_v24, %v1003_v20  ;;  %v1100_v34 = vmul.f32 %v1066_v25, %v1002_v21  ;;  %v1074_v35 = vrot.slane %v1057_v26, %v1061_v10 }
 0x3bc   : > { %1109 = vadd.xlane.f32.xlu0 %v1108_v32  ;;  %v1104_v46 = vmul.f32 %v1082_v38, %v1006_v37  ;;  %v1090_v47 = vrot.slane %v1058_v39, %v1061_v10  ;;  %v1120_v49 = vsel %vm1107_vm0, %v1103_v36, 0.0  ;;  %v1105_v50 = vmul.f32 %v1086_v43, %v1007_v44 }
 0x3bd   : > { %v1114_v40 = vsel %vm1107_vm0, %v1101_v33, 0.0  ;;  %v1111_v41 = vsel %vm1107_vm0, %v1100_v34, 0.0  ;;  %v1102_v42 = vmul.f32 %v1074_v35, %v1004_v28 }
 0x3be   : > { %1115 = vadd.xlane.f32.xlu1 %v1114_v40  ;;  %v1123_v51 = vsel %vm1107_vm0, %v1104_v46, 0.0  ;;  %v1106_v52 = vmul.f32 %v1090_v47, %v1008_v48  ;;  %v1126_v53 = vsel %vm1107_vm0, %v1105_v50, 0.0 }
 0x3bf   : > { %v1117_v45 = vsel %vm1107_vm0, %v1102_v42, 0.0 }
 0x3c0   : > { %1112 = vadd.xlane.f32.xlu0 %v1111_v41  ;;  %v1129_v54 = vsel %vm1107_vm0, %v1106_v52, 0.0 }
 0x3c2   : > { %1118 = vadd.xlane.f32.xlu1 %v1117_v45 }
 0x3c4   : > { %1121 = vadd.xlane.f32.xlu0 %v1120_v49 }
 0x3c6   : > { %1124 = vadd.xlane.f32.xlu1 %v1123_v51 }
 0x3c8   : > { %1127 = vadd.xlane.f32.xlu0 %v1126_v53 }
 0x3ca   : > { %1130 = vadd.xlane.f32.xlu1 %v1129_v54 }
 0x445   : > { %v1110_v55 = vpop.xlane.xlu0 %1109 }
 0x446   : > { %v1145_v58 = vrot.slane %v1110_v55, %v3592_v6 }
 0x447   : > { %v1116_v56 = vpop.xlane.xlu1 %1115 }
 0x448   : > { %v1153_v60 = vrot.slane %v1116_v56, %v3592_v6 }
 0x449   : > { %v1113_v57 = vpop.xlane.xlu0 %1112 }
 0x44a   : > { %v1149_v59 = vrot.slane %v1113_v57, %v3592_v6 }
 0x44b   : > { %v1119_v61 = vpop.xlane.xlu1 %1118 }
 0x44c   : > { %v1175_v62 = vsel %vm1174_vm1, %v1149_v59, %v1145_v58  ;;  %v1157_v63 = vrot.slane %v1119_v61, %v3592_v6 }
 0x44d   : > { %v1177_v0 = vsel %vm1176_vm2, %v1153_v60, %v1175_v62  ;;  %v1122_v1 = vpop.xlane.xlu0 %1121 }
 0x44e   : > { %v1179_v2 = vsel %vm1178_vm3, %v1157_v63, %v1177_v0  ;;  %v1161_v3 = vrot.slane %v1122_v1, %v3592_v6 }
 0x44f   : > { %v1125_v4 = vpop.xlane.xlu1 %1124 }
 0x450   : > { %v1181_v5 = vsel %vm1180_vm4, %v1161_v3, %v1179_v2  ;;  %v1165_v7 = vrot.slane %v1125_v4, %v3592_v6 }
 0x451   : > { %v1128_v8 = vpop.xlane.xlu0 %1127 }
 0x452   : > { %v1183_v9 = vsel %vm1182_vm5, %v1165_v7, %v1181_v5  ;;  %v1169_v10 = vrot.slane %v1128_v8, %v3592_v6 }
 0x453   : > { %v1131_v11 = vpop.xlane.xlu1 %1130 }
 0x454   : > { %v1185_v12 = vsel %vm1184_vm6, %v1169_v10, %v1183_v9  ;;  %v1173_v13 = vrot.slane %v1131_v11, %v3592_v6 }
 0x456   : > { %v1187_v14 = vsel %vm1186_vm7, %v1173_v13, %v1185_v12 }
 0x457   : > { %1190 = vst.msk [vmem:[%s2701_s28] sm:$0xff] %vm1189_vm8, %v1187_v14 }
 0x458 PF: > { %s19_s17 = sadd.s32 1, %s2613_s17  }
 0x459   : > { %p16_p0 = scmp.ge.s32.totalorder %s19_s17, 4  }
 0x45b   :  { %18 = sbr.rel (!%p16_p0) target bundleno = 16 (0x10), region = 293 }
 0x460   :  { %1210 = vsyncmov [#allocation3] }
 0x463   :  { %s1211_s21 = vpop.sfrf %1210 }
 0x464   :  { %p1579_p2 = scmp.ne.s32.totalorder %s1211_s21, 0 }
 0x466   :  { %1215 = shalt.err (%p1579_p2)  }

</bundles_post_ra>
